<compile_context>
chip_gen: v7x
topology: tpu7x:2x2x1
jax: 0.10.0
libtpu: 0.0.40
codegen_flags: <defaults>
</compile_context>

<pallas_src>
import math

import jax
import jax.numpy as jnp
from jax import lax
from jax.experimental import pallas as pl
from jax.experimental.pallas import tpu as pltpu

_SQRT_HALF = 0.7071067811865476
_LANE = 128                     # pad channel dims to multiples of the 128-lane width
_SUBLANE = 8                    # pad the time axis to a multiple of 8 sublanes
_MATMUL_DTYPE = jnp.bfloat16    # MXU operand dtype (accumulation is always f32)
_ROWS_TARGET = 512              # target folded batch*time rows per grid step (MXU M)


def _round_up(n, m):
    return ((n + m - 1) // m) * m


def _gelu(x):
    # matches torch.nn.functional.gelu (erf-based, approximate='none'), in f32.
    # (tanh-approx GELU would move this work to the EUP slot at a small numerics cost)
    return 0.5 * x * (1.0 + lax.erf(x * _SQRT_HALF))


def _mm(a, w):
    # MXU matmul: cast the activation to the (bf16) weight dtype, accumulate in f32
    return jnp.dot(a.astype(w.dtype), w, preferred_element_type=jnp.float32)


def _fused_conv3(g, w_cat, b, d, M, m_lo, m_hi):
    """SAME dilated conv (kernel_size=3) as ONE fused MXU matmul.

    g: (M, Cin_p) f32 activation with M = Bt*T8 folded batch*time rows.
    w_cat: (3*Cin_p, Cout_p) bf16, tap order [-d, 0, +d]. b: (1, Cout_p) f32.
    Time shifts are aligned sublane rolls + per-element time masks, so the global
    roll never leaks rows across batch elements or reads time-pad rows.
    """
    sh_m = d % M            # tap ofs = -d : out[t] += g[t-d]
    sh_p = (-d) % M         # tap ofs = +d : out[t] += g[t+d]
    g_m = jnp.where(m_lo, pltpu.roll(g, sh_m, 0) if sh_m else g, 0.0)
    g_p = jnp.where(m_hi, pltpu.roll(g, sh_p, 0) if sh_p else g, 0.0)
    dt = w_cat.dtype
    g_cat = jnp.concatenate([g_m.astype(dt), g.astype(dt), g_p.astype(dt)], axis=1)
    return jnp.dot(g_cat, w_cat, preferred_element_type=jnp.float32) + b


def _make_fused_kernel(Bt, T, T8, dilations, has_proj, double_sigmoid):
    n_blocks = len(dilations)
    M = Bt * T8

    def kernel(*refs):
        out_ref = refs[-1]
        it = iter(refs[:-1])
        x_ref, tidx_ref = next(it), next(it)
        win_ref, bin_ref = next(it), next(it)

        row = tidx_ref[...]                      # (M, 1) per-element time index
        valid = row < T

        # ---- TSEncoder.input_fc ; mask == 'all_true' (eval) is a no-op ----
        h = _mm(x_ref[...], win_ref[...]) + bin_ref[...]          # (M, Hp) f32
        # (no where(valid) here: tap masks keep pad rows from reaching valid rows)

        # ---- DilatedConvEncoder: stack of ConvBlocks, all VMEM-resident ----
        for i in range(n_blocks):
            d = dilations[i]
            if has_proj[i]:
                wp, bp = next(it), next(it)
                res = _mm(h, wp[...]) + bp[...]                   # 1x1 projector
            else:
                res = h
            w1, b1, w2, b2 = next(it), next(it), next(it), next(it)
            # hoisted per-dilation tap masks, reused by conv1 and conv2
            m_lo = row >= d               # ofs = -d tap stays in-range / in-element
            m_hi = row < (T - d)          # ofs = +d tap stays in-range / in-element
            h1 = _fused_conv3(_gelu(h), w1[...], b1[...], d, M, m_lo, m_hi)
            h = _fused_conv3(_gelu(h1), w2[...], b2[...], d, M, m_lo, m_hi) + res
            h = jnp.where(valid, h, 0.0)  # keep time-pad rows zero/bounded

        # ---- repr_dropout: identity (eval). Per-element max-pool over valid time ----
        hm = jnp.where(valid, h, -jnp.inf).reshape(Bt, T8, h.shape[1])
        pooled = jnp.max(hm, axis=1)                              # (Bt, C)

        # ---- ProjectionHead: Linear -> BN(eval) -> ReLU -> Linear (-> sigmoid^2) ----
        hw1, hb1 = next(it), next(it)
        hsc, hsh = next(it), next(it)
        hw2, hb2 = next(it), next(it)
        z = _mm(pooled, hw1[...]) + hb1[...]
        z = z * hsc[...] + hsh[...]                 # BatchNorm1d with running stats
        z = jnp.maximum(z, 0.0)                     # ReLU
        y = _mm(z, hw2[...]) + hb2[...]
        if double_sigmoid:
            # ProjectionHead applies sigmoid (output_dims == 2) and FTClassifier
            # applies it again (p_output_dims == 2) -> sigmoid(sigmoid(.)) as in torch.
            y = jax.nn.sigmoid(jax.nn.sigmoid(y))
        out_ref[0] = y.astype(out_ref.dtype)        # lane-dense (Bt, 128) store

    return kernel


# ---------------- parameter preparation (padding / bf16 cast / tap fusion) ----------------
def prepare_params(params, p_output_dims, matmul_dtype=_MATMUL_DTYPE):
    """Pad channel dims to 128 lanes, fuse the 3 conv taps into a (3*Cin_p, Cout_p)
    weight, cast matmul weights to bf16, and flatten into the kernel's arg order."""
    mp = matmul_dtype
    f32 = jnp.float32

    def pad_mat(a, r, c):
        return jnp.pad(a, ((0, r - a.shape[0]), (0, c - a.shape[1])))

    def pad_bias(a, c):
        return jnp.pad(a, (0, c - a.shape[0])).reshape(1, c).astype(f32)

    flat = []
    cin = params["w_in"].shape[0]
    hp = _round_up(params["w_in"].shape[1], _LANE)
    flat.append(pad_mat(params["w_in"], cin, hp).astype(mp))
    flat.append(pad_bias(params["b_in"], hp))

    dilations, has_proj = [], []
    cprev_p = hp
    c_max = hp
    for blk in params["blocks"]:
        K, cin_l, cout_l = blk["w1"].shape
        # TODO(synk): only kernel_size == 3 (the spec's value) is tap-fused here.
        assert K == 3, "fused conv path assumes kernel_size == 3"
        cout_p = _round_up(cout_l, _LANE)
        c_max = max(c_max, cout_p)
        dilations.append(int(blk["dilation"]))
        has_proj.append(blk["proj"] is not None)
        if blk["proj"] is not None:
            wp, bp = blk["proj"]
            flat.append(pad_mat(wp, cprev_p, cout_p).astype(mp))
            flat.append(pad_bias(bp, cout_p))
        # fuse the 3 taps: (3, Cin_p, Cout_p) -> (3*Cin_p, Cout_p), tap order [-d, 0, +d]
        w1p = jnp.pad(blk["w1"], ((0, 0), (0, cprev_p - cin_l), (0, cout_p - cout_l)))
        flat.append(w1p.reshape(K * cprev_p, cout_p).astype(mp))
        flat.append(pad_bias(blk["b1"], cout_p))
        w2p = jnp.pad(blk["w2"], ((0, 0), (0, cout_p - cout_l), (0, cout_p - cout_l)))
        flat.append(w2p.reshape(K * cout_p, cout_p).astype(mp))
        flat.append(pad_bias(blk["b2"], cout_p))
        cprev_p = cout_p

    ph = params["proj_head"]
    phid_p = _round_up(ph["w1"].shape[1], _LANE)
    pout = int(ph["w2"].shape[1])
    pout_p = _round_up(pout, _LANE)          # lane-dense output columns
    c_max = max(c_max, phid_p, pout_p)
    eps = 1e-5
    scale = ph["gamma"] / jnp.sqrt(ph["running_var"] + eps)
    shift = ph["beta"] - ph["running_mean"] * scale
    flat.append(pad_mat(ph["w1"], cprev_p, phid_p).astype(mp))
    flat.append(pad_bias(ph["b1"], phid_p))
    flat.append(pad_bias(scale, phid_p))
    flat.append(pad_bias(shift, phid_p))
    flat.append(pad_mat(ph["w2"], phid_p, pout_p).astype(mp))
    flat.append(pad_bias(ph["b2"], pout_p))

    return {
        "flat": flat,
        "dilations": tuple(dilations),
        "has_proj": tuple(has_proj),
        "p_output_dims": pout,
        "pout_padded": int(pout_p),
        "double_sigmoid": p_output_dims == 2,
        "input_dims": int(cin),
        "c_max_padded": int(c_max),
        "n_blocks": len(dilations),
    }


def _const_spec(shape, single_buffer):
    """Spec for a grid-invariant input: whole array, constant index map.

    Default Pallas double-buffers every input (2x VMEM for blocks that never
    change across grid steps); when the constant footprint is big enough to
    matter we request single buffering via pipeline_mode=pl.Buffered(1)."""
    ndim = len(shape)
    imap = lambda b, _n=ndim: (0,) * _n
    if single_buffer and hasattr(pl, "Buffered"):
        try:
            return pl.BlockSpec(shape, imap, pipeline_mode=pl.Buffered(1))
        except TypeError:   # older jax without pipeline_mode on BlockSpec
            pass
    return pl.BlockSpec(shape, imap)


def _vmem_limit_bytes():
    """~3/4 of the chip's VMEM: ~96 MiB on v5e/v6e (128 MiB), ~48 MiB on v7x (64 MiB)."""
    try:
        cap = int(pltpu.get_tpu_info().vmem_capacity_bytes)
    except Exception:
        cap = 64 * 1024 * 1024
    return max(32 * 1024 * 1024, min(cap * 3 // 4, 100 * 1024 * 1024))


# ---------------- full forward (single fused pallas_call) ----------------
def ft_classifier_forward(prep, x):
    B, T, cin = x.shape
    assert cin == prep["input_dims"]
    T8 = _round_up(max(T, _SUBLANE), _SUBLANE)
    flat = prep["flat"]
    pout, pout_p = prep["p_output_dims"], prep["pout_padded"]
    c_max = prep["c_max_padded"]

    # ---- batch tiling: fold Bt elements into the matmul M (sublane) dimension ----
    # target >= ~512 folded rows so the MXU sees a deep M, capped so ~16 live f32
    # activations of shape (rows, c_max) stay well inside even v7x's 64 MiB VMEM.
    rows_budget = max(_SUBLANE, (8 * 1024 * 1024) // (16 * 4 * c_max))
    rows_target = min(_ROWS_TARGET, rows_budget)
    Bt = max(1, min(B, rows_target // T8))
    Bp = _round_up(B, Bt)
    nsteps = Bp // Bt
    M = Bt * T8

    xp = x.astype(jnp.float32)
    if Bp != B or T8 != T:
        xp = jnp.pad(xp, ((0, Bp - B), (0, T8 - T), (0, 0)))
    xp = xp.reshape(Bp * T8, cin)                 # host-side fold (free in XLA)
    # per-element time index of every folded row (drives SAME-pad / pooling masks)
    tidx = jnp.tile(jnp.arange(T8, dtype=jnp.int32), Bt).reshape(M, 1)

    kernel = _make_fused_kernel(Bt, T, T8, prep["dilations"], prep["has_proj"],
                                prep["double_sigmoid"])

    weight_bytes = sum(int(a.size) * a.dtype.itemsize for a in flat)
    single_buffer = weight_bytes >= (2 << 20)     # only worth it for big weight sets

    in_specs = [pl.BlockSpec((M, cin), lambda b: (b, 0)),     # one batch tile / step
                _const_spec(tidx.shape, single_buffer)]
    for a in flat:                                            # weights: DMA'd once
        in_specs.append(_const_spec(a.shape, single_buffer))

    # advisory cost estimate for XLA's scheduler
    flops = 0
    bytes_acc = int(xp.size) * 4 + int(tidx.size) * 4 + nsteps * Bt * pout_p * 4
    for a in flat:
        bytes_acc += int(a.size) * a.dtype.itemsize
        if a.ndim == 2 and a.shape[0] > 1:        # matmul weights (biases have 1 row)
            flops += 2 * Bp * T8 * a.shape[0] * a.shape[1]
    transcendentals = Bp * T8 * c_max * 2 * prep["n_blocks"] + Bp * pout_p * 2

    out = pl.pallas_call(
        kernel,
        out_shape=jax.ShapeDtypeStruct((nsteps, Bt, pout_p), jnp.float32),
        grid=(nsteps,),
        in_specs=in_specs,
        out_specs=pl.BlockSpec((1, Bt, pout_p), lambda b: (b, 0, 0)),
        compiler_params=pltpu.CompilerParams(
            dimension_semantics=("parallel",),    # batch tiles across TensorCores
            vmem_limit_bytes=_vmem_limit_bytes(),
        ),
        cost_estimate=pl.CostEstimate(flops=int(flops),
                                      transcendentals=int(transcendentals),
                                      bytes_accessed=int(bytes_acc)),
    )(xp, tidx, *flat)
    return out.reshape(Bp, pout_p)[:B, :pout]     # drop batch / lane padding


# ---------------- deterministic parameter construction ----------------
def _uniform(key, shape, bound):
    return jax.random.uniform(key, shape, jnp.float32, -bound, bound)


def init_params(key, input_dims, output_dims, depth, p_output_dims,
                hidden_dims=64, p_hidden_dims=128, kernel_size=3):
    keys = iter(jax.random.split(key, 256))
    p = {}
    bnd = 1.0 / math.sqrt(input_dims)
    p["w_in"] = _uniform(next(keys), (input_dims, hidden_dims), bnd)
    p["b_in"] = _uniform(next(keys), (hidden_dims,), bnd)
    channels = [hidden_dims] * depth + [output_dims]
    blocks = []
    for i, out_ch in enumerate(channels):
        in_ch = channels[i - 1] if i > 0 else hidden_dims
        final = i == len(channels) - 1
        blk = {"dilation": 2 ** i}
        bnd1 = 1.0 / math.sqrt(in_ch * kernel_size)
        blk["w1"] = _uniform(next(keys), (kernel_size, in_ch, out_ch), bnd1)
        blk["b1"] = _uniform(next(keys), (out_ch,), bnd1)
        bnd2 = 1.0 / math.sqrt(out_ch * kernel_size)
        blk["w2"] = _uniform(next(keys), (kernel_size, out_ch, out_ch), bnd2)
        blk["b2"] = _uniform(next(keys), (out_ch,), bnd2)
        if in_ch != out_ch or final:                       # 1x1 projector conv
            bndp = 1.0 / math.sqrt(in_ch)
            blk["proj"] = (_uniform(next(keys), (in_ch, out_ch), bndp),
                           _uniform(next(keys), (out_ch,), bndp))
        else:
            blk["proj"] = None
        blocks.append(blk)
    p["blocks"] = blocks
    bnd = 1.0 / math.sqrt(output_dims)
    ph = {
        "w1": _uniform(next(keys), (output_dims, p_hidden_dims), bnd),
        "b1": _uniform(next(keys), (p_hidden_dims,), bnd),
        "gamma": jnp.ones((p_hidden_dims,), jnp.float32),   # torch BN default init
        "beta": jnp.zeros((p_hidden_dims,), jnp.float32),
        "running_mean": jnp.zeros((p_hidden_dims,), jnp.float32),
        "running_var": jnp.ones((p_hidden_dims,), jnp.float32),
    }
    bnd = 1.0 / math.sqrt(p_hidden_dims)
    ph["w2"] = _uniform(next(keys), (p_hidden_dims, p_output_dims), bnd)
    ph["b2"] = _uniform(next(keys), (p_output_dims,), bnd)
    p["proj_head"] = ph
    return p


# ---------------- pure-JAX reference (f32) for an in-script sanity check ----------------
def _reference_forward(params, x, p_output_dims):
    def conv(g, w, b, d):
        K = w.shape[0]
        pad = ((K - 1) // 2) * d
        gp = jnp.pad(g, ((0, 0), (pad, pad), (0, 0)))
        T = g.shape[1]
        acc = 0.0
        for k in range(K):
            acc = acc + jnp.einsum("btc,cf->btf", gp[:, k * d:k * d + T, :], w[k])
        return acc + b

    h = jnp.einsum("btc,cf->btf", x, params["w_in"]) + params["b_in"]
    for blk in params["blocks"]:
        d = blk["dilation"]
        if blk["proj"] is not None:
            wp, bp = blk["proj"]
            res = jnp.einsum("btc,cf->btf", h, wp) + bp
        else:
            res = h
        h1 = conv(_gelu(h), blk["w1"], blk["b1"], d)
        h = conv(_gelu(h1), blk["w2"], blk["b2"], d) + res
    pooled = jnp.max(h, axis=1)
    ph = params["proj_head"]
    scale = ph["gamma"] / jnp.sqrt(ph["running_var"] + 1e-5)
    shift = ph["beta"] - ph["running_mean"] * scale
    z = jnp.maximum((pooled @ ph["w1"] + ph["b1"]) * scale + shift, 0.0)
    y = z @ ph["w2"] + ph["b2"]
    if p_output_dims == 2:
        y = jax.nn.sigmoid(jax.nn.sigmoid(y))
    return y


if __name__ == "__main__":
    B, T = 3, 20                                  # T=20 exercises time padding (T8=24)
    input_dims, hidden_dims, output_dims, depth = 4, 32, 32, 2
    p_hidden_dims, p_output_dims = 32, 2

    key = jax.random.PRNGKey(0)
    pkey, xkey = jax.random.split(key)
    params = init_params(pkey, input_dims, output_dims, depth, p_output_dims,
                         hidden_dims=hidden_dims, p_hidden_dims=p_hidden_dims)
    x = jax.random.normal(xkey, (B, T, input_dims), jnp.float32)

    prep = prepare_params(params, p_output_dims)
    y = ft_classifier_forward(prep, x)
    jax.block_until_ready(y)

    assert y.shape == (B, p_output_dims), y.shape
    assert bool(jnp.all(jnp.isfinite(y)))

    # sanity check against a pure-JAX f32 reference (bf16 MXU -> loose tolerance)
    y_ref = _reference_forward(params, x, p_output_dims)
    max_err = float(jnp.max(jnp.abs(y - y_ref)))
    assert max_err < 5e-2, f"mismatch vs reference: {max_err}"

    print("KERNEL_OK")
</pallas_src>

<mosaic_0001>
module attributes {stable_mosaic.version = 11 : i64} {
  func.func @kernel(%arg0: i32, %arg1: memref<72x4xf32, #tpu.memory_space<vmem>>, %arg2: memref<72x1xi32, #tpu.memory_space<vmem>>, %arg3: memref<4x128xbf16, #tpu.memory_space<vmem>>, %arg4: memref<1x128xf32, #tpu.memory_space<vmem>>, %arg5: memref<384x128xbf16, #tpu.memory_space<vmem>>, %arg6: memref<1x128xf32, #tpu.memory_space<vmem>>, %arg7: memref<384x128xbf16, #tpu.memory_space<vmem>>, %arg8: memref<1x128xf32, #tpu.memory_space<vmem>>, %arg9: memref<384x128xbf16, #tpu.memory_space<vmem>>, %arg10: memref<1x128xf32, #tpu.memory_space<vmem>>, %arg11: memref<384x128xbf16, #tpu.memory_space<vmem>>, %arg12: memref<1x128xf32, #tpu.memory_space<vmem>>, %arg13: memref<128x128xbf16, #tpu.memory_space<vmem>>, %arg14: memref<1x128xf32, #tpu.memory_space<vmem>>, %arg15: memref<384x128xbf16, #tpu.memory_space<vmem>>, %arg16: memref<1x128xf32, #tpu.memory_space<vmem>>, %arg17: memref<384x128xbf16, #tpu.memory_space<vmem>>, %arg18: memref<1x128xf32, #tpu.memory_space<vmem>>, %arg19: memref<128x128xbf16, #tpu.memory_space<vmem>>, %arg20: memref<1x128xf32, #tpu.memory_space<vmem>>, %arg21: memref<1x128xf32, #tpu.memory_space<vmem>>, %arg22: memref<1x128xf32, #tpu.memory_space<vmem>>, %arg23: memref<128x128xbf16, #tpu.memory_space<vmem>>, %arg24: memref<1x128xf32, #tpu.memory_space<vmem>>, %arg25: memref<1x3x128xf32, #tpu.memory_space<vmem>>) attributes {dimension_semantics = [#tpu.dimension_semantics<parallel>], iteration_bounds = array<i64: 1>, scalar_prefetch = 0 : i64, scratch_operands = 0 : i64, tpu.core_type = #tpu.core_type<tc>, window_params = [{transform_indices = @transform_0, window_bounds = array<i64: 72, 4>}, {pipeline_mode = #tpu.pipeline_mode<synchronous>, transform_indices = @transform_1, window_bounds = array<i64: 72, 1>}, {pipeline_mode = #tpu.pipeline_mode<synchronous>, transform_indices = @transform_2, window_bounds = array<i64: 4, 128>}, {pipeline_mode = #tpu.pipeline_mode<synchronous>, transform_indices = @transform_3, window_bounds = array<i64: 1, 128>}, {pipeline_mode = #tpu.pipeline_mode<synchronous>, transform_indices = @transform_4, window_bounds = array<i64: 384, 128>}, {pipeline_mode = #tpu.pipeline_mode<synchronous>, transform_indices = @transform_5, window_bounds = array<i64: 1, 128>}, {pipeline_mode = #tpu.pipeline_mode<synchronous>, transform_indices = @transform_6, window_bounds = array<i64: 384, 128>}, {pipeline_mode = #tpu.pipeline_mode<synchronous>, transform_indices = @transform_7, window_bounds = array<i64: 1, 128>}, {pipeline_mode = #tpu.pipeline_mode<synchronous>, transform_indices = @transform_8, window_bounds = array<i64: 384, 128>}, {pipeline_mode = #tpu.pipeline_mode<synchronous>, transform_indices = @transform_9, window_bounds = array<i64: 1, 128>}, {pipeline_mode = #tpu.pipeline_mode<synchronous>, transform_indices = @transform_10, window_bounds = array<i64: 384, 128>}, {pipeline_mode = #tpu.pipeline_mode<synchronous>, transform_indices = @transform_11, window_bounds = array<i64: 1, 128>}, {pipeline_mode = #tpu.pipeline_mode<synchronous>, transform_indices = @transform_12, window_bounds = array<i64: 128, 128>}, {pipeline_mode = #tpu.pipeline_mode<synchronous>, transform_indices = @transform_13, window_bounds = array<i64: 1, 128>}, {pipeline_mode = #tpu.pipeline_mode<synchronous>, transform_indices = @transform_14, window_bounds = array<i64: 384, 128>}, {pipeline_mode = #tpu.pipeline_mode<synchronous>, transform_indices = @transform_15, window_bounds = array<i64: 1, 128>}, {pipeline_mode = #tpu.pipeline_mode<synchronous>, transform_indices = @transform_16, window_bounds = array<i64: 384, 128>}, {pipeline_mode = #tpu.pipeline_mode<synchronous>, transform_indices = @transform_17, window_bounds = array<i64: 1, 128>}, {pipeline_mode = #tpu.pipeline_mode<synchronous>, transform_indices = @transform_18, window_bounds = array<i64: 128, 128>}, {pipeline_mode = #tpu.pipeline_mode<synchronous>, transform_indices = @transform_19, window_bounds = array<i64: 1, 128>}, {pipeline_mode = #tpu.pipeline_mode<synchronous>, transform_indices = @transform_20, window_bounds = array<i64: 1, 128>}, {pipeline_mode = #tpu.pipeline_mode<synchronous>, transform_indices = @transform_21, window_bounds = array<i64: 1, 128>}, {pipeline_mode = #tpu.pipeline_mode<synchronous>, transform_indices = @transform_22, window_bounds = array<i64: 128, 128>}, {pipeline_mode = #tpu.pipeline_mode<synchronous>, transform_indices = @transform_23, window_bounds = array<i64: 1, 128>}, {transform_indices = @transform_24, window_bounds = array<i64: 1, 3, 128>}]} {
    %c0 = arith.constant 0 : index
    %c0_0 = arith.constant 0 : index
    %0 = vector.load %arg2[%c0, %c0_0] : memref<72x1xi32, #tpu.memory_space<vmem>>, vector<72x1xi32>
    %c20_i32 = arith.constant 20 : i32
    %1 = vector.broadcast %c20_i32 : i32 to vector<72x1xi32>
    %2 = arith.cmpi slt, %0, %1 : vector<72x1xi32>
    %c0_1 = arith.constant 0 : index
    %c0_2 = arith.constant 0 : index
    %3 = vector.load %arg1[%c0_1, %c0_2] : memref<72x4xf32, #tpu.memory_space<vmem>>, vector<72x4xf32>
    %c0_3 = arith.constant 0 : index
    %c0_4 = arith.constant 0 : index
    %4 = vector.load %arg3[%c0_3, %c0_4] : memref<4x128xbf16, #tpu.memory_space<vmem>>, vector<4x128xbf16>
    %5 = arith.truncf %3 : vector<72x4xf32> to vector<72x4xbf16>
    %cst = arith.constant dense<0.000000e+00> : vector<72x128xf32>
    %6 = tpu.matmul %5, %4, %cst {dimension_numbers = #tpu.dot_dimension_numbers<[1], [0], [0], [1], [0, 0, 1, 1], [], []>} : vector<72x4xbf16>, vector<4x128xbf16>, vector<72x128xf32> -> vector<72x128xf32>
    %c0_5 = arith.constant 0 : index
    %c0_6 = arith.constant 0 : index
    %7 = vector.load %arg4[%c0_5, %c0_6] : memref<1x128xf32, #tpu.memory_space<vmem>>, vector<1x128xf32>
    %8 = vector.broadcast %7 : vector<1x128xf32> to vector<72x128xf32>
    %9 = arith.addf %6, %8 : vector<72x128xf32>
    %c1_i32 = arith.constant 1 : i32
    %10 = vector.broadcast %c1_i32 : i32 to vector<72x1xi32>
    %11 = arith.cmpi sge, %0, %10 : vector<72x1xi32>
    %c19_i32 = arith.constant 19 : i32
    %12 = vector.broadcast %c19_i32 : i32 to vector<72x1xi32>
    %13 = arith.cmpi slt, %0, %12 : vector<72x1xi32>
    %cst_7 = arith.constant 5.000000e-01 : f32
    %14 = vector.broadcast %cst_7 : f32 to vector<72x128xf32>
    %15 = arith.mulf %14, %9 : vector<72x128xf32>
    %cst_8 = arith.constant 0.707106769 : f32
    %16 = vector.broadcast %cst_8 : f32 to vector<72x128xf32>
    %17 = arith.mulf %9, %16 : vector<72x128xf32>
    %18 = math.erf %17 : vector<72x128xf32>
    %cst_9 = arith.constant 1.000000e+00 : f32
    %19 = vector.broadcast %cst_9 : f32 to vector<72x128xf32>
    %20 = arith.addf %19, %18 : vector<72x128xf32>
    %21 = arith.mulf %15, %20 : vector<72x128xf32>
    %c0_10 = arith.constant 0 : index
    %c0_11 = arith.constant 0 : index
    %22 = vector.load %arg5[%c0_10, %c0_11] : memref<384x128xbf16, #tpu.memory_space<vmem>>, vector<384x128xbf16>
    %c0_12 = arith.constant 0 : index
    %c0_13 = arith.constant 0 : index
    %23 = vector.load %arg6[%c0_12, %c0_13] : memref<1x128xf32, #tpu.memory_space<vmem>>, vector<1x128xf32>
    %c1_i32_14 = arith.constant 1 : i32
    %24 = tpu.dynamic_rotate %21 by %c1_i32_14 dim 0 : vector<72x128xf32>, i32 -> vector<72x128xf32>
    %cst_15 = arith.constant 0.000000e+00 : f32
    %25 = vector.shape_cast %11 : vector<72x1xi1> to vector<72x1xi1>
    %26 = vector.broadcast %25 : vector<72x1xi1> to vector<72x128xi1>
    %27 = vector.broadcast %cst_15 : f32 to vector<72x128xf32>
    %28 = arith.select %26, %24, %27 : vector<72x128xi1>, vector<72x128xf32>
    %c71_i32 = arith.constant 71 : i32
    %29 = tpu.dynamic_rotate %21 by %c71_i32 dim 0 : vector<72x128xf32>, i32 -> vector<72x128xf32>
    %cst_16 = arith.constant 0.000000e+00 : f32
    %30 = vector.shape_cast %13 : vector<72x1xi1> to vector<72x1xi1>
    %31 = vector.broadcast %30 : vector<72x1xi1> to vector<72x128xi1>
    %32 = vector.broadcast %cst_16 : f32 to vector<72x128xf32>
    %33 = arith.select %31, %29, %32 : vector<72x128xi1>, vector<72x128xf32>
    %34 = arith.truncf %28 : vector<72x128xf32> to vector<72x128xbf16>
    %35 = arith.truncf %21 : vector<72x128xf32> to vector<72x128xbf16>
    %36 = arith.truncf %33 : vector<72x128xf32> to vector<72x128xbf16>
    %37 = tpu.concatenate %34, %35, %36 in 1 : vector<72x128xbf16>, vector<72x128xbf16>, vector<72x128xbf16> -> vector<72x384xbf16>
    %cst_17 = arith.constant dense<0.000000e+00> : vector<72x128xf32>
    %38 = tpu.matmul %37, %22, %cst_17 {dimension_numbers = #tpu.dot_dimension_numbers<[1], [0], [0], [1], [0, 0, 1, 1], [], []>} : vector<72x384xbf16>, vector<384x128xbf16>, vector<72x128xf32> -> vector<72x128xf32>
    %39 = vector.broadcast %23 : vector<1x128xf32> to vector<72x128xf32>
    %40 = arith.addf %38, %39 : vector<72x128xf32>
    %cst_18 = arith.constant 5.000000e-01 : f32
    %41 = vector.broadcast %cst_18 : f32 to vector<72x128xf32>
    %42 = arith.mulf %41, %40 : vector<72x128xf32>
    %cst_19 = arith.constant 0.707106769 : f32
    %43 = vector.broadcast %cst_19 : f32 to vector<72x128xf32>
    %44 = arith.mulf %40, %43 : vector<72x128xf32>
    %45 = math.erf %44 : vector<72x128xf32>
    %cst_20 = arith.constant 1.000000e+00 : f32
    %46 = vector.broadcast %cst_20 : f32 to vector<72x128xf32>
    %47 = arith.addf %46, %45 : vector<72x128xf32>
    %48 = arith.mulf %42, %47 : vector<72x128xf32>
    %c0_21 = arith.constant 0 : index
    %c0_22 = arith.constant 0 : index
    %49 = vector.load %arg7[%c0_21, %c0_22] : memref<384x128xbf16, #tpu.memory_space<vmem>>, vector<384x128xbf16>
    %c0_23 = arith.constant 0 : index
    %c0_24 = arith.constant 0 : index
    %50 = vector.load %arg8[%c0_23, %c0_24] : memref<1x128xf32, #tpu.memory_space<vmem>>, vector<1x128xf32>
    %c1_i32_25 = arith.constant 1 : i32
    %51 = tpu.dynamic_rotate %48 by %c1_i32_25 dim 0 : vector<72x128xf32>, i32 -> vector<72x128xf32>
    %cst_26 = arith.constant 0.000000e+00 : f32
    %52 = vector.shape_cast %11 : vector<72x1xi1> to vector<72x1xi1>
    %53 = vector.broadcast %52 : vector<72x1xi1> to vector<72x128xi1>
    %54 = vector.broadcast %cst_26 : f32 to vector<72x128xf32>
    %55 = arith.select %53, %51, %54 : vector<72x128xi1>, vector<72x128xf32>
    %c71_i32_27 = arith.constant 71 : i32
    %56 = tpu.dynamic_rotate %48 by %c71_i32_27 dim 0 : vector<72x128xf32>, i32 -> vector<72x128xf32>
    %cst_28 = arith.constant 0.000000e+00 : f32
    %57 = vector.shape_cast %13 : vector<72x1xi1> to vector<72x1xi1>
    %58 = vector.broadcast %57 : vector<72x1xi1> to vector<72x128xi1>
    %59 = vector.broadcast %cst_28 : f32 to vector<72x128xf32>
    %60 = arith.select %58, %56, %59 : vector<72x128xi1>, vector<72x128xf32>
    %61 = arith.truncf %55 : vector<72x128xf32> to vector<72x128xbf16>
    %62 = arith.truncf %48 : vector<72x128xf32> to vector<72x128xbf16>
    %63 = arith.truncf %60 : vector<72x128xf32> to vector<72x128xbf16>
    %64 = tpu.concatenate %61, %62, %63 in 1 : vector<72x128xbf16>, vector<72x128xbf16>, vector<72x128xbf16> -> vector<72x384xbf16>
    %cst_29 = arith.constant dense<0.000000e+00> : vector<72x128xf32>
    %65 = tpu.matmul %64, %49, %cst_29 {dimension_numbers = #tpu.dot_dimension_numbers<[1], [0], [0], [1], [0, 0, 1, 1], [], []>} : vector<72x384xbf16>, vector<384x128xbf16>, vector<72x128xf32> -> vector<72x128xf32>
    %66 = vector.broadcast %50 : vector<1x128xf32> to vector<72x128xf32>
    %67 = arith.addf %65, %66 : vector<72x128xf32>
    %68 = arith.addf %67, %9 : vector<72x128xf32>
    %cst_30 = arith.constant 0.000000e+00 : f32
    %69 = vector.shape_cast %2 : vector<72x1xi1> to vector<72x1xi1>
    %70 = vector.broadcast %69 : vector<72x1xi1> to vector<72x128xi1>
    %71 = vector.broadcast %cst_30 : f32 to vector<72x128xf32>
    %72 = arith.select %70, %68, %71 : vector<72x128xi1>, vector<72x128xf32>
    %c2_i32 = arith.constant 2 : i32
    %73 = vector.broadcast %c2_i32 : i32 to vector<72x1xi32>
    %74 = arith.cmpi sge, %0, %73 : vector<72x1xi32>
    %c18_i32 = arith.constant 18 : i32
    %75 = vector.broadcast %c18_i32 : i32 to vector<72x1xi32>
    %76 = arith.cmpi slt, %0, %75 : vector<72x1xi32>
    %cst_31 = arith.constant 5.000000e-01 : f32
    %77 = vector.broadcast %cst_31 : f32 to vector<72x128xf32>
    %78 = arith.mulf %77, %72 : vector<72x128xf32>
    %cst_32 = arith.constant 0.707106769 : f32
    %79 = vector.broadcast %cst_32 : f32 to vector<72x128xf32>
    %80 = arith.mulf %72, %79 : vector<72x128xf32>
    %81 = math.erf %80 : vector<72x128xf32>
    %cst_33 = arith.constant 1.000000e+00 : f32
    %82 = vector.broadcast %cst_33 : f32 to vector<72x128xf32>
    %83 = arith.addf %82, %81 : vector<72x128xf32>
    %84 = arith.mulf %78, %83 : vector<72x128xf32>
    %c0_34 = arith.constant 0 : index
    %c0_35 = arith.constant 0 : index
    %85 = vector.load %arg9[%c0_34, %c0_35] : memref<384x128xbf16, #tpu.memory_space<vmem>>, vector<384x128xbf16>
    %c0_36 = arith.constant 0 : index
    %c0_37 = arith.constant 0 : index
    %86 = vector.load %arg10[%c0_36, %c0_37] : memref<1x128xf32, #tpu.memory_space<vmem>>, vector<1x128xf32>
    %c2_i32_38 = arith.constant 2 : i32
    %87 = tpu.dynamic_rotate %84 by %c2_i32_38 dim 0 : vector<72x128xf32>, i32 -> vector<72x128xf32>
    %cst_39 = arith.constant 0.000000e+00 : f32
    %88 = vector.shape_cast %74 : vector<72x1xi1> to vector<72x1xi1>
    %89 = vector.broadcast %88 : vector<72x1xi1> to vector<72x128xi1>
    %90 = vector.broadcast %cst_39 : f32 to vector<72x128xf32>
    %91 = arith.select %89, %87, %90 : vector<72x128xi1>, vector<72x128xf32>
    %c70_i32 = arith.constant 70 : i32
    %92 = tpu.dynamic_rotate %84 by %c70_i32 dim 0 : vector<72x128xf32>, i32 -> vector<72x128xf32>
    %cst_40 = arith.constant 0.000000e+00 : f32
    %93 = vector.shape_cast %76 : vector<72x1xi1> to vector<72x1xi1>
    %94 = vector.broadcast %93 : vector<72x1xi1> to vector<72x128xi1>
    %95 = vector.broadcast %cst_40 : f32 to vector<72x128xf32>
    %96 = arith.select %94, %92, %95 : vector<72x128xi1>, vector<72x128xf32>
    %97 = arith.truncf %91 : vector<72x128xf32> to vector<72x128xbf16>
    %98 = arith.truncf %84 : vector<72x128xf32> to vector<72x128xbf16>
    %99 = arith.truncf %96 : vector<72x128xf32> to vector<72x128xbf16>
    %100 = tpu.concatenate %97, %98, %99 in 1 : vector<72x128xbf16>, vector<72x128xbf16>, vector<72x128xbf16> -> vector<72x384xbf16>
    %cst_41 = arith.constant dense<0.000000e+00> : vector<72x128xf32>
    %101 = tpu.matmul %100, %85, %cst_41 {dimension_numbers = #tpu.dot_dimension_numbers<[1], [0], [0], [1], [0, 0, 1, 1], [], []>} : vector<72x384xbf16>, vector<384x128xbf16>, vector<72x128xf32> -> vector<72x128xf32>
    %102 = vector.broadcast %86 : vector<1x128xf32> to vector<72x128xf32>
    %103 = arith.addf %101, %102 : vector<72x128xf32>
    %cst_42 = arith.constant 5.000000e-01 : f32
    %104 = vector.broadcast %cst_42 : f32 to vector<72x128xf32>
    %105 = arith.mulf %104, %103 : vector<72x128xf32>
    %cst_43 = arith.constant 0.707106769 : f32
    %106 = vector.broadcast %cst_43 : f32 to vector<72x128xf32>
    %107 = arith.mulf %103, %106 : vector<72x128xf32>
    %108 = math.erf %107 : vector<72x128xf32>
    %cst_44 = arith.constant 1.000000e+00 : f32
    %109 = vector.broadcast %cst_44 : f32 to vector<72x128xf32>
    %110 = arith.addf %109, %108 : vector<72x128xf32>
    %111 = arith.mulf %105, %110 : vector<72x128xf32>
    %c0_45 = arith.constant 0 : index
    %c0_46 = arith.constant 0 : index
    %112 = vector.load %arg11[%c0_45, %c0_46] : memref<384x128xbf16, #tpu.memory_space<vmem>>, vector<384x128xbf16>
    %c0_47 = arith.constant 0 : index
    %c0_48 = arith.constant 0 : index
    %113 = vector.load %arg12[%c0_47, %c0_48] : memref<1x128xf32, #tpu.memory_space<vmem>>, vector<1x128xf32>
    %c2_i32_49 = arith.constant 2 : i32
    %114 = tpu.dynamic_rotate %111 by %c2_i32_49 dim 0 : vector<72x128xf32>, i32 -> vector<72x128xf32>
    %cst_50 = arith.constant 0.000000e+00 : f32
    %115 = vector.shape_cast %74 : vector<72x1xi1> to vector<72x1xi1>
    %116 = vector.broadcast %115 : vector<72x1xi1> to vector<72x128xi1>
    %117 = vector.broadcast %cst_50 : f32 to vector<72x128xf32>
    %118 = arith.select %116, %114, %117 : vector<72x128xi1>, vector<72x128xf32>
    %c70_i32_51 = arith.constant 70 : i32
    %119 = tpu.dynamic_rotate %111 by %c70_i32_51 dim 0 : vector<72x128xf32>, i32 -> vector<72x128xf32>
    %cst_52 = arith.constant 0.000000e+00 : f32
    %120 = vector.shape_cast %76 : vector<72x1xi1> to vector<72x1xi1>
    %121 = vector.broadcast %120 : vector<72x1xi1> to vector<72x128xi1>
    %122 = vector.broadcast %cst_52 : f32 to vector<72x128xf32>
    %123 = arith.select %121, %119, %122 : vector<72x128xi1>, vector<72x128xf32>
    %124 = arith.truncf %118 : vector<72x128xf32> to vector<72x128xbf16>
    %125 = arith.truncf %111 : vector<72x128xf32> to vector<72x128xbf16>
    %126 = arith.truncf %123 : vector<72x128xf32> to vector<72x128xbf16>
    %127 = tpu.concatenate %124, %125, %126 in 1 : vector<72x128xbf16>, vector<72x128xbf16>, vector<72x128xbf16> -> vector<72x384xbf16>
    %cst_53 = arith.constant dense<0.000000e+00> : vector<72x128xf32>
    %128 = tpu.matmul %127, %112, %cst_53 {dimension_numbers = #tpu.dot_dimension_numbers<[1], [0], [0], [1], [0, 0, 1, 1], [], []>} : vector<72x384xbf16>, vector<384x128xbf16>, vector<72x128xf32> -> vector<72x128xf32>
    %129 = vector.broadcast %113 : vector<1x128xf32> to vector<72x128xf32>
    %130 = arith.addf %128, %129 : vector<72x128xf32>
    %131 = arith.addf %130, %72 : vector<72x128xf32>
    %cst_54 = arith.constant 0.000000e+00 : f32
    %132 = vector.shape_cast %2 : vector<72x1xi1> to vector<72x1xi1>
    %133 = vector.broadcast %132 : vector<72x1xi1> to vector<72x128xi1>
    %134 = vector.broadcast %cst_54 : f32 to vector<72x128xf32>
    %135 = arith.select %133, %131, %134 : vector<72x128xi1>, vector<72x128xf32>
    %c0_55 = arith.constant 0 : index
    %c0_56 = arith.constant 0 : index
    %136 = vector.load %arg13[%c0_55, %c0_56] : memref<128x128xbf16, #tpu.memory_space<vmem>>, vector<128x128xbf16>
    %137 = arith.truncf %135 : vector<72x128xf32> to vector<72x128xbf16>
    %cst_57 = arith.constant dense<0.000000e+00> : vector<72x128xf32>
    %138 = tpu.matmul %137, %136, %cst_57 {dimension_numbers = #tpu.dot_dimension_numbers<[1], [0], [0], [1], [0, 0, 1, 1], [], []>} : vector<72x128xbf16>, vector<128x128xbf16>, vector<72x128xf32> -> vector<72x128xf32>
    %c0_58 = arith.constant 0 : index
    %c0_59 = arith.constant 0 : index
    %139 = vector.load %arg14[%c0_58, %c0_59] : memref<1x128xf32, #tpu.memory_space<vmem>>, vector<1x128xf32>
    %140 = vector.broadcast %139 : vector<1x128xf32> to vector<72x128xf32>
    %141 = arith.addf %138, %140 : vector<72x128xf32>
    %c4_i32 = arith.constant 4 : i32
    %142 = vector.broadcast %c4_i32 : i32 to vector<72x1xi32>
    %143 = arith.cmpi sge, %0, %142 : vector<72x1xi32>
    %c16_i32 = arith.constant 16 : i32
    %144 = vector.broadcast %c16_i32 : i32 to vector<72x1xi32>
    %145 = arith.cmpi slt, %0, %144 : vector<72x1xi32>
    %cst_60 = arith.constant 5.000000e-01 : f32
    %146 = vector.broadcast %cst_60 : f32 to vector<72x128xf32>
    %147 = arith.mulf %146, %135 : vector<72x128xf32>
    %cst_61 = arith.constant 0.707106769 : f32
    %148 = vector.broadcast %cst_61 : f32 to vector<72x128xf32>
    %149 = arith.mulf %135, %148 : vector<72x128xf32>
    %150 = math.erf %149 : vector<72x128xf32>
    %cst_62 = arith.constant 1.000000e+00 : f32
    %151 = vector.broadcast %cst_62 : f32 to vector<72x128xf32>
    %152 = arith.addf %151, %150 : vector<72x128xf32>
    %153 = arith.mulf %147, %152 : vector<72x128xf32>
    %c0_63 = arith.constant 0 : index
    %c0_64 = arith.constant 0 : index
    %154 = vector.load %arg15[%c0_63, %c0_64] : memref<384x128xbf16, #tpu.memory_space<vmem>>, vector<384x128xbf16>
    %c0_65 = arith.constant 0 : index
    %c0_66 = arith.constant 0 : index
    %155 = vector.load %arg16[%c0_65, %c0_66] : memref<1x128xf32, #tpu.memory_space<vmem>>, vector<1x128xf32>
    %c4_i32_67 = arith.constant 4 : i32
    %156 = tpu.dynamic_rotate %153 by %c4_i32_67 dim 0 : vector<72x128xf32>, i32 -> vector<72x128xf32>
    %cst_68 = arith.constant 0.000000e+00 : f32
    %157 = vector.shape_cast %143 : vector<72x1xi1> to vector<72x1xi1>
    %158 = vector.broadcast %157 : vector<72x1xi1> to vector<72x128xi1>
    %159 = vector.broadcast %cst_68 : f32 to vector<72x128xf32>
    %160 = arith.select %158, %156, %159 : vector<72x128xi1>, vector<72x128xf32>
    %c68_i32 = arith.constant 68 : i32
    %161 = tpu.dynamic_rotate %153 by %c68_i32 dim 0 : vector<72x128xf32>, i32 -> vector<72x128xf32>
    %cst_69 = arith.constant 0.000000e+00 : f32
    %162 = vector.shape_cast %145 : vector<72x1xi1> to vector<72x1xi1>
    %163 = vector.broadcast %162 : vector<72x1xi1> to vector<72x128xi1>
    %164 = vector.broadcast %cst_69 : f32 to vector<72x128xf32>
    %165 = arith.select %163, %161, %164 : vector<72x128xi1>, vector<72x128xf32>
    %166 = arith.truncf %160 : vector<72x128xf32> to vector<72x128xbf16>
    %167 = arith.truncf %153 : vector<72x128xf32> to vector<72x128xbf16>
    %168 = arith.truncf %165 : vector<72x128xf32> to vector<72x128xbf16>
    %169 = tpu.concatenate %166, %167, %168 in 1 : vector<72x128xbf16>, vector<72x128xbf16>, vector<72x128xbf16> -> vector<72x384xbf16>
    %cst_70 = arith.constant dense<0.000000e+00> : vector<72x128xf32>
    %170 = tpu.matmul %169, %154, %cst_70 {dimension_numbers = #tpu.dot_dimension_numbers<[1], [0], [0], [1], [0, 0, 1, 1], [], []>} : vector<72x384xbf16>, vector<384x128xbf16>, vector<72x128xf32> -> vector<72x128xf32>
    %171 = vector.broadcast %155 : vector<1x128xf32> to vector<72x128xf32>
    %172 = arith.addf %170, %171 : vector<72x128xf32>
    %cst_71 = arith.constant 5.000000e-01 : f32
    %173 = vector.broadcast %cst_71 : f32 to vector<72x128xf32>
    %174 = arith.mulf %173, %172 : vector<72x128xf32>
    %cst_72 = arith.constant 0.707106769 : f32
    %175 = vector.broadcast %cst_72 : f32 to vector<72x128xf32>
    %176 = arith.mulf %172, %175 : vector<72x128xf32>
    %177 = math.erf %176 : vector<72x128xf32>
    %cst_73 = arith.constant 1.000000e+00 : f32
    %178 = vector.broadcast %cst_73 : f32 to vector<72x128xf32>
    %179 = arith.addf %178, %177 : vector<72x128xf32>
    %180 = arith.mulf %174, %179 : vector<72x128xf32>
    %c0_74 = arith.constant 0 : index
    %c0_75 = arith.constant 0 : index
    %181 = vector.load %arg17[%c0_74, %c0_75] : memref<384x128xbf16, #tpu.memory_space<vmem>>, vector<384x128xbf16>
    %c0_76 = arith.constant 0 : index
    %c0_77 = arith.constant 0 : index
    %182 = vector.load %arg18[%c0_76, %c0_77] : memref<1x128xf32, #tpu.memory_space<vmem>>, vector<1x128xf32>
    %c4_i32_78 = arith.constant 4 : i32
    %183 = tpu.dynamic_rotate %180 by %c4_i32_78 dim 0 : vector<72x128xf32>, i32 -> vector<72x128xf32>
    %cst_79 = arith.constant 0.000000e+00 : f32
    %184 = vector.shape_cast %143 : vector<72x1xi1> to vector<72x1xi1>
    %185 = vector.broadcast %184 : vector<72x1xi1> to vector<72x128xi1>
    %186 = vector.broadcast %cst_79 : f32 to vector<72x128xf32>
    %187 = arith.select %185, %183, %186 : vector<72x128xi1>, vector<72x128xf32>
    %c68_i32_80 = arith.constant 68 : i32
    %188 = tpu.dynamic_rotate %180 by %c68_i32_80 dim 0 : vector<72x128xf32>, i32 -> vector<72x128xf32>
    %cst_81 = arith.constant 0.000000e+00 : f32
    %189 = vector.shape_cast %145 : vector<72x1xi1> to vector<72x1xi1>
    %190 = vector.broadcast %189 : vector<72x1xi1> to vector<72x128xi1>
    %191 = vector.broadcast %cst_81 : f32 to vector<72x128xf32>
    %192 = arith.select %190, %188, %191 : vector<72x128xi1>, vector<72x128xf32>
    %193 = arith.truncf %187 : vector<72x128xf32> to vector<72x128xbf16>
    %194 = arith.truncf %180 : vector<72x128xf32> to vector<72x128xbf16>
    %195 = arith.truncf %192 : vector<72x128xf32> to vector<72x128xbf16>
    %196 = tpu.concatenate %193, %194, %195 in 1 : vector<72x128xbf16>, vector<72x128xbf16>, vector<72x128xbf16> -> vector<72x384xbf16>
    %cst_82 = arith.constant dense<0.000000e+00> : vector<72x128xf32>
    %197 = tpu.matmul %196, %181, %cst_82 {dimension_numbers = #tpu.dot_dimension_numbers<[1], [0], [0], [1], [0, 0, 1, 1], [], []>} : vector<72x384xbf16>, vector<384x128xbf16>, vector<72x128xf32> -> vector<72x128xf32>
    %198 = vector.broadcast %182 : vector<1x128xf32> to vector<72x128xf32>
    %199 = arith.addf %197, %198 : vector<72x128xf32>
    %200 = arith.addf %199, %141 : vector<72x128xf32>
    %cst_83 = arith.constant 0.000000e+00 : f32
    %201 = vector.shape_cast %2 : vector<72x1xi1> to vector<72x1xi1>
    %202 = vector.broadcast %201 : vector<72x1xi1> to vector<72x128xi1>
    %203 = vector.broadcast %cst_83 : f32 to vector<72x128xf32>
    %204 = arith.select %202, %200, %203 : vector<72x128xi1>, vector<72x128xf32>
    %cst_84 = arith.constant 0xFF800000 : f32
    %205 = vector.shape_cast %2 : vector<72x1xi1> to vector<72x1xi1>
    %206 = vector.broadcast %205 : vector<72x1xi1> to vector<72x128xi1>
    %207 = vector.broadcast %cst_84 : f32 to vector<72x128xf32>
    %208 = arith.select %206, %204, %207 : vector<72x128xi1>, vector<72x128xf32>
    %209 = vector.shape_cast %208 : vector<72x128xf32> to vector<3x24x128xf32>
    %cst_85 = arith.constant dense<0xFF800000> : vector<3x128xf32>
    %210 = vector.multi_reduction <maximumf>, %209, %cst_85 [1] : vector<3x24x128xf32> to vector<3x128xf32>
    %c0_86 = arith.constant 0 : index
    %c0_87 = arith.constant 0 : index
    %211 = vector.load %arg19[%c0_86, %c0_87] : memref<128x128xbf16, #tpu.memory_space<vmem>>, vector<128x128xbf16>
    %212 = arith.truncf %210 : vector<3x128xf32> to vector<3x128xbf16>
    %cst_88 = arith.constant dense<0.000000e+00> : vector<3x128xf32>
    %213 = tpu.matmul %212, %211, %cst_88 {dimension_numbers = #tpu.dot_dimension_numbers<[1], [0], [0], [1], [0, 0, 1, 1], [], []>} : vector<3x128xbf16>, vector<128x128xbf16>, vector<3x128xf32> -> vector<3x128xf32>
    %c0_89 = arith.constant 0 : index
    %c0_90 = arith.constant 0 : index
    %214 = vector.load %arg20[%c0_89, %c0_90] : memref<1x128xf32, #tpu.memory_space<vmem>>, vector<1x128xf32>
    %215 = vector.broadcast %214 : vector<1x128xf32> to vector<3x128xf32>
    %216 = arith.addf %213, %215 : vector<3x128xf32>
    %c0_91 = arith.constant 0 : index
    %c0_92 = arith.constant 0 : index
    %217 = vector.load %arg21[%c0_91, %c0_92] : memref<1x128xf32, #tpu.memory_space<vmem>>, vector<1x128xf32>
    %218 = vector.broadcast %217 : vector<1x128xf32> to vector<3x128xf32>
    %219 = arith.mulf %216, %218 : vector<3x128xf32>
    %c0_93 = arith.constant 0 : index
    %c0_94 = arith.constant 0 : index
    %220 = vector.load %arg22[%c0_93, %c0_94] : memref<1x128xf32, #tpu.memory_space<vmem>>, vector<1x128xf32>
    %221 = vector.broadcast %220 : vector<1x128xf32> to vector<3x128xf32>
    %222 = arith.addf %219, %221 : vector<3x128xf32>
    %cst_95 = arith.constant 0.000000e+00 : f32
    %223 = vector.broadcast %cst_95 : f32 to vector<3x128xf32>
    %224 = arith.maximumf %222, %223 : vector<3x128xf32>
    %c0_96 = arith.constant 0 : index
    %c0_97 = arith.constant 0 : index
    %225 = vector.load %arg23[%c0_96, %c0_97] : memref<128x128xbf16, #tpu.memory_space<vmem>>, vector<128x128xbf16>
    %226 = arith.truncf %224 : vector<3x128xf32> to vector<3x128xbf16>
    %cst_98 = arith.constant dense<0.000000e+00> : vector<3x128xf32>
    %227 = tpu.matmul %226, %225, %cst_98 {dimension_numbers = #tpu.dot_dimension_numbers<[1], [0], [0], [1], [0, 0, 1, 1], [], []>} : vector<3x128xbf16>, vector<128x128xbf16>, vector<3x128xf32> -> vector<3x128xf32>
    %c0_99 = arith.constant 0 : index
    %c0_100 = arith.constant 0 : index
    %228 = vector.load %arg24[%c0_99, %c0_100] : memref<1x128xf32, #tpu.memory_space<vmem>>, vector<1x128xf32>
    %229 = vector.broadcast %228 : vector<1x128xf32> to vector<3x128xf32>
    %230 = arith.addf %227, %229 : vector<3x128xf32>
    %231 = arith.negf %230 : vector<3x128xf32>
    %232 = math.exp %231 : vector<3x128xf32>
    %cst_101 = arith.constant 1.000000e+00 : f32
    %233 = vector.broadcast %cst_101 : f32 to vector<3x128xf32>
    %234 = arith.addf %233, %232 : vector<3x128xf32>
    %235 = arith.divf %233, %234 : vector<3x128xf32>
    %236 = arith.negf %235 : vector<3x128xf32>
    %237 = math.exp %236 : vector<3x128xf32>
    %cst_102 = arith.constant 1.000000e+00 : f32
    %238 = vector.broadcast %cst_102 : f32 to vector<3x128xf32>
    %239 = arith.addf %238, %237 : vector<3x128xf32>
    %240 = arith.divf %238, %239 : vector<3x128xf32>
    %c0_103 = arith.constant 0 : index
    %c0_104 = arith.constant 0 : index
    %c0_105 = arith.constant 0 : index
    %241 = vector.load %arg25[%c0_103, %c0_104, %c0_105] : memref<1x3x128xf32, #tpu.memory_space<vmem>>, vector<1x3x128xf32>
    %242 = vector.shape_cast %241 : vector<1x3x128xf32> to vector<3x128xf32>
    %243 = vector.shape_cast %240 : vector<3x128xf32> to vector<1x3x128xf32>
    tpu.vector_store %arg25[%c0_103, %c0_104, %c0_105], %243 {strides = array<i32>} : memref<1x3x128xf32, #tpu.memory_space<vmem>>, vector<1x3x128xf32>,
    return
  }
  func.func @transform_0(%arg0: i32) -> (i32, i32) {
    %c0_i32 = arith.constant 0 : i32
    %c0_i32_0 = arith.constant 0 : i32
    return %arg0, %c0_i32 : i32, i32
  }
  func.func @transform_1(%arg0: i32) -> (i32, i32) {
    %c0_i32 = arith.constant 0 : i32
    %c0_i32_0 = arith.constant 0 : i32
    %c0_i32_1 = arith.constant 0 : i32
    return %c0_i32, %c0_i32_0 : i32, i32
  }
  func.func @transform_2(%arg0: i32) -> (i32, i32) {
    %c0_i32 = arith.constant 0 : i32
    %c0_i32_0 = arith.constant 0 : i32
    %c0_i32_1 = arith.constant 0 : i32
    return %c0_i32, %c0_i32_0 : i32, i32
  }
  func.func @transform_3(%arg0: i32) -> (i32, i32) {
    %c0_i32 = arith.constant 0 : i32
    %c0_i32_0 = arith.constant 0 : i32
    %c0_i32_1 = arith.constant 0 : i32
    return %c0_i32, %c0_i32_0 : i32, i32
  }
  func.func @transform_4(%arg0: i32) -> (i32, i32) {
    %c0_i32 = arith.constant 0 : i32
    %c0_i32_0 = arith.constant 0 : i32
    %c0_i32_1 = arith.constant 0 : i32
    return %c0_i32, %c0_i32_0 : i32, i32
  }
  func.func @transform_5(%arg0: i32) -> (i32, i32) {
    %c0_i32 = arith.constant 0 : i32
    %c0_i32_0 = arith.constant 0 : i32
    %c0_i32_1 = arith.constant 0 : i32
    return %c0_i32, %c0_i32_0 : i32, i32
  }
  func.func @transform_6(%arg0: i32) -> (i32, i32) {
    %c0_i32 = arith.constant 0 : i32
    %c0_i32_0 = arith.constant 0 : i32
    %c0_i32_1 = arith.constant 0 : i32
    return %c0_i32, %c0_i32_0 : i32, i32
  }
  func.func @transform_7(%arg0: i32) -> (i32, i32) {
    %c0_i32 = arith.constant 0 : i32
    %c0_i32_0 = arith.constant 0 : i32
    %c0_i32_1 = arith.constant 0 : i32
    return %c0_i32, %c0_i32_0 : i32, i32
  }
  func.func @transform_8(%arg0: i32) -> (i32, i32) {
    %c0_i32 = arith.constant 0 : i32
    %c0_i32_0 = arith.constant 0 : i32
    %c0_i32_1 = arith.constant 0 : i32
    return %c0_i32, %c0_i32_0 : i32, i32
  }
  func.func @transform_9(%arg0: i32) -> (i32, i32) {
    %c0_i32 = arith.constant 0 : i32
    %c0_i32_0 = arith.constant 0 : i32
    %c0_i32_1 = arith.constant 0 : i32
    return %c0_i32, %c0_i32_0 : i32, i32
  }
  func.func @transform_10(%arg0: i32) -> (i32, i32) {
    %c0_i32 = arith.constant 0 : i32
    %c0_i32_0 = arith.constant 0 : i32
    %c0_i32_1 = arith.constant 0 : i32
    return %c0_i32, %c0_i32_0 : i32, i32
  }
  func.func @transform_11(%arg0: i32) -> (i32, i32) {
    %c0_i32 = arith.constant 0 : i32
    %c0_i32_0 = arith.constant 0 : i32
    %c0_i32_1 = arith.constant 0 : i32
    return %c0_i32, %c0_i32_0 : i32, i32
  }
  func.func @transform_12(%arg0: i32) -> (i32, i32) {
    %c0_i32 = arith.constant 0 : i32
    %c0_i32_0 = arith.constant 0 : i32
    %c0_i32_1 = arith.constant 0 : i32
    return %c0_i32, %c0_i32_0 : i32, i32
  }
  func.func @transform_13(%arg0: i32) -> (i32, i32) {
    %c0_i32 = arith.constant 0 : i32
    %c0_i32_0 = arith.constant 0 : i32
    %c0_i32_1 = arith.constant 0 : i32
    return %c0_i32, %c0_i32_0 : i32, i32
  }
  func.func @transform_14(%arg0: i32) -> (i32, i32) {
    %c0_i32 = arith.constant 0 : i32
    %c0_i32_0 = arith.constant 0 : i32
    %c0_i32_1 = arith.constant 0 : i32
    return %c0_i32, %c0_i32_0 : i32, i32
  }
  func.func @transform_15(%arg0: i32) -> (i32, i32) {
    %c0_i32 = arith.constant 0 : i32
    %c0_i32_0 = arith.constant 0 : i32
    %c0_i32_1 = arith.constant 0 : i32
    return %c0_i32, %c0_i32_0 : i32, i32
  }
  func.func @transform_16(%arg0: i32) -> (i32, i32) {
    %c0_i32 = arith.constant 0 : i32
    %c0_i32_0 = arith.constant 0 : i32
    %c0_i32_1 = arith.constant 0 : i32
    return %c0_i32, %c0_i32_0 : i32, i32
  }
  func.func @transform_17(%arg0: i32) -> (i32, i32) {
    %c0_i32 = arith.constant 0 : i32
    %c0_i32_0 = arith.constant 0 : i32
    %c0_i32_1 = arith.constant 0 : i32
    return %c0_i32, %c0_i32_0 : i32, i32
  }
  func.func @transform_18(%arg0: i32) -> (i32, i32) {
    %c0_i32 = arith.constant 0 : i32
    %c0_i32_0 = arith.constant 0 : i32
    %c0_i32_1 = arith.constant 0 : i32
    return %c0_i32, %c0_i32_0 : i32, i32
  }
  func.func @transform_19(%arg0: i32) -> (i32, i32) {
    %c0_i32 = arith.constant 0 : i32
    %c0_i32_0 = arith.constant 0 : i32
    %c0_i32_1 = arith.constant 0 : i32
    return %c0_i32, %c0_i32_0 : i32, i32
  }
  func.func @transform_20(%arg0: i32) -> (i32, i32) {
    %c0_i32 = arith.constant 0 : i32
    %c0_i32_0 = arith.constant 0 : i32
    %c0_i32_1 = arith.constant 0 : i32
    return %c0_i32, %c0_i32_0 : i32, i32
  }
  func.func @transform_21(%arg0: i32) -> (i32, i32) {
    %c0_i32 = arith.constant 0 : i32
    %c0_i32_0 = arith.constant 0 : i32
    %c0_i32_1 = arith.constant 0 : i32
    return %c0_i32, %c0_i32_0 : i32, i32
  }
  func.func @transform_22(%arg0: i32) -> (i32, i32) {
    %c0_i32 = arith.constant 0 : i32
    %c0_i32_0 = arith.constant 0 : i32
    %c0_i32_1 = arith.constant 0 : i32
    return %c0_i32, %c0_i32_0 : i32, i32
  }
  func.func @transform_23(%arg0: i32) -> (i32, i32) {
    %c0_i32 = arith.constant 0 : i32
    %c0_i32_0 = arith.constant 0 : i32
    %c0_i32_1 = arith.constant 0 : i32
    return %c0_i32, %c0_i32_0 : i32, i32
  }
  func.func @transform_24(%arg0: i32) -> (i32, i32, i32) {
    %c0_i32 = arith.constant 0 : i32
    %c0_i32_0 = arith.constant 0 : i32
    %c0_i32_1 = arith.constant 0 : i32
    return %arg0, %c0_i32, %c0_i32_0 : i32, i32, i32
  }
}

</mosaic_0001>

<bundles_post_ra>
// kernel: tpu_custom_call.1
= control target key start
LH: loop header
LB: loop body
LE: loop exit
PB: predicated region body
PF: predicated region fallthrough
CT: control target
= control target key end

     0   :  { %s7543_s0 = inlined_call_operand.vmem [shape: f32[72,4], index: 0, kind: input, shape index: {}]   ;;  %s7544_s1 = inlined_call_operand.vmem [shape: s32[72,1], index: 1, kind: input, shape index: {}]   ;;  %s7545_s2 = inlined_call_operand.vmem [shape: bf16[4,128], index: 2, kind: input, shape index: {}]   ;;  %s7546_s3 = inlined_call_operand.vmem [shape: f32[1,128], index: 3, kind: input, shape index: {}]   ;;  %s7547_s4 = inlined_call_operand.hbm [shape: bf16[384,128], index: 4, kind: input, shape index: {}]   ;;  %s7548_s5 = inlined_call_operand.vmem [shape: f32[1,128], index: 5, kind: input, shape index: {}]   ;;  %s7549_s6 = inlined_call_operand.hbm [shape: bf16[384,128], index: 6, kind: input, shape index: {}]   ;;  %s7550_s7 = inlined_call_operand.vmem [shape: f32[1,128], index: 7, kind: input, shape index: {}]   ;;  %s7551_s8 = inlined_call_operand.hbm [shape: bf16[384,128], index: 8, kind: input, shape index: {}]   ;;  %s7552_s9 = inlined_call_operand.vmem [shape: f32[1,128], index: 9, kind: input, shape index: {}]   ;;  %s7553_s10 = inlined_call_operand.hbm [shape: bf16[384,128], index: 10, kind: input, shape index: {}]   ;;  %s7554_s11 = inlined_call_operand.vmem [shape: f32[1,128], index: 11, kind: input, shape index: {}]   ;;  %s7555_s12 = inlined_call_operand.hbm [shape: bf16[128,128], index: 12, kind: input, shape index: {}]   ;;  %s7556_s13 = inlined_call_operand.vmem [shape: f32[1,128], index: 13, kind: input, shape index: {}]   ;;  %s7557_s14 = inlined_call_operand.vmem [shape: bf16[384,128], index: 14, kind: input, shape index: {}]   ;;  %s7558_s15 = inlined_call_operand.vmem [shape: f32[1,128], index: 15, kind: input, shape index: {}]   ;;  %s7559_s16 = inlined_call_operand.hbm [shape: bf16[384,128], index: 16, kind: input, shape index: {}]   ;;  %s7560_s17 = inlined_call_operand.vmem [shape: f32[1,128], index: 17, kind: input, shape index: {}]   ;;  %s7561_s18 = inlined_call_operand.hbm [shape: bf16[128,128], index: 18, kind: input, shape index: {}]   ;;  %s7562_s19 = inlined_call_operand.vmem [shape: f32[1,128], index: 19, kind: input, shape index: {}]   ;;  %s7563_s20 = inlined_call_operand.vmem [shape: f32[1,128], index: 20, kind: input, shape index: {}]   ;;  %s7564_s21 = inlined_call_operand.vmem [shape: f32[1,128], index: 21, kind: input, shape index: {}]   ;;  %s7565_s22 = inlined_call_operand.hbm [shape: bf16[128,128], index: 22, kind: input, shape index: {}]   ;;  %s7566_s23 = inlined_call_operand.vmem [shape: f32[1,128], index: 23, kind: input, shape index: {}]   ;;  %s7567_s24 = inlined_call_operand.vmem [shape: f32[1,3,128], index: 24, kind: output, shape index: {}]  }
   0x1   :  { %7582 = sst [smem:[#allocation20_spill]] %s7543_s0 }
   0x2   :  { %7583 = sst [smem:[#allocation21_spill]] %s7544_s1 }
   0x3   :  { %7584 = sst [smem:[#allocation22_spill]] %s7545_s2 }
   0x4   :  { %7585 = sst [smem:[#allocation23_spill]] %s7546_s3 }
   0x5   :  { %7586 = sst [smem:[#allocation24_spill]] %s7547_s4 }
   0x6   :  { %7587 = sst [smem:[#allocation25_spill]] %s7548_s5 }
   0x7   :  { %7588 = sst [smem:[#allocation26_spill]] %s7549_s6 }
   0x8   :  { %7589 = sst [smem:[#allocation27_spill]] %s7550_s7 }
   0x9   :  { %7590 = sst [smem:[#allocation28_spill]] %s7551_s8 }
   0xa   :  { %7591 = sst [smem:[#allocation29_spill]] %s7567_s24 }
   0xb   :  { %29 = vsyncpa [#allocation3], 0 }
   0xc   :  { %30 = vsyncpa [#allocation5], 0 }
   0xd   :  { %31 = vsyncpa [#allocation8], 0 }
   0xe   :  { %32 = vsyncpa [#allocation11], 0 }
   0xf   :  { %33 = vsyncpa [#allocation14], 0  ;;  %s5514_s5 = smov [#allocation4]   ;;  %s5515_s27 = smov [#allocation7]  }
  0x10   :  { %s61_s26 = sshll.u32 %s5514_s5, 4  ;;  %s89_s28 = sshll.u32 %s5515_s27, 4  ;;  %s62_s26 = int_to_ptr.vmem [resolvable:$true] %s61_s26  ;;  %s5652_s28 = int_to_ptr.vmem [resolvable:$true] %s89_s28 }
  0x11   :  { %s7592_s29 = sld [smem:[#allocation26_spill]] }
  0x17   :  { %s5328_s0 = scalar_lea.hbm %s7592_s29, 3072 }
  0x18   :  { %p5329_p0 = scmp.ne.s32.totalorder %s7592_s29, %s5328_s0  ;;  %p5332_p1 = scmp.lt.u32.totalorder %s5328_s0, %s7592_s29 }
  0x1a   :  { %p5334_p2 = pnand %p5332_p1, %p5329_p0 }
  0x1c   :  { %5337 = shalt.err (!%p5334_p2)
}
  0x1d   :  { %s5338_s8 = scalar_lea.vmem %s62_s26, 3072  ;;  %p5343_p4 = scmp.lt.s32.totalorder %s62_s26, %s62_s26 }
  0x1e   :  { %p5339_p3 = scmp.ne.s32.totalorder %s62_s26, %s5338_s8  ;;  %p5344_p5 = scmp.lt.s32.totalorder %s5338_s8, %s5338_s8 }
  0x20   :  { %p5345_p6 = por %p5344_p5, %p5343_p4 }
  0x22   :  { %p5346_p7 = pnand %p5345_p6, %p5339_p3 }
  0x24   :  { %5349 = shalt.err (!%p5346_p7)
}
  0x25   :  { %s5516_s4 = smov 64   ;;  %s5517_s1 = smov 4  }
  0x26   :  { %67 = dma.hbm_to_vmem [thread:$0]  %s7592_s29, 3072, %s62_s26, [#allocation5], %s5516_s4, %s5516_s4, %s5517_s1  }
  0x27   :  { %s5350_s0 = scalar_lea.hbm %s7553_s10, 3072 }
  0x28   :  { %p5351_p8 = scmp.ne.s32.totalorder %s7553_s10, %s5350_s0  ;;  %p5354_p9 = scmp.lt.u32.totalorder %s5350_s0, %s7553_s10 }
  0x2a   :  { %p5356_p10 = pnand %p5354_p9, %p5351_p8 }
  0x2c   :  { %5359 = shalt.err (!%p5356_p10)
}
  0x2d   :  { %s5360_s8 = scalar_lea.vmem %s5652_s28, 3072  ;;  %p5365_p12 = scmp.lt.s32.totalorder %s5652_s28, %s5652_s28 }
  0x2e   :  { %p5361_p11 = scmp.ne.s32.totalorder %s5652_s28, %s5360_s8  ;;  %p5366_p13 = scmp.lt.s32.totalorder %s5360_s8, %s5360_s8 }
  0x30   :  { %p5367_p0 = por %p5366_p13, %p5365_p12 }
  0x32   :  { %p5368_p1 = pnand %p5367_p0, %p5361_p11 }
  0x34   :  { %5371 = shalt.err (!%p5368_p1)
}
  0x35   :  { %95 = dma.hbm_to_vmem [thread:$0]  %s7553_s10, 3072, %s5652_s28, [#allocation8], %s5516_s4, %s5516_s4, %s5517_s1  }
  0x36   :  { %s5518_s5 = smov [#allocation10]   ;;  %s5519_s6 = smov [#allocation2]  }
  0x37   :  { %s121_s27 = sshll.u32 %s5518_s5, 4  ;;  %s47_s2 = sshll.u32 %s5519_s6, 4  ;;  %s122_s27 = int_to_ptr.vmem [resolvable:$true] %s121_s27  ;;  %s5689_s2 = int_to_ptr.vmem [resolvable:$true] %s47_s2 }
  0x38   :  { %s5372_s30 = scalar_lea.hbm %s7559_s16, 3072 }
  0x39   :  { %p5373_p2 = scmp.ne.s32.totalorder %s7559_s16, %s5372_s30  ;;  %p5376_p3 = scmp.lt.u32.totalorder %s5372_s30, %s7559_s16 }
  0x3b   :  { %p5378_p4 = pnand %p5376_p3, %p5373_p2 }
  0x3d   :  { %5381 = shalt.err (!%p5378_p4)
}
  0x3e   :  { %s5382_s10 = scalar_lea.vmem %s122_s27, 3072  ;;  %p5387_p6 = scmp.lt.s32.totalorder %s122_s27, %s122_s27 }
  0x3f   :  { %p5383_p5 = scmp.ne.s32.totalorder %s122_s27, %s5382_s10  ;;  %p5388_p7 = scmp.lt.s32.totalorder %s5382_s10, %s5382_s10 }
  0x41   :  { %p5389_p8 = por %p5388_p7, %p5387_p6 }
  0x43   :  { %p5390_p9 = pnand %p5389_p8, %p5383_p5 }
  0x45   :  { %5393 = shalt.err (!%p5390_p9)
}
  0x46   :  { %127 = dma.hbm_to_vmem [thread:$0]  %s7559_s16, 3072, %s122_s27, [#allocation11], %s5516_s4, %s5516_s4, %s5517_s1  }
  0x47   :  { %s7593_s24 = sld [smem:[#allocation24_spill]] }
  0x4d   :  { %s5394_s6 = scalar_lea.hbm %s7593_s24, 3072 }
  0x4e   :  { %p5395_p10 = scmp.ne.s32.totalorder %s7593_s24, %s5394_s6  ;;  %p5398_p11 = scmp.lt.u32.totalorder %s5394_s6, %s7593_s24 }
  0x50   :  { %p5400_p12 = pnand %p5398_p11, %p5395_p10 }
  0x52   :  { %5403 = shalt.err (!%p5400_p12)
}
  0x53   :  { %s5404_s25 = scalar_lea.vmem %s5689_s2, 3072  ;;  %p5409_p0 = scmp.lt.s32.totalorder %s5689_s2, %s5689_s2 }
  0x54   :  { %p5405_p13 = scmp.ne.s32.totalorder %s5689_s2, %s5404_s25  ;;  %p5410_p1 = scmp.lt.s32.totalorder %s5404_s25, %s5404_s25 }
  0x56   :  { %p5411_p2 = por %p5410_p1, %p5409_p0 }
  0x58   :  { %p5412_p3 = pnand %p5411_p2, %p5405_p13 }
  0x5a   :  { %5415 = shalt.err (!%p5412_p3)
}
  0x5b   :  { %53 = dma.hbm_to_vmem [thread:$0]  %s7593_s24, 3072, %s5689_s2, [#allocation3], %s5516_s4, %s5516_s4, %s5517_s1  }
  0x5c   :  { %s5520_s8 = smov [#allocation6]   ;;  %s5521_s28 = smov [#allocation9]  }
  0x5d   :  { %s75_s10 = sshll.u32 %s5520_s8, 4  ;;  %s103_s26 = sshll.u32 %s5521_s28, 4  ;;  %s76_s10 = int_to_ptr.vmem [resolvable:$true] %s75_s10  ;;  %s5726_s26 = int_to_ptr.vmem [resolvable:$true] %s103_s26 }
  0x5e   :  { %s7594_s6 = sld [smem:[#allocation28_spill]] }
  0x64   :  { %s5416_s0 = scalar_lea.hbm %s7594_s6, 3072 }
  0x65   :  { %p5417_p4 = scmp.ne.s32.totalorder %s7594_s6, %s5416_s0  ;;  %p5420_p5 = scmp.lt.u32.totalorder %s5416_s0, %s7594_s6 }
  0x67   :  { %p5422_p6 = pnand %p5420_p5, %p5417_p4 }
  0x69   :  { %5425 = shalt.err (!%p5422_p6)
}
  0x6a   :  { %s5426_s2 = scalar_lea.vmem %s76_s10, 3072  ;;  %p5431_p8 = scmp.lt.s32.totalorder %s76_s10, %s76_s10 }
  0x6b   :  { %p5427_p7 = scmp.ne.s32.totalorder %s76_s10, %s5426_s2  ;;  %p5432_p9 = scmp.lt.s32.totalorder %s5426_s2, %s5426_s2 }
  0x6d   :  { %p5433_p10 = por %p5432_p9, %p5431_p8 }
  0x6f   :  { %p5434_p11 = pnand %p5433_p10, %p5427_p7 }
  0x71   :  { %5437 = shalt.err (!%p5434_p11)
}
  0x72   :  { %81 = dma.hbm_to_vmem [thread:$0]  %s7594_s6, 3072, %s76_s10, [#allocation5], %s5516_s4, %s5516_s4, %s5517_s1  }
  0x73   :  { %s5438_s28 = scalar_lea.hbm %s7555_s12, 1024 }
  0x74   :  { %p5439_p12 = scmp.ne.s32.totalorder %s7555_s12, %s5438_s28  ;;  %p5442_p13 = scmp.lt.u32.totalorder %s5438_s28, %s7555_s12 }
  0x76   :  { %p5444_p0 = pnand %p5442_p13, %p5439_p12 }
  0x78   :  { %5447 = shalt.err (!%p5444_p0)
}
  0x79   :  { %s5448_s30 = scalar_lea.vmem %s5726_s26, 1024  ;;  %p5453_p2 = scmp.lt.s32.totalorder %s5726_s26, %s5726_s26 }
  0x7a   :  { %p5449_p1 = scmp.ne.s32.totalorder %s5726_s26, %s5448_s30  ;;  %p5454_p3 = scmp.lt.s32.totalorder %s5448_s30, %s5448_s30 }
  0x7c   :  { %p5455_p4 = por %p5454_p3, %p5453_p2 }
  0x7e   :  { %p5456_p5 = pnand %p5455_p4, %p5449_p1 }
  0x80   :  { %5459 = shalt.err (!%p5456_p5)
}
  0x81   :  { %109 = dma.hbm_to_vmem [thread:$0]  %s7555_s12, 1024, %s5726_s26, [#allocation8], %s5516_s4, %s5516_s4, %s5517_s1  }
  0x82   :  { %s5522_s3 = smov [#allocation12]   ;;  %s5523_s2 = smov [#allocation13]  }
  0x83   :  { %s135_s25 = sshll.u32 %s5522_s3, 4  ;;  %s153_s24 = sshll.u32 %s5523_s2, 4  ;;  %s136_s25 = int_to_ptr.vmem [resolvable:$true] %s135_s25  ;;  %s5763_s24 = int_to_ptr.vmem [resolvable:$true] %s153_s24 }
  0x84   :  { %s5460_s8 = scalar_lea.hbm %s7561_s18, 1024 }
  0x85   :  { %p5461_p6 = scmp.ne.s32.totalorder %s7561_s18, %s5460_s8  ;;  %p5464_p7 = scmp.lt.u32.totalorder %s5460_s8, %s7561_s18 }
  0x87   :  { %p5466_p8 = pnand %p5464_p7, %p5461_p6 }
  0x89   :  { %5469 = shalt.err (!%p5466_p8)
}
  0x8a   :  { %s5470_s12 = scalar_lea.vmem %s136_s25, 1024  ;;  %p5475_p10 = scmp.lt.s32.totalorder %s136_s25, %s136_s25 }
  0x8b   :  { %p5471_p9 = scmp.ne.s32.totalorder %s136_s25, %s5470_s12  ;;  %p5476_p11 = scmp.lt.s32.totalorder %s5470_s12, %s5470_s12 }
  0x8d   :  { %p5477_p12 = por %p5476_p11, %p5475_p10 }
  0x8f   :  { %p5478_p13 = pnand %p5477_p12, %p5471_p9 }
  0x91   :  { %5481 = shalt.err (!%p5478_p13)
}
  0x92   :  { %141 = dma.hbm_to_vmem [thread:$0]  %s7561_s18, 1024, %s136_s25, [#allocation11], %s5516_s4, %s5516_s4, %s5517_s1  }
  0x93   :  { %s5482_s6 = scalar_lea.hbm %s7565_s22, 1024 }
  0x94   :  { %p5483_p0 = scmp.ne.s32.totalorder %s7565_s22, %s5482_s6  ;;  %p5486_p1 = scmp.lt.u32.totalorder %s5482_s6, %s7565_s22 }
  0x96   :  { %p5488_p2 = pnand %p5486_p1, %p5483_p0 }
  0x98   :  { %5491 = shalt.err (!%p5488_p2)
}
  0x99   :  { %s5492_s8 = scalar_lea.vmem %s5763_s24, 1024  ;;  %p5497_p4 = scmp.lt.s32.totalorder %s5763_s24, %s5763_s24 }
  0x9a   :  { %p5493_p3 = scmp.ne.s32.totalorder %s5763_s24, %s5492_s8  ;;  %p5498_p5 = scmp.lt.s32.totalorder %s5492_s8, %s5492_s8 }
  0x9c   :  { %p5499_p6 = por %p5498_p5, %p5497_p4 }
  0x9e   :  { %p5500_p7 = pnand %p5499_p6, %p5493_p3 }
  0xa0   :  { %5503 = shalt.err (!%p5500_p7)
}
  0xa1   :  { %159 = dma.hbm_to_vmem [thread:$0]  %s7565_s22, 1024, %s5763_s24, [#allocation14], %s5516_s4, %s5516_s4, %s5517_s1  }
  0xa2   :  { %5504 = dma.done.wait [#allocation3], 3072  }
  0xa3   :  { %5505 = vsyncadd [#allocation3], 4294964224 }
  0xa4   :  { %5506 = dma.done.wait [#allocation5], 6144  }
  0xa5   :  { %5507 = vsyncadd [#allocation5], 4294961152 }
  0xa6   :  { %5508 = dma.done.wait [#allocation8], 4096  }
  0xa7   :  { %5509 = vsyncadd [#allocation8], 4294963200 }
  0xa8   :  { %5510 = dma.done.wait [#allocation11], 4096  }
  0xa9   :  { %5511 = vsyncadd [#allocation11], 4294963200 }
  0xaa   :  { %5512 = dma.done.wait [#allocation14], 1024  }
  0xab   :  { %5513 = vsyncadd [#allocation14], 4294966272  ;;  %v5524_v0 = vmov 0.0   ;;  %vm5525_vm0 = vmmov 0   ;;  %v5526_v1 = vmov 0   ;;  %vm243_vm1 = vcmask 1041408  }
  0xac   :  { %4677 = vmatprep.subr.bf16.mxu0 %v5524_v0  ;;  %4679 = vmatprep.mubr.msk.bf16.mxu0 %vm5525_vm0, %v5524_v0  ;;  %s7595_s1 = sld [smem:[#allocation22_spill]]  ;;  %s7596_s29 = sld [smem:[#allocation20_spill]]  ;;  %vm227_vm2 = vcmask 31744  }
  0xad   :  { %5042 = vset.pattern.permute.xlu0 %v5526_v1  ;;  %5043 = vset.pattern.permute.xlu1 %v5526_v1  ;;  %s7597_s7 = sld [smem:[#allocation21_spill]]  ;;  %s7598_s4 = sld [smem:[#allocation23_spill]] }
  0xae   :  { %s7619_s28 = sld [smem:[#allocation25_spill]]  ;;  %s7620_s12 = sld [smem:[#allocation27_spill]] }
  0xb2   :  { %v214_v2 = vld [vmem:[%s7595_s1] sm:$0x3]  ;;  %v206_v4 = vld [vmem:[%s7596_s29 + $0x8] sm:$0xff]  ;;  %v207_v9 = vld [vmem:[%s7596_s29 + $0x10] sm:$0xff] }
  0xb3   :  { %v205_v3 = vld [vmem:[%s7596_s29] sm:$0xff]  ;;  %v245_v5 = vsel %vm243_vm1, %v214_v2, 0  ;;  %v5823_v8 = vld [vmem:[%s7597_s7 + $0x8] sm:$0xff]  ;;  %v5835_v12 = vld [vmem:[%s7597_s7 + $0x10] sm:$0xff] }
  0xb4   :  { %v215_v6 = vpack.c.bf16 %v206_v4, %v205_v3  ;;  %v5817_v7 = vld [vmem:[%s7597_s7] sm:$0xff]  ;;  %4678 = vmatpush3.bf16.msra.mxu0 %v245_v5  ;;  %vm320_vm5 = vcmp.ge.s32.totalorder %v5823_v8, 1  ;;  %v208_v13 = vld [vmem:[%s7596_s29 + $0x18] sm:$0xff]  ;;  %vm321_vm6 = vcmp.ge.s32.totalorder %v5835_v12, 1  ;;  %vm329_vm7 = vcmp.lt.s32.totalorder %v5823_v8, 19  ;;  %v5864_v18 = vld [vmem:[%s7596_s29 + $0x28] sm:$0xff] }
  0xb5   :  { %vm319_vm3 = vcmp.ge.s32.totalorder %v5817_v7, 1  ;;  %vm328_vm4 = vcmp.lt.s32.totalorder %v5817_v7, 19  ;;  %4699 = vmatprep.subr.bf16.mxu0 %v5524_v0  ;;  %vm330_vm8 = vcmp.lt.s32.totalorder %v5835_v12, 19  ;;  %v5847_v14 = vld [vmem:[%s7597_s7 + $0x18] sm:$0xff]  ;;  %v5852_v15 = vld [vmem:[%s7597_s7 + $0x20] sm:$0xff]  ;;  %v453_v16 = vsel %vm320_vm5, 1, %v5526_v1 }
  0xb6   :  { %v452_v10 = vsel %vm319_vm3, 1, %v5526_v1  ;;  %v525_v11 = vsel %vm328_vm4, 1, %v5526_v1  ;;  %v5859_v17 = vld [vmem:[%s7596_s29 + $0x20] sm:$0xff]  ;;  %v526_v19 = vsel %vm329_vm7, 1, %v5526_v1  ;;  %v5870_v20 = vld [vmem:[%s7597_s7 + $0x28] sm:$0xff]  ;;  %v454_v21 = vsel %vm321_vm6, 1, %v5526_v1 }
  0xb7   :  { %462 = vperm.xlu0 %5042, %v452_v10   ;;  %535 = vperm.xlu1 %5043, %v525_v11   ;;  %v5878_v22 = vld [vmem:[%s7596_s29 + $0x30] sm:$0xff]  ;;  %v5883_v23 = vld [vmem:[%s7596_s29 + $0x38] sm:$0xff]  ;;  %vm322_vm9 = vcmp.ge.s32.totalorder %v5847_v14, 1  ;;  %vm196_vm10 = vcmp.lt.s32.totalorder %v5817_v7, 20  ;;  %v216_v25 = vpack.c.bf16 %v208_v13, %v207_v9  ;;  %v527_v26 = vsel %vm330_vm8, 1, %v5526_v1  ;;  %v5904_v28 = vld [vmem:[%s7597_s7 + $0x40] sm:$0xff] }
  0xb8   :  { %4680 = vmatmul.mubr.msk.bf16.vlgmr.msra.gmra.mrb[0].mxu0 %vm227_vm2, %v215_v6  ;;  %v5889_v24 = vld [vmem:[%s7597_s7 + $0x30] sm:$0xff]  ;;  %vm323_vm11 = vcmp.ge.s32.totalorder %v5852_v15, 1  ;;  %v5899_v27 = vld [vmem:[%s7597_s7 + $0x38] sm:$0xff]  ;;  %v217_v29 = vpack.c.bf16 %v5864_v18, %v5859_v17  ;;  %vm331_vm12 = vcmp.lt.s32.totalorder %v5847_v14, 19  ;;  %vm332_vm13 = vcmp.lt.s32.totalorder %v5852_v15, 19  ;;  %v5913_v30 = vld [vmem:[%s7596_s29 + $0x40] sm:$0xff] }
  0xb9   :  { %4683 = vmatprep.mubr.msk.bf16.mxu0 %vm5525_vm0, %v5524_v0  ;;  %vm324_vm14 = vcmp.ge.s32.totalorder %v5870_v20, 1  ;;  %v455_v31 = vsel %vm322_vm9, 1, %v5526_v1  ;;  %vm325_vm15 = vcmp.ge.s32.totalorder %v5889_v24, 1  ;;  %vm333_vm1 = vcmp.lt.s32.totalorder %v5870_v20, 19 }
  0xba   :  { %vm334_vm3 = vcmp.lt.s32.totalorder %v5889_v24, 19  ;;  %v218_v32 = vpack.c.bf16 %v5883_v23, %v5878_v22  ;;  %v456_v33 = vsel %vm323_vm11, 1, %v5526_v1  ;;  %vm326_vm4 = vcmp.ge.s32.totalorder %v5899_v27, 1 }
  0xbb   :  { %465 = vperm.xlu0 %5042, %v453_v16   ;;  %538 = vperm.xlu1 %5043, %v526_v19   ;;  %vm327_vm5 = vcmp.ge.s32.totalorder %v5904_v28, 1  ;;  %v528_v34 = vsel %vm331_vm12, 1, %v5526_v1  ;;  %v529_v35 = vsel %vm332_vm13, 1, %v5526_v1  ;;  %v219_v36 = vpack.c.bf16 %v5913_v30, %v5913_v30  ;;  %v5045_v30 = vld [vmem:[#allocation2 + $0x88] sm:$0xff]  }
  0xbc   :  { %v457_v37 = vsel %vm324_vm14, 1, %v5526_v1  ;;  %v5931_v38 = vsel %vm325_vm15, 1, %v5526_v1  ;;  %v530_v39 = vsel %vm333_vm1, 1, %v5526_v1  ;;  %v5935_v40 = vsel %vm334_vm3, 1, %v5526_v1 }
  0xbd   :  { %vm335_vm6 = vcmp.lt.s32.totalorder %v5899_v27, 19  ;;  %v5940_v41 = vsel %vm326_vm4, 1, %v5526_v1  ;;  %v5943_v42 = vsel %vm327_vm5, 1, %v5526_v1  ;;  %vm336_vm7 = vcmp.lt.s32.totalorder %v5904_v28, 19 }
  0xbe   :  { %vm204_vm8 = vcmp.lt.s32.totalorder %v5904_v28, 20  ;;  %vm197_vm9 = vcmp.lt.s32.totalorder %v5823_v8, 20  ;;  %vm199_vm11 = vcmp.lt.s32.totalorder %v5847_v14, 20  ;;  %vm198_vm12 = vcmp.lt.s32.totalorder %v5835_v12, 20 }
  0xbf   :  { %468 = vperm.xlu0 %5042, %v454_v21   ;;  %471 = vperm.xlu1 %5043, %v455_v31   ;;  %vm201_vm13 = vcmp.lt.s32.totalorder %v5870_v20, 20  ;;  %v5954_v43 = vsel %vm335_vm6, 1, %v5526_v1  ;;  %v5959_v44 = vsel %vm196_vm10, 1, %v5526_v1  ;;  %vm200_vm14 = vcmp.lt.s32.totalorder %v5852_v15, 20  ;;  %v5048_v31 = vld [vmem:[#allocation2 + $0xa0] sm:$0xff]  }
  0xc0   :  { %4684 = vmatmul.mubr.msk.bf16.gmra.mrb[4].mxu0 %vm227_vm2, %v216_v25  ;;  %vm1408_vm15 = vcmp.ge.s32.totalorder %v5817_v7, 2  ;;  %v5964_v45 = vsel %vm336_vm7, 1, %v5526_v1  ;;  %v5967_v46 = vsel %vm204_vm8, 1, %v5526_v1  ;;  %vm202_vm1 = vcmp.lt.s32.totalorder %v5889_v24, 20 }
  0xc1   :  { %4687 = vmatprep.mubr.msk.bf16.mxu0 %vm5525_vm0, %v5524_v0  ;;  %vm203_vm3 = vcmp.lt.s32.totalorder %v5899_v27, 20  ;;  %v5972_v47 = vsel %vm197_vm9, 1, %v5526_v1  ;;  %v5975_v48 = vsel %vm199_vm11, 1, %v5526_v1  ;;  %v5978_v49 = vsel %vm198_vm12, 1, %v5526_v1 }
  0xc2   :  { %v5981_v50 = vsel %vm201_vm13, 1, %v5526_v1  ;;  %v5984_v51 = vsel %vm200_vm14, 1, %v5526_v1  ;;  %v5987_v52 = vsel %vm1408_vm15, 1, %v5526_v1  ;;  %vm1409_vm10 = vcmp.ge.s32.totalorder %v5823_v8, 2 }
  0xc3   :  { %541 = vperm.xlu0 %5042, %v527_v26   ;;  %544 = vperm.xlu1 %5043, %v528_v34   ;;  %vm1418_vm4 = vcmp.lt.s32.totalorder %v5823_v8, 18  ;;  %v5992_v53 = vsel %vm202_vm1, 1, %v5526_v1  ;;  %v5995_v54 = vsel %vm203_vm3, 1, %v5526_v1  ;;  %vm1417_vm5 = vcmp.lt.s32.totalorder %v5817_v7, 18  ;;  %v5051_v34 = vld [vmem:[#allocation2] sm:$0xff]  }
  0xc4   :  { %vm1411_vm6 = vcmp.ge.s32.totalorder %v5847_v14, 2  ;;  %vm1410_vm7 = vcmp.ge.s32.totalorder %v5835_v12, 2  ;;  %vm1420_vm8 = vcmp.lt.s32.totalorder %v5847_v14, 18  ;;  %vm1419_vm9 = vcmp.lt.s32.totalorder %v5835_v12, 18 }
  0xc5   :  { %vm1413_vm11 = vcmp.ge.s32.totalorder %v5870_v20, 2  ;;  %v6005_v55 = vsel %vm1409_vm10, 1, %v5526_v1  ;;  %v6008_v56 = vsel %vm1418_vm4, 1, %v5526_v1  ;;  %vm1412_vm12 = vcmp.ge.s32.totalorder %v5852_v15, 2 }
  0xc6   :  { %vm1422_vm13 = vcmp.lt.s32.totalorder %v5870_v20, 18  ;;  %v6015_v57 = vsel %vm1417_vm5, 1, %v5526_v1  ;;  %v6018_v58 = vsel %vm1411_vm6, 1, %v5526_v1  ;;  %vm1421_vm14 = vcmp.lt.s32.totalorder %v5852_v15, 18 }
  0xc7   :  { %474 = vperm.xlu0 %5042, %v456_v33   ;;  %477 = vperm.xlu1 %5043, %v457_v37   ;;  %vm1415_vm15 = vcmp.ge.s32.totalorder %v5899_v27, 2  ;;  %v6023_v59 = vsel %vm1410_vm7, 1, %v5526_v1  ;;  %v6026_v60 = vsel %vm1420_vm8, 1, %v5526_v1  ;;  %v6029_v61 = vsel %vm1419_vm9, 1, %v5526_v1  ;;  %v5050_v33 = vld [vmem:[#allocation2 + $0x40] sm:$0xff]   ;;  %v5054_v37 = vld [vmem:[#allocation2 + $0x8] sm:$0xff]  }
  0xc8   :  { %4688 = vmatmul.mubr.msk.bf16.gmra.mrb[8].mxu0 %vm227_vm2, %v217_v29  ;;  %v6032_v62 = vsel %vm1413_vm11, 1, %v5526_v1  ;;  %v6035_v63 = vsel %vm1412_vm12, 1, %v5526_v1  ;;  %v6038_v2 = vsel %vm1422_vm13, 1, %v5526_v1  ;;  %vm1414_vm1 = vcmp.ge.s32.totalorder %v5889_v24, 2  ;;  %v5044_v29 = vld [vmem:[#allocation2 + $0x80] sm:$0xff]   ;;  %4292 = vmatprep.subr.bf16.mxu1 %v5050_v33 }
  0xc9   :  { %4691 = vmatprep.mubr.msk.bf16.mxu0 %vm5525_vm0, %v5524_v0  ;;  %vm2599_vm3 = vcmp.ge.s32.totalorder %v5823_v8, 4  ;;  %v6043_v3 = vsel %vm1421_vm14, 1, %v5526_v1  ;;  %v6046_v4 = vsel %vm1415_vm15, 1, %v5526_v1  ;;  %vm1424_vm10 = vcmp.lt.s32.totalorder %v5899_v27, 18  ;;  %4700 = vmatpush3.bf16.msra.mxu0 %v5044_v29 }
  0xca   :  { %v6050_v5 = vsel %vm2599_vm3, 1, %v5526_v1  ;;  %vm2598_vm4 = vcmp.ge.s32.totalorder %v5817_v7, 4  ;;  %vm2608_vm5 = vcmp.lt.s32.totalorder %v5823_v8, 16  ;;  %vm2607_vm6 = vcmp.lt.s32.totalorder %v5817_v7, 16  ;;  %4701 = vmatprep.subr.bf16.mxu0 %v5524_v0  ;;  %4293 = vmatpush3.bf16.msra.mxu1 %v5051_v34 }
  0xcb   :  { %547 = vperm.xlu0 %5042, %v529_v35   ;;  %550 = vperm.xlu1 %5043, %v530_v39   ;;  %vm2601_vm7 = vcmp.ge.s32.totalorder %v5847_v14, 4  ;;  %v6057_v6 = vsel %vm2598_vm4, 1, %v5526_v1  ;;  %v6060_v9 = vsel %vm2608_vm5, 1, %v5526_v1  ;;  %v6063_v10 = vsel %vm2607_vm6, 1, %v5526_v1  ;;  %v5052_v35 = vld [vmem:[#allocation2 + $0xb0] sm:$0xff]  }
  0xcc   :  { %v6066_v11 = vsel %vm2601_vm7, 1, %v5526_v1  ;;  %vm2600_vm8 = vcmp.ge.s32.totalorder %v5835_v12, 4  ;;  %vm2610_vm9 = vcmp.lt.s32.totalorder %v5847_v14, 16  ;;  %vm2609_vm11 = vcmp.lt.s32.totalorder %v5835_v12, 16  ;;  %v5056_v39 = vld [vmem:[#allocation2 + $0x50] sm:$0xff]  }
  0xcd   :  { %vm2603_vm12 = vcmp.ge.s32.totalorder %v5870_v20, 4  ;;  %v6079_v7 = vsel %vm2600_vm8, 1, %v5526_v1  ;;  %v6082_v8 = vsel %vm2610_vm9, 1, %v5526_v1  ;;  %v6085_v13 = vsel %vm2609_vm11, 1, %v5526_v1  ;;  %4702 = vmatpush3.bf16.msra.mxu0 %v5045_v30 }
  0xce   :  { %v6088_v14 = vsel %vm2603_vm12, 1, %v5526_v1  ;;  %vm2602_vm13 = vcmp.ge.s32.totalorder %v5852_v15, 4  ;;  %vm2612_vm14 = vcmp.lt.s32.totalorder %v5870_v20, 16  ;;  %vm2611_vm15 = vcmp.lt.s32.totalorder %v5852_v15, 16  ;;  %4703 = vmatprep.subr.bf16.mxu0 %v5524_v0 }
  0xcf   :  { %480 = vperm.xlu0 %5042, %v5931_v38   ;;  %483 = vperm.xlu1 %5043, %v5940_v41   ;;  %vm2605_vm3 = vcmp.ge.s32.totalorder %v5899_v27, 4  ;;  %v6097_v12 = vsel %vm2602_vm13, 1, %v5526_v1  ;;  %v6100_v16 = vsel %vm2612_vm14, 1, %v5526_v1  ;;  %v6103_v17 = vsel %vm2611_vm15, 1, %v5526_v1  ;;  %v5055_v38 = vld [vmem:[#allocation2 + $0xb8] sm:$0xff]  }
  0xd0   :  { %4692 = vmatmul.mubr.msk.bf16.gmra.mrb[12].mxu0 %vm227_vm2, %v218_v32  ;;  %v6106_v18 = vsel %vm2605_vm3, 1, %v5526_v1  ;;  %vm2604_vm4 = vcmp.ge.s32.totalorder %v5889_v24, 4  ;;  %vm2614_vm5 = vcmp.lt.s32.totalorder %v5899_v27, 16  ;;  %vm2613_vm6 = vcmp.lt.s32.totalorder %v5889_v24, 16  ;;  %v5049_v32 = vld [vmem:[#allocation2 + $0xa8] sm:$0xff]   ;;  %v5058_v41 = vld [vmem:[#allocation2 + $0x58] sm:$0xff]  }
  0xd1   :  { %4695 = vmatprep.mubr.msk.bf16.mxu0 %vm5525_vm0, %v5524_v0  ;;  %vm2615_vm7 = vcmp.lt.s32.totalorder %v5904_v28, 16  ;;  %v6115_v15 = vsel %vm2604_vm4, 1, %v5526_v1  ;;  %v6118_v19 = vsel %vm2614_vm5, 1, %v5526_v1  ;;  %v6121_v20 = vsel %vm2613_vm6, 1, %v5526_v1 }
  0xd2   :  { %v6124_v21 = vsel %vm2615_vm7, 1, %v5526_v1  ;;  %v1545_v22 = vsel %vm1414_vm1, 1, %v5526_v1  ;;  %vm2606_vm8 = vcmp.ge.s32.totalorder %v5904_v28, 4  ;;  %v1619_v23 = vsel %vm1424_vm10, 1, %v5526_v1 }
  0xd3   :  { %553 = vperm.xlu0 %5042, %v5935_v40   ;;  %556 = vperm.xlu1 %5043, %v5954_v43   ;;  %v6134_v25 = vsel %vm2606_vm8, 1, %v5526_v1  ;;  %vm1416_vm1 = vcmp.ge.s32.totalorder %v5904_v28, 2  ;;  %vm1425_vm10 = vcmp.lt.s32.totalorder %v5904_v28, 18  ;;  %v5046_v28 = vld [vmem:[#allocation2 + $0x90] sm:$0xff]   ;;  %v5060_v43 = vld [vmem:[#allocation2 + $0x60] sm:$0xff]  }
  0xd4   :  { %v1547_v27 = vsel %vm1416_vm1, 1, %v5526_v1  ;;  %4704 = vmatpush3.bf16.msra.mxu0 %v5046_v28  ;;  %v5057_v40 = vld [vmem:[#allocation2 + $0x10] sm:$0xff]  }
  0xd5   :  { %4705 = vmatprep.subr.bf16.mxu0 %v5524_v0 }
  0xd7   :  { %486 = vperm.xlu0 %5042, %v5943_v42   ;;  %559 = vperm.xlu1 %5043, %v5964_v45   ;;  %v5059_v42 = vld [vmem:[#allocation2 + $0x18] sm:$0xff]   ;;  %v5062_v45 = vld [vmem:[#allocation2 + $0x68] sm:$0xff]  }
  0xd8   :  { %4696 = vmatmul.mubr.msk.bf16.gmra.mrb[16].mxu0 %vm227_vm2, %v219_v36  ;;  %vm1423_vm2 = vcmp.lt.s32.totalorder %v5889_v24, 18  ;;  %v1620_v24 = vsel %vm1425_vm10, 1, %v5526_v1  ;;  %v5053_v36 = vld [vmem:[#allocation2 + $0x48] sm:$0xff]  }
  0xd9   :  { %4715 = vmatprep.mubr.msk.bf16.mxu0 %vm5525_vm0, %v5524_v0  ;;  %v1618_v26 = vsel %vm1423_vm2, 1, %v5526_v1  ;;  %v5047_v1 = vld [vmem:[#allocation2 + $0x98] sm:$0xff]   ;;  %4294 = vmatprep.subr.bf16.mxu1 %v5053_v36 }
  0xda   :  { %4706 = vmatpush3.bf16.msra.mxu0 %v5047_v1  ;;  %4295 = vmatpush3.bf16.msra.mxu1 %v5054_v37 }
  0xdb   :  { %1364 = vperm.xlu0 %5042, %v5959_v44   ;;  %1367 = vperm.xlu1 %5043, %v5972_v47   ;;  %v5061_v44 = vld [vmem:[#allocation2 + $0x20] sm:$0xff]   ;;  %v5064_v47 = vld [vmem:[#allocation2 + $0x70] sm:$0xff]  }
  0xdc   :  { %4707 = vmatprep.subr.bf16.mxu0 %v5524_v0  ;;  %4296 = vmatprep.subr.bf16.mxu1 %v5056_v39 }
  0xde   :  { %4708 = vmatpush3.bf16.msra.mxu0 %v5048_v31  ;;  %4297 = vmatpush3.bf16.msra.mxu1 %v5057_v40 }
  0xdf   :  { %1388 = vperm.xlu0 %5042, %v5967_v46   ;;  %1370 = vperm.xlu1 %5043, %v5978_v49   ;;  %v5063_v46 = vld [vmem:[#allocation2 + $0x28] sm:$0xff]   ;;  %v5066_v49 = vld [vmem:[#allocation2 + $0x78] sm:$0xff]  }
  0xe0   :  { %4709 = vmatprep.subr.bf16.mxu0 %v5524_v0  ;;  %4298 = vmatprep.subr.bf16.mxu1 %v5058_v41 }
  0xe2   :  { %4710 = vmatpush3.bf16.msra.mxu0 %v5049_v32  ;;  %4299 = vmatpush3.bf16.msra.mxu1 %v5059_v42 }
  0xe3   :  { %1373 = vperm.xlu0 %5042, %v5975_v48   ;;  %1376 = vperm.xlu1 %5043, %v5984_v51   ;;  %v5065_v48 = vld [vmem:[#allocation2 + $0x30] sm:$0xff]   ;;  %v6201_v51 = vld [vmem:[%s7598_s4] ss:$0 sm:$0xff] }
  0xe4   :  { %4711 = vmatprep.subr.bf16.mxu0 %v5524_v0  ;;  %4300 = vmatprep.subr.bf16.mxu1 %v5060_v43 }
  0xe6   :  { %4712 = vmatpush3.bf16.msra.mxu0 %v5052_v35  ;;  %4301 = vmatpush3.bf16.msra.mxu1 %v5061_v44 }
  0xe7   :  { %1379 = vperm.xlu0 %5042, %v5981_v50   ;;  %1382 = vperm.xlu1 %5043, %v5992_v53   ;;  %v5067_v50 = vld [vmem:[#allocation2 + $0x38] sm:$0xff]  }
  0xe8   :  { %4713 = vmatprep.subr.bf16.mxu0 %v5524_v0  ;;  %4302 = vmatprep.subr.bf16.mxu1 %v5062_v45 }
  0xea   :  { %4714 = vmatpush3.bf16.msra.mxu0 %v5055_v38  ;;  %4303 = vmatpush3.bf16.msra.mxu1 %v5063_v46 }
  0xeb   :  { %1549 = vperm.xlu0 %5042, %v5987_v52   ;;  %1552 = vperm.xlu1 %5043, %v6005_v55  }
  0xec   :  { %4735 = vmatprep.subr.bf16.mxu0 %v5524_v0  ;;  %4304 = vmatprep.subr.bf16.mxu1 %v5064_v47 }
  0xee   :  { %4305 = vmatpush3.bf16.msra.mxu1 %v5065_v48 }
  0xef   :  { %1385 = vperm.xlu0 %5042, %v5995_v54   ;;  %1622 = vperm.xlu1 %5043, %v6015_v57  }
  0xf0   :  { %4306 = vmatprep.subr.bf16.mxu1 %v5066_v49 }
  0xf2   :  { %4307 = vmatpush3.bf16.msra.mxu1 %v5067_v50 }
  0xf3   :  { %1625 = vperm.xlu0 %5042, %v6008_v56   ;;  %1555 = vperm.xlu1 %5043, %v6023_v59  }
  0xf7   :  { %1558 = vperm.xlu0 %5042, %v6018_v58   ;;  %1628 = vperm.xlu1 %5043, %v6029_v61  }
  0xfb   :  { %1631 = vperm.xlu0 %5042, %v6026_v60   ;;  %1561 = vperm.xlu1 %5043, %v6035_v63  }
  0xff   :  { %1564 = vperm.xlu0 %5042, %v6032_v62   ;;  %1634 = vperm.xlu1 %5043, %v6043_v3  }
 0x103   :  { %1637 = vperm.xlu0 %5042, %v6038_v2   ;;  %1567 = vperm.xlu1 %5043, %v1545_v22  }
 0x107   :  { %1570 = vperm.xlu0 %5042, %v6046_v4   ;;  %1640 = vperm.xlu1 %5043, %v1618_v26  }
 0x10b   :  { %1643 = vperm.xlu0 %5042, %v1619_v23   ;;  %1573 = vperm.xlu1 %5043, %v1547_v27  }
 0x10f   :  { %1646 = vperm.xlu0 %5042, %v1620_v24   ;;  %2739 = vperm.xlu1 %5043, %v6057_v6  }
 0x113   :  { %2742 = vperm.xlu0 %5042, %v6050_v5   ;;  %2793 = vperm.xlu1 %5043, %v6063_v10  }
 0x117   :  { %2796 = vperm.xlu0 %5042, %v6060_v9   ;;  %2745 = vperm.xlu1 %5043, %v6079_v7  }
 0x11b   :  { %2748 = vperm.xlu0 %5042, %v6066_v11   ;;  %2799 = vperm.xlu1 %5043, %v6085_v13  }
 0x11f   :  { %2802 = vperm.xlu0 %5042, %v6082_v8   ;;  %2751 = vperm.xlu1 %5043, %v6097_v12  }
 0x123   :  { %2754 = vperm.xlu0 %5042, %v6088_v14   ;;  %2805 = vperm.xlu1 %5043, %v6103_v17  }
 0x127   :  { %2808 = vperm.xlu0 %5042, %v6100_v16   ;;  %2757 = vperm.xlu1 %5043, %v6115_v15  }
 0x12b   :  { %2760 = vperm.xlu0 %5042, %v6106_v18   ;;  %2811 = vperm.xlu1 %5043, %v6121_v20   ;;  %v440_v20 = vlaneseq }
 0x12d   :  { %v6241_v30 = vshrl.u32 %v440_v20, 7 }
 0x12f   :  { %2814 = vperm.xlu0 %5042, %v6118_v19   ;;  %2763 = vperm.xlu1 %5043, %v6134_v25   ;;  %vm515_vm9 = vcmp.lt.s32.totalorder %v6241_v30, 7  ;;  %vm442_vm8 = vcmp.lt.s32.totalorder %v6241_v30, 1 }
 0x133   :  { %2817 = vperm.xlu0 %5042, %v6124_v21  }
 0x136   :  { %v6211_v61 = vpop.permute.xlu0 %462  ;;  %v536_v2 = vpop.permute.xlu1 %535 }
 0x137   :  { %vm561_vm11 = vcmp.eq.s32.totalorder %v536_v2, 1  ;;  %vm488_vm7 = vcmp.eq.s32.totalorder %v6211_v61, 1 }
 0x13a   :  { %v6221_v11 = vpop.permute.xlu0 %465  ;;  %v539_v7 = vpop.permute.xlu1 %538 }
 0x13b   :  { %vm562_vm12 = vcmp.eq.s32.totalorder %v539_v7, 1  ;;  %vm489_vm2 = vcmp.eq.s32.totalorder %v6221_v11, 1 }
 0x13c   :  { %vm6261_vm13 = vmpackc.low %vm562_vm12, %vm561_vm11 }
 0x13d   :  { %vm6348_vm11 = vmpackc.low %vm489_vm2, %vm488_vm7 }
 0x13e   :  { %v6236_v27 = vpop.permute.xlu0 %468  ;;  %v6239_v29 = vpop.permute.xlu1 %471 }
 0x142   :  { %v542_v41 = vpop.permute.xlu0 %541  ;;  %v545_v45 = vpop.permute.xlu1 %544 }
 0x143   :  { %vm563_vm14 = vcmp.eq.s32.totalorder %v542_v41, 1  ;;  %vm564_vm15 = vcmp.eq.s32.totalorder %v545_v45, 1 }
 0x144   :  { %vm6291_vm3 = vmpackc.low %vm564_vm15, %vm563_vm14  ;;  %vm490_vm14 = vcmp.eq.s32.totalorder %v6236_v27, 1  ;;  %vm491_vm15 = vcmp.eq.s32.totalorder %v6239_v29, 1  ;;  %v5093_v29 = vld [vmem:[#allocation6 + $0x88] sm:$0xff]  }
 0x18b   :  { %v281_v52 = vpop.f32.mrb[0].mxu0 }
 0x18c   :  { %v6204_v53 = vadd.f32 %v6201_v51, %v281_v52  ;;  %v4681_v54 = vpop.f32.mrb[1].mxu0 }
 0x18d   :  { %v284_v55 = vpop.f32.mrb[2].mxu0 }
 0x18e   :  { %v346_v56 = vmul.f32 0.70710677, %v6204_v53  ;;  %v6208_v57 = vadd.f32 %v6201_v51, %v284_v55  ;;  %v4682_v58 = vpop.f32.mrb[3].mxu0  ;;  %v337_v17 = vmul.f32 0.5, %v6204_v53 }
 0x190   :  { %5212 = verf.f32 %v346_v56  ;;  %v347_v59 = vmul.f32 0.70710677, %v6208_v57  ;;  %v338_v18 = vmul.f32 0.5, %v6208_v57 }
 0x192   :  { %5214 = verf.f32 %v347_v59 }
 0x193   :  { %v289_v60 = vpop.f32.mrb[4].mxu0 }
 0x194   :  { %v6214_v62 = vadd.f32 %v6201_v51, %v289_v60  ;;  %v4685_v63 = vpop.f32.mrb[5].mxu0 }
 0x195   :  { %v292_v3 = vpop.f32.mrb[6].mxu0 }
 0x196   :  { %v348_v4 = vmul.f32 0.70710677, %v6214_v62  ;;  %v6218_v5 = vadd.f32 %v6201_v51, %v292_v3  ;;  %v4686_v6 = vpop.f32.mrb[7].mxu0  ;;  %v339_v31 = vmul.f32 0.5, %v6214_v62  ;;  %v6274_v3 = vpop.permute.xlu0 %474 }
 0x197   :  { %vm492_vm2 = vcmp.eq.s32.totalorder %v6274_v3, 1 }
 0x198   :  { %5216 = verf.f32 %v348_v4  ;;  %v349_v9 = vmul.f32 0.70710677, %v6218_v5  ;;  %v340_v47 = vmul.f32 0.5, %v6218_v5 }
 0x19a   :  { %v5213_v10 = vpop.eup %5212  ;;  %5218 = verf.f32 %v349_v9  ;;  %v6281_v9 = vpop.permute.xlu1 %477 }
 0x19b   :  { %v297_v8 = vpop.f32.mrb[8].mxu0  ;;  %v364_v13 = vadd.f32 1.0, %v5213_v10 }
 0x19c   :  { %v5215_v14 = vpop.eup %5214  ;;  %v6224_v12 = vadd.f32 %v6201_v51, %v297_v8  ;;  %v4689_v16 = vpop.f32.mrb[9].mxu0 }
 0x19d   :  { %v300_v15 = vpop.f32.mrb[10].mxu0  ;;  %v365_v19 = vadd.f32 1.0, %v5215_v14  ;;  %v6232_v25 = vmul.f32 %v364_v13, %v337_v17 }
 0x19e   :  { %v350_v21 = vmul.f32 0.70710677, %v6224_v12  ;;  %v6230_v22 = vadd.f32 %v6201_v51, %v300_v15  ;;  %v4690_v23 = vpop.f32.mrb[11].mxu0  ;;  %v341_v59 = vmul.f32 0.5, %v6224_v12 }
 0x19f   :  { %v6234_v26 = vmul.f32 %v365_v19, %v338_v18  ;;  %v506_v48 = vrot.slane %v6232_v25, 1 }
 0x1a0   :  { %5220 = verf.f32 %v350_v21  ;;  %v351_v24 = vmul.f32 0.70710677, %v6230_v22  ;;  %v342_v17 = vmul.f32 0.5, %v6230_v22 }
 0x1a1   :  { %v584_v28 = vpack.c.bf16 %v6234_v26, %v6232_v25  ;;  %v507_v39 = vrot.slane %v6234_v26, 1 }
 0x1a2   :  { %v5217_v1 = vpop.eup %5216  ;;  %5222 = verf.f32 %v351_v24  ;;  %v548_v24 = vpop.permute.xlu0 %547 }
 0x1a3   :  { %v366_v32 = vadd.f32 1.0, %v5217_v1  ;;  %v305_v33 = vpop.f32.mrb[12].mxu0  ;;  %776 = vmatprep.mubr.bf16.mxu1 %v584_v28  ;;  %v523_v55 = vsel %vm515_vm9, %v506_v48, %v507_v39  ;;  %v551_v28 = vpop.permute.xlu1 %550  ;;  %vm565_vm4 = vcmp.eq.s32.totalorder %v548_v24, 1  ;;  %v5092_v24 = vld [vmem:[#allocation6 + $0x80] sm:$0xff]  }
 0x1a4   :  { %v5219_v34 = vpop.eup %5218  ;;  %v6247_v35 = vadd.f32 %v6201_v51, %v305_v33  ;;  %v4693_v36 = vpop.f32.mrb[13].mxu0  ;;  %vm566_vm5 = vcmp.eq.s32.totalorder %v551_v28, 1 }
 0x1a5   :  { %v6249_v37 = vmul.f32 %v366_v32, %v339_v31  ;;  %v367_v38 = vadd.f32 1.0, %v5219_v34  ;;  %v308_v40 = vpop.f32.mrb[14].mxu0  ;;  %vm6313_vm6 = vmpackc.low %vm566_vm5, %vm565_vm4 }
 0x1a6   :  { %v352_v42 = vmul.f32 0.70710677, %v6247_v35  ;;  %v6255_v43 = vadd.f32 %v6201_v51, %v308_v40  ;;  %v4694_v44 = vpop.f32.mrb[15].mxu0  ;;  %v343_v1 = vmul.f32 0.5, %v6247_v35  ;;  %v6311_v40 = vpop.permute.xlu0 %480  ;;  %vm6376_vm5 = vmpackc.low %vm491_vm15, %vm490_vm14 }
 0x1a7   :  { %v508_v46 = vrot.slane %v6249_v37, 1  ;;  %v6265_v52 = vmul.f32 %v367_v38, %v340_v47  ;;  %vm494_vm14 = vcmp.eq.s32.totalorder %v6311_v40, 1 }
 0x1a8   :  { %5224 = verf.f32 %v352_v42  ;;  %v353_v49 = vmul.f32 0.70710677, %v6255_v43  ;;  %v6317_v42 = vpop.permute.xlu1 %483 }
 0x1a9   :  { %v522_v54 = vsel %vm515_vm9, %v507_v39, %v508_v46  ;;  %v509_v10 = vrot.slane %v6265_v52, 1  ;;  %v344_v39 = vmul.f32 0.5, %v6255_v43  ;;  %vm495_vm15 = vcmp.eq.s32.totalorder %v6317_v42, 1 }
 0x1aa   :  { %v5221_v56 = vpop.eup %5220  ;;  %v3951_v58 = vpack.c.bf16 %v522_v54, %v523_v55  ;;  %5226 = verf.f32 %v353_v49 }
 0x1ab   :  { %v368_v60 = vadd.f32 1.0, %v5221_v56  ;;  %v313_v63 = vpop.f32.mrb[16].mxu0  ;;  %v521_v20 = vsel %vm515_vm9, %v508_v46, %v509_v10  ;;  %v432_v56 = vrot.slane %v6234_v26, 7 }
 0x1ac   :  { %v5223_v2 = vpop.eup %5222  ;;  %v6277_v4 = vadd.f32 %v6201_v51, %v313_v63  ;;  %v4697_v6 = vpop.f32.mrb[17].mxu0  ;;  %4716 = vmatmul.mubr.msk.bf16.vlgmr.msra.gmra.mrb[20].mxu0 %vm6261_vm13, %v3951_v58 }
 0x1ad   :  { %v6284_v7 = vmul.f32 %v368_v60, %v341_v59  ;;  %v369_v8 = vadd.f32 1.0, %v5223_v2  ;;  %v316_v13 = vpop.f32.mrb[18].mxu0  ;;  %4719 = vmatprep.mubr.msk.bf16.mxu0 %vm5525_vm0, %v5524_v0  ;;  %v554_v60 = vpop.permute.xlu0 %553  ;;  %v431_v2 = vrot.slane %v6232_v25, 7 }
 0x1ae   :  { %v354_v51 = vmul.f32 0.70710677, %v6277_v4  ;;  %v4698_v14 = vpop.f32.mrb[19].mxu0  ;;  %v345_v54 = vmul.f32 0.5, %v6277_v4  ;;  %v557_v63 = vpop.permute.xlu1 %556  ;;  %vm567_vm1 = vcmp.eq.s32.totalorder %v554_v60, 1  ;;  %v5073_v60 = vld [vmem:[#allocation4] sm:$0xff]  }
 0x1af   :  { %v510_v16 = vrot.slane %v6284_v7, 1  ;;  %v6295_v15 = vmul.f32 %v369_v8, %v342_v17  ;;  %vm568_vm10 = vcmp.eq.s32.totalorder %v557_v63, 1  ;;  %v434_v17 = vrot.slane %v6265_v52, 7  ;;  %v5079_v63 = vld [vmem:[#allocation4 + $0xb0] sm:$0xff]  }
 0x1b0   :  { %5228 = verf.f32 %v354_v51  ;;  %vm6352_vm12 = vmpackc.low %vm568_vm10, %vm567_vm1  ;;  %vm493_vm1 = vcmp.eq.s32.totalorder %v6281_v9, 1 }
 0x1b1   :  { %v520_v19 = vsel %vm515_vm9, %v509_v10, %v510_v16  ;;  %v511_v33 = vrot.slane %v6295_v15, 1  ;;  %v450_v10 = vsel %vm442_vm8, %v431_v2, %v432_v56  ;;  %v586_v25 = vpack.c.bf16 %v6295_v15, %v6284_v7  ;;  %vm6400_vm10 = vmpackc.low %vm493_vm1, %vm492_vm2 }
 0x1b2   :  { %v5225_v21 = vpop.eup %5224  ;;  %v3954_v23 = vpack.c.bf16 %v520_v19, %v521_v20  ;;  %v585_v19 = vpack.c.bf16 %v6265_v52, %v6249_v37  ;;  %v433_v20 = vrot.slane %v6249_v37, 7 }
 0x1b3   :  { %v370_v31 = vadd.f32 1.0, %v5225_v21  ;;  %v519_v46 = vsel %vm515_vm9, %v510_v16, %v511_v33  ;;  %v560_v21 = vpop.permute.xlu1 %559 }
 0x1b4   :  { %v5227_v32 = vpop.eup %5226  ;;  %4720 = vmatmul.mubr.msk.bf16.gmra.mrb[24].mxu0 %vm6291_vm3, %v3954_v23  ;;  %v448_v52 = vsel %vm442_vm8, %v433_v20, %v434_v17  ;;  %vm569_vm4 = vcmp.eq.s32.totalorder %v560_v21, 1  ;;  %v449_v37 = vsel %vm442_vm8, %v432_v56, %v433_v20  ;;  %v5074_v56 = vld [vmem:[#allocation4 + $0xa0] sm:$0xff]   ;;  %v5088_v20 = vld [vmem:[#allocation4 + $0x70] sm:$0xff]  }
 0x1b5   :  { %v6305_v34 = vmul.f32 %v370_v31, %v343_v1  ;;  %v371_v36 = vadd.f32 1.0, %v5227_v32  ;;  %4723 = vmatprep.mubr.msk.bf16.mxu0 %vm5525_vm0, %v5524_v0  ;;  %v3939_v27 = vpack.c.bf16 %v448_v52, %v449_v37  ;;  %vm6380_vm7 = vmpackc.low %vm569_vm4, %vm569_vm4  ;;  %v436_v1 = vrot.slane %v6295_v15, 7  ;;  %v5089_v21 = vld [vmem:[#allocation4 + $0x30] sm:$0xff]   ;;  %v5090_v52 = vld [vmem:[#allocation4 + $0x78] sm:$0xff]  }
 0x1b6   :  { %vm6416_vm4 = vmpackc.low %vm495_vm15, %vm494_vm14 }
 0x1b7   :  { %v512_v38 = vrot.slane %v6305_v34, 1  ;;  %v6319_v44 = vmul.f32 %v371_v36, %v344_v39  ;;  %v437_v3 = vrot.slane %v6305_v34, 7 }
 0x1b9   :  { %v518_v45 = vsel %vm515_vm9, %v511_v33, %v512_v38  ;;  %v513_v58 = vrot.slane %v6319_v44, 1  ;;  %v587_v36 = vpack.c.bf16 %v6319_v44, %v6305_v34  ;;  %v487_v34 = vpop.permute.xlu0 %486  ;;  %v5094_v33 = vld [vmem:[#allocation6 + $0x90] sm:$0xff]  }
 0x1ba   :  { %v5229_v47 = vpop.eup %5228  ;;  %v3957_v49 = vpack.c.bf16 %v518_v45, %v519_v46  ;;  %vm496_vm2 = vcmp.eq.s32.totalorder %v487_v34, 1  ;;  %v5098_v45 = vld [vmem:[#allocation6 + $0xa0] sm:$0xff]   ;;  %v5101_v46 = vld [vmem:[#allocation6 + $0xa8] sm:$0xff]  }
 0x1bb   :  { %v372_v55 = vadd.f32 1.0, %v5229_v47  ;;  %v517_v11 = vsel %vm515_vm9, %v512_v38, %v513_v58  ;;  %v445_v38 = vsel %vm442_vm8, %v436_v1, %v437_v3  ;;  %vm6426_vm1 = vmpackc.low %vm496_vm2, %vm496_vm2  ;;  %v5068_v47 = vld [vmem:[#allocation4 + $0x80] sm:$0xff]  }
 0x1bc   :  { %4724 = vmatmul.mubr.msk.bf16.gmra.mrb[28].mxu0 %vm6313_vm6, %v3957_v49  ;;  %v5069_v49 = vld [vmem:[#allocation4 + $0x88] sm:$0xff]  }
 0x1bd   :  { %v6330_v59 = vmul.f32 %v372_v55, %v345_v54  ;;  %4727 = vmatprep.mubr.msk.bf16.mxu0 %vm5525_vm0, %v5524_v0  ;;  %4736 = vmatpush3.bf16.msra.mxu0 %v5068_v47  ;;  %v5070_v54 = vld [vmem:[#allocation4 + $0x90] sm:$0xff]   ;;  %v5071_v55 = vld [vmem:[#allocation4 + $0x98] sm:$0xff]  }
 0x1be   :  { %4737 = vmatprep.subr.bf16.mxu0 %v5524_v0 }
 0x1bf   :  { %v439_v6 = vrot.slane %v6330_v59, 7  ;;  %v514_v26 = vrot.slane %v6330_v59, 1 }
 0x1c1   :  { %v451_v61 = vsel %vm442_vm8, %v439_v6, %v431_v2  ;;  %v516_v8 = vsel %vm515_vm9, %v513_v58, %v514_v26  ;;  %v524_v23 = vsel %vm515_vm9, %v514_v26, %v506_v48  ;;  %v435_v48 = vrot.slane %v6284_v7, 7  ;;  %4738 = vmatpush3.bf16.msra.mxu0 %v5069_v49  ;;  %v5077_v58 = vld [vmem:[#allocation4 + $0xa8] sm:$0xff]   ;;  %v5081_v26 = vld [vmem:[#allocation4 + $0xb8] sm:$0xff]  }
 0x1c2   :  { %v3936_v51 = vpack.c.bf16 %v450_v10, %v451_v61  ;;  %v3960_v14 = vpack.c.bf16 %v516_v8, %v517_v11  ;;  %v3963_v28 = vpack.c.bf16 %v524_v23, %v524_v23  ;;  %v438_v7 = vrot.slane %v6319_v44, 7  ;;  %4739 = vmatprep.subr.bf16.mxu0 %v5524_v0  ;;  %v5075_v2 = vld [vmem:[#allocation4 + $0x48] sm:$0xff]   ;;  %v5078_v10 = vld [vmem:[#allocation4 + $0x50] sm:$0xff]   ;;  %v5082_v8 = vld [vmem:[#allocation4 + $0x58] sm:$0xff]  }
 0x1c3   :  { %v446_v31 = vsel %vm442_vm8, %v435_v48, %v436_v1  ;;  %v447_v15 = vsel %vm442_vm8, %v434_v17, %v435_v48  ;;  %v588_v44 = vpack.c.bf16 %v6330_v59, %v6330_v59  ;;  %v5072_v59 = vld [vmem:[#allocation4 + $0x40] sm:$0xff]   ;;  %v5080_v61 = vld [vmem:[#allocation4 + $0x10] sm:$0xff]   ;;  %v5083_v11 = vld [vmem:[#allocation4 + $0x18] sm:$0xff]  }
 0x1c4   :  { %3937 = vmatmul.mubr.msk.bf16.vlgmr.msra.gmra.mrb[0].mxu1 %vm6348_vm11, %v3936_v51  ;;  %4728 = vmatmul.mubr.msk.bf16.gmra.mrb[32].mxu0 %vm6352_vm12, %v3960_v14  ;;  %v3942_v32 = vpack.c.bf16 %v446_v31, %v447_v15  ;;  %v444_v9 = vsel %vm442_vm8, %v437_v3, %v438_v7  ;;  %v443_v40 = vsel %vm442_vm8, %v438_v7, %v439_v6  ;;  %v5076_v6 = vld [vmem:[#allocation4 + $0x8] sm:$0xff]   ;;  %v5084_v51 = vld [vmem:[#allocation4 + $0x60] sm:$0xff]   ;;  %v5091_v23 = vld [vmem:[#allocation4 + $0x38] sm:$0xff]  }
 0x1c5   :  { %784 = vmatprep.mubr.bf16.mxu1 %v585_v19  ;;  %4731 = vmatprep.mubr.msk.bf16.mxu0 %vm5525_vm0, %v5524_v0  ;;  %v3945_v39 = vpack.c.bf16 %v444_v9, %v445_v38  ;;  %v3948_v42 = vpack.c.bf16 %v443_v40, %v443_v40  ;;  %v5085_v14 = vld [vmem:[#allocation4 + $0x20] sm:$0xff]   ;;  %v5086_v17 = vld [vmem:[#allocation4 + $0x68] sm:$0xff]  }
 0x1c6   :  { %4740 = vmatpush3.bf16.msra.mxu0 %v5070_v54  ;;  %4351 = vmatprep.subr.bf16.mxu1 %v5072_v59  ;;  %v5087_v19 = vld [vmem:[#allocation4 + $0x28] sm:$0xff]  }
 0x1c7   :  { %4741 = vmatprep.subr.bf16.mxu0 %v5524_v0  ;;  %4352 = vmatpush3.bf16.msra.mxu1 %v5073_v60 }
 0x1c8   :  { %4353 = vmatprep.subr.bf16.mxu1 %v5075_v2 }
 0x1ca   :  { %4742 = vmatpush3.bf16.msra.mxu0 %v5071_v55 }
 0x1cb   :  { %4743 = vmatprep.subr.bf16.mxu0 %v5524_v0  ;;  %4354 = vmatpush3.bf16.msra.mxu1 %v5076_v6 }
 0x1cc   :  { %3940 = vmatmul.mubr.msk.bf16.gmra.mrb[4].mxu1 %vm6376_vm5, %v3939_v27  ;;  %4732 = vmatmul.mubr.msk.bf16.gmra.mrb[36].mxu0 %vm6380_vm7, %v3963_v28 }
 0x1cd   :  { %792 = vmatprep.mubr.bf16.mxu1 %v586_v25  ;;  %4751 = vmatprep.mubr.msk.bf16.mxu0 %vm5525_vm0, %v5524_v0 }
 0x1ce   :  { %4744 = vmatpush3.bf16.msra.mxu0 %v5074_v56  ;;  %4355 = vmatprep.subr.bf16.mxu1 %v5078_v10 }
 0x1cf   :  { %4745 = vmatprep.subr.bf16.mxu0 %v5524_v0  ;;  %4356 = vmatpush3.bf16.msra.mxu1 %v5080_v61 }
 0x1d0   :  { %4357 = vmatprep.subr.bf16.mxu1 %v5082_v8 }
 0x1d2   :  { %4746 = vmatpush3.bf16.msra.mxu0 %v5077_v58 }
 0x1d3   :  { %4747 = vmatprep.subr.bf16.mxu0 %v5524_v0  ;;  %4358 = vmatpush3.bf16.msra.mxu1 %v5083_v11 }
 0x1d4   :  { %3943 = vmatmul.mubr.msk.bf16.gmra.mrb[8].mxu1 %vm6400_vm10, %v3942_v32  ;;  %4359 = vmatprep.subr.bf16.mxu1 %v5084_v51 }
 0x1d5   :  { %800 = vmatprep.mubr.bf16.mxu1 %v587_v36 }
 0x1d6   :  { %4748 = vmatpush3.bf16.msra.mxu0 %v5079_v63 }
 0x1d7   :  { %4749 = vmatprep.subr.bf16.mxu0 %v5524_v0  ;;  %4360 = vmatpush3.bf16.msra.mxu1 %v5085_v14 }
 0x1d8   :  { %4361 = vmatprep.subr.bf16.mxu1 %v5086_v17 }
 0x1da   :  { %4750 = vmatpush3.bf16.msra.mxu0 %v5081_v26 }
 0x1db   :  { %4771 = vmatprep.subr.bf16.mxu0 %v5524_v0  ;;  %4362 = vmatpush3.bf16.msra.mxu1 %v5087_v19 }
 0x1dc   :  { %3946 = vmatmul.mubr.msk.bf16.gmra.mrb[12].mxu1 %vm6416_vm4, %v3945_v39  ;;  %4363 = vmatprep.subr.bf16.mxu1 %v5088_v20  ;;  %v6445_v39 = vld [vmem:[%s7619_s28] ss:$0 sm:$0xff] }
 0x1dd   :  { %808 = vmatprep.mubr.bf16.mxu1 %v588_v44 }
 0x1df   :  { %4364 = vmatpush3.bf16.msra.mxu1 %v5089_v21 }
 0x1e0   :  { %4365 = vmatprep.subr.bf16.mxu1 %v5090_v52 }
 0x1e3   :  { %4366 = vmatpush3.bf16.msra.mxu1 %v5091_v23 }
 0x1e4   :  { %3949 = vmatmul.mubr.msk.bf16.gmra.mrb[16].mxu1 %vm6426_vm1, %v3948_v42 }
 0x27f   :  { %v850_v37 = vpop.f32.mrb[20].mxu0 }
 0x280   :  { %v4717_v27 = vpop.f32.mrb[21].mxu0 }
 0x281   :  { %v853_v28 = vpop.f32.mrb[22].mxu0 }
 0x282   :  { %v4718_v1 = vpop.f32.mrb[23].mxu0 }
 0x287   :  { %v858_v25 = vpop.f32.mrb[24].mxu0 }
 0x288   :  { %v4721_v48 = vpop.f32.mrb[25].mxu0 }
 0x289   :  { %v861_v31 = vpop.f32.mrb[26].mxu0 }
 0x28a   :  { %v4722_v15 = vpop.f32.mrb[27].mxu0 }
 0x28f   :  { %v866_v32 = vpop.f32.mrb[28].mxu0 }
 0x290   :  { %v4725_v7 = vpop.f32.mrb[29].mxu0 }
 0x291   :  { %v869_v36 = vpop.f32.mrb[30].mxu0 }
 0x292   :  { %v4726_v3 = vpop.f32.mrb[31].mxu0 }
 0x297   :  { %v4308_v9 = vpop.f32.mrb[0].mxu1  ;;  %v6440_v38 = vpop.f32.mrb[32].mxu0 }
 0x298   :  { %v4309_v44 = vpop.f32.mrb[1].mxu1  ;;  %v4729_v34 = vpop.f32.mrb[33].mxu0 }
 0x299   :  { %v4310_v40 = vadd.f32 %v4309_v44, %v4308_v9  ;;  %v4311_v42 = vpop.f32.mrb[2].mxu1  ;;  %v6447_v47 = vpop.f32.mrb[34].mxu0 }
 0x29a   :  { %v4312_v49 = vpop.f32.mrb[3].mxu1  ;;  %v4730_v54 = vpop.f32.mrb[35].mxu0 }
 0x29b   :  { %v779_v55 = vadd.f32 %v4310_v40, %v6445_v39  ;;  %v4313_v56 = vadd.f32 %v4312_v49, %v4311_v42 }
 0x29d   :  { %v851_v58 = vadd.f32 %v850_v37, %v779_v55  ;;  %v782_v59 = vadd.f32 %v4313_v56, %v6445_v39 }
 0x29f   :  { %v897_v60 = vmul.f32 0.70710677, %v851_v58  ;;  %v854_v63 = vadd.f32 %v853_v28, %v782_v59  ;;  %v4314_v2 = vpop.f32.mrb[4].mxu1  ;;  %v6451_v6 = vpop.f32.mrb[36].mxu0  ;;  %v888_v34 = vmul.f32 0.5, %v851_v58 }
 0x2a0   :  { %v4315_v26 = vpop.f32.mrb[5].mxu1  ;;  %v4733_v10 = vpop.f32.mrb[37].mxu0 }
 0x2a1   :  { %5230 = verf.f32 %v897_v60  ;;  %v898_v61 = vmul.f32 0.70710677, %v854_v63  ;;  %v4316_v8 = vadd.f32 %v4315_v26, %v4314_v2  ;;  %v4317_v11 = vpop.f32.mrb[6].mxu1  ;;  %v885_v51 = vpop.f32.mrb[38].mxu0  ;;  %v889_v54 = vmul.f32 0.5, %v854_v63 }
 0x2a2   :  { %v4318_v14 = vpop.f32.mrb[7].mxu1  ;;  %v4734_v17 = vpop.f32.mrb[39].mxu0 }
 0x2a3   :  { %5232 = verf.f32 %v898_v61  ;;  %v787_v19 = vadd.f32 %v4316_v8, %v6445_v39  ;;  %v4319_v20 = vadd.f32 %v4318_v14, %v4317_v11 }
 0x2a5   :  { %v859_v21 = vadd.f32 %v858_v25, %v787_v19  ;;  %v790_v52 = vadd.f32 %v4319_v20, %v6445_v39 }
 0x2a7   :  { %v899_v23 = vmul.f32 0.70710677, %v859_v21  ;;  %v862_v37 = vadd.f32 %v861_v31, %v790_v52  ;;  %v4320_v27 = vpop.f32.mrb[8].mxu1  ;;  %v890_v20 = vmul.f32 0.5, %v859_v21 }
 0x2a8   :  { %v4321_v28 = vpop.f32.mrb[9].mxu1 }
 0x2a9   :  { %5234 = verf.f32 %v899_v23  ;;  %v900_v1 = vmul.f32 0.70710677, %v862_v37  ;;  %v4322_v48 = vadd.f32 %v4321_v28, %v4320_v27  ;;  %v4323_v15 = vpop.f32.mrb[10].mxu1  ;;  %v891_v21 = vmul.f32 0.5, %v862_v37 }
 0x2aa   :  { %v4324_v7 = vpop.f32.mrb[11].mxu1 }
 0x2ab   :  { %v5231_v3 = vpop.eup %5230  ;;  %5236 = verf.f32 %v900_v1  ;;  %v795_v9 = vadd.f32 %v4322_v48, %v6445_v39  ;;  %v4325_v44 = vadd.f32 %v4324_v7, %v4323_v15 }
 0x2ac   :  { %v915_v40 = vadd.f32 1.0, %v5231_v3 }
 0x2ad   :  { %v5233_v42 = vpop.eup %5232  ;;  %v867_v25 = vadd.f32 %v866_v32, %v795_v9  ;;  %v798_v49 = vadd.f32 %v4325_v44, %v6445_v39 }
 0x2ae   :  { %v916_v31 = vadd.f32 1.0, %v5233_v42  ;;  %v6457_v55 = vmul.f32 %v915_v40, %v888_v34 }
 0x2af   :  { %v901_v56 = vmul.f32 0.70710677, %v867_v25  ;;  %v870_v59 = vadd.f32 %v869_v36, %v798_v49  ;;  %v4326_v60 = vpop.f32.mrb[12].mxu1 }
 0x2b0   :  { %v4327_v2 = vpop.f32.mrb[13].mxu1  ;;  %v925_v26 = vmul.f32 %v916_v31, %v889_v54  ;;  %v982_v58 = vrot.slane %v6457_v55, 7  ;;  %v1009_v32 = vrot.slane %v6457_v55, 1 }
 0x2b1   :  { %5238 = verf.f32 %v901_v56  ;;  %v902_v10 = vmul.f32 0.70710677, %v870_v59  ;;  %v4328_v61 = vadd.f32 %v4327_v2, %v4326_v60  ;;  %v4329_v8 = vpop.f32.mrb[14].mxu1 }
 0x2b2   :  { %v4330_v11 = vpop.f32.mrb[15].mxu1  ;;  %v983_v51 = vrot.slane %v925_v26, 7  ;;  %v1010_v14 = vrot.slane %v925_v26, 1  ;;  %v1041_v63 = vpack.c.bf16 %v925_v26, %v6457_v55 }
 0x2b3   :  { %v5235_v17 = vpop.eup %5234  ;;  %5240 = verf.f32 %v902_v10  ;;  %v803_v36 = vadd.f32 %v4328_v61, %v6445_v39  ;;  %v4331_v19 = vadd.f32 %v4330_v11, %v4329_v8  ;;  %v892_v11 = vmul.f32 0.5, %v867_v25 }
 0x2b4   :  { %v917_v52 = vadd.f32 1.0, %v5235_v17  ;;  %v6467_v23 = vsel %vm442_vm8, %v982_v58, %v983_v51  ;;  %v1025_v27 = vsel %vm515_vm9, %v1009_v32, %v1010_v14  ;;  %1233 = vmatprep.mubr.bf16.mxu1 %v1041_v63 }
 0x2b5   :  { %v5237_v28 = vpop.eup %5236  ;;  %v875_v1 = vadd.f32 %v6440_v38, %v803_v36  ;;  %v806_v48 = vadd.f32 %v4331_v19, %v6445_v39 }
 0x2b6   :  { %v6475_v15 = vmul.f32 %v917_v52, %v890_v20  ;;  %v918_v7 = vadd.f32 1.0, %v5237_v28  ;;  %v893_v20 = vmul.f32 0.5, %v870_v59 }
 0x2b7   :  { %v903_v3 = vmul.f32 0.70710677, %v875_v1  ;;  %v878_v9 = vadd.f32 %v6447_v47, %v806_v48  ;;  %v4332_v44 = vpop.f32.mrb[16].mxu1 }
 0x2b8   :  { %v1011_v34 = vrot.slane %v6475_v15, 1  ;;  %v6479_v40 = vmul.f32 %v918_v7, %v891_v21  ;;  %v4333_v42 = vpop.f32.mrb[17].mxu1  ;;  %v984_v49 = vrot.slane %v6475_v15, 7 }
 0x2b9   :  { %5242 = verf.f32 %v903_v3  ;;  %v904_v54 = vmul.f32 0.70710677, %v878_v9  ;;  %v4334_v38 = vadd.f32 %v4333_v42, %v4332_v44  ;;  %v4335_v31 = vpop.f32.mrb[18].mxu1 }
 0x2ba   :  { %v1024_v56 = vsel %vm515_vm9, %v1010_v14, %v1011_v34  ;;  %v4336_v37 = vpop.f32.mrb[19].mxu1  ;;  %v1012_v60 = vrot.slane %v6479_v40, 1  ;;  %v1042_v47 = vpack.c.bf16 %v6479_v40, %v6475_v15  ;;  %v985_v2 = vrot.slane %v6479_v40, 7  ;;  %v5103_v15 = vld [vmem:[#allocation6 + $0xb0] sm:$0xff]   ;;  %v5099_v40 = vld [vmem:[#allocation6 + $0x48] sm:$0xff]  }
 0x2bb   :  { %v5239_v26 = vpop.eup %5238  ;;  %5244 = verf.f32 %v904_v54  ;;  %v811_v10 = vadd.f32 %v4334_v38, %v6445_v39  ;;  %v4006_v61 = vpack.c.bf16 %v1024_v56, %v1025_v27  ;;  %v6491_v8 = vsel %vm442_vm8, %v983_v51, %v984_v49 }
 0x2bc   :  { %v919_v63 = vadd.f32 1.0, %v5239_v26  ;;  %v1023_v14 = vsel %vm515_vm9, %v1011_v34, %v1012_v60  ;;  %v6497_v17 = vsel %vm442_vm8, %v984_v49, %v985_v2  ;;  %v894_v34 = vmul.f32 0.5, %v875_v1 }
 0x2bd   :  { %v5241_v36 = vpop.eup %5240  ;;  %v883_v19 = vadd.f32 %v6451_v6, %v811_v10  ;;  %4752 = vmatmul.mubr.msk.bf16.vlgmr.msra.gmra.mrb[40].mxu0 %vm6261_vm13, %v4006_v61  ;;  %v3994_v39 = vpack.c.bf16 %v6497_v17, %v6491_v8  ;;  %v895_v37 = vmul.f32 0.5, %v878_v9 }
 0x2be   :  { %v928_v51 = vmul.f32 %v919_v63, %v892_v11  ;;  %v920_v25 = vadd.f32 1.0, %v5241_v36  ;;  %4755 = vmatprep.mubr.msk.bf16.mxu0 %vm5525_vm0, %v5524_v0  ;;  %4772 = vmatpush3.bf16.msra.mxu0 %v5092_v24 }
 0x2bf   :  { %v905_v52 = vmul.f32 0.70710677, %v883_v19  ;;  %v896_v17 = vmul.f32 0.5, %v883_v19  ;;  %4773 = vmatprep.subr.bf16.mxu0 %v5524_v0 }
 0x2c0   :  { %v929_v27 = vmul.f32 %v920_v25, %v893_v20  ;;  %v1013_v28 = vrot.slane %v928_v51, 1  ;;  %v986_v48 = vrot.slane %v928_v51, 7 }
 0x2c1   :  { %5246 = verf.f32 %v905_v52 }
 0x2c2   :  { %v1022_v6 = vsel %vm515_vm9, %v1012_v60, %v1013_v28  ;;  %v1014_v21 = vrot.slane %v929_v27, 1  ;;  %v1043_v50 = vpack.c.bf16 %v929_v27, %v928_v51  ;;  %v987_v7 = vrot.slane %v929_v27, 7  ;;  %4774 = vmatpush3.bf16.msra.mxu0 %v5093_v29 }
 0x2c3   :  { %v5243_v3 = vpop.eup %5242  ;;  %v4009_v44 = vpack.c.bf16 %v1022_v6, %v1023_v14  ;;  %v995_v59 = vsel %vm442_vm8, %v985_v2, %v986_v48  ;;  %4775 = vmatprep.subr.bf16.mxu0 %v5524_v0 }
 0x2c4   :  { %v921_v42 = vadd.f32 1.0, %v5243_v3  ;;  %v1021_v49 = vsel %vm515_vm9, %v1013_v28, %v1014_v21  ;;  %v994_v54 = vsel %vm442_vm8, %v986_v48, %v987_v7  ;;  %v5106_v3 = vld [vmem:[#allocation6 + $0x58] sm:$0xff]  }
 0x2c5   :  { %v5245_v38 = vpop.eup %5244  ;;  %4756 = vmatmul.mubr.msk.bf16.gmra.mrb[44].mxu0 %vm6291_vm3, %v4009_v44  ;;  %v3997_v31 = vpack.c.bf16 %v994_v54, %v995_v59  ;;  %v5107_v44 = vld [vmem:[#allocation6 + $0x18] sm:$0xff]   ;;  %v5108_v59 = vld [vmem:[#allocation6 + $0x60] sm:$0xff]   ;;  %v5112_v54 = vld [vmem:[#allocation6 + $0x70] sm:$0xff]  }
 0x2c6   :  { %v930_v56 = vmul.f32 %v921_v42, %v894_v34  ;;  %v922_v60 = vadd.f32 1.0, %v5245_v38  ;;  %4759 = vmatprep.mubr.msk.bf16.mxu0 %vm5525_vm0, %v5524_v0  ;;  %4776 = vmatpush3.bf16.msra.mxu0 %v5094_v33  ;;  %v5109_v34 = vld [vmem:[#allocation6 + $0x20] sm:$0xff]   ;;  %v5110_v42 = vld [vmem:[#allocation6 + $0x68] sm:$0xff]   ;;  %v5113_v38 = vld [vmem:[#allocation6 + $0x30] sm:$0xff]  }
 0x2c7   :  { %4777 = vmatprep.subr.bf16.mxu0 %v5524_v0 }
 0x2c8   :  { %v931_v2 = vmul.f32 %v922_v60, %v895_v37  ;;  %v1015_v1 = vrot.slane %v930_v56, 1  ;;  %v988_v26 = vrot.slane %v930_v56, 7 }
 0x2ca   :  { %v1020_v10 = vsel %vm515_vm9, %v1014_v21, %v1015_v1  ;;  %v1016_v61 = vrot.slane %v931_v2, 1  ;;  %v1044_v8 = vpack.c.bf16 %v931_v2, %v930_v56  ;;  %v989_v11 = vrot.slane %v931_v2, 7  ;;  %v5115_v56 = vld [vmem:[#allocation6 + $0x38] sm:$0xff]  }
 0x2cb   :  { %v5247_v63 = vpop.eup %5246  ;;  %v4012_v14 = vpack.c.bf16 %v1020_v10, %v1021_v49  ;;  %v993_v18 = vsel %vm442_vm8, %v987_v7, %v988_v26  ;;  %v5104_v7 = vld [vmem:[#allocation6 + $0x10] sm:$0xff]   ;;  %v5111_v49 = vld [vmem:[#allocation6 + $0x28] sm:$0xff]  }
 0x2cc   :  { %v923_v9 = vadd.f32 1.0, %v5247_v63  ;;  %v1019_v36 = vsel %vm515_vm9, %v1015_v1, %v1016_v61  ;;  %v992_v51 = vsel %vm442_vm8, %v988_v26, %v989_v11  ;;  %v6574_v63 = vpop.permute.xlu1 %1367 }
 0x2cd   :  { %4760 = vmatmul.mubr.msk.bf16.gmra.mrb[48].mxu0 %vm6313_vm6, %v4012_v14  ;;  %v4000_v20 = vpack.c.bf16 %v992_v51, %v993_v18  ;;  %vm7580_vm13 = vcmp.eq.s32.totalorder %v6574_v63, 1 }
 0x2ce   :  { %v932_v25 = vmul.f32 %v923_v9, %v896_v17  ;;  %4763 = vmatprep.mubr.msk.bf16.mxu0 %vm5525_vm0, %v5524_v0 }
 0x2d0   :  { %v990_v52 = vrot.slane %v932_v25, 7  ;;  %v1017_v27 = vrot.slane %v932_v25, 1  ;;  %v1045_v13 = vpack.c.bf16 %v932_v25, %v932_v25 }
 0x2d2   :  { %v999_v19 = vsel %vm442_vm8, %v990_v52, %v982_v58  ;;  %v1018_v28 = vsel %vm515_vm9, %v1016_v61, %v1017_v27  ;;  %v1026_v41 = vsel %vm515_vm9, %v1017_v27, %v1009_v32  ;;  %v991_v48 = vsel %vm442_vm8, %v989_v11, %v990_v52  ;;  %v5095_v58 = vld [vmem:[#allocation6 + $0x98] sm:$0xff]   ;;  %v5096_v32 = vld [vmem:[#allocation6 + $0x40] sm:$0xff]  }
 0x2d3   :  { %v3991_v6 = vpack.c.bf16 %v6467_v23, %v999_v19  ;;  %v4015_v21 = vpack.c.bf16 %v1018_v28, %v1019_v36  ;;  %v4018_v55 = vpack.c.bf16 %v1026_v41, %v1026_v41  ;;  %v4003_v16 = vpack.c.bf16 %v991_v48, %v991_v48  ;;  %4778 = vmatpush3.bf16.msra.mxu0 %v5095_v58  ;;  %v5097_v23 = vld [vmem:[#allocation6] sm:$0xff]  }
 0x2d4   :  { %4779 = vmatprep.subr.bf16.mxu0 %v5524_v0  ;;  %4410 = vmatprep.subr.bf16.mxu1 %v5096_v32  ;;  %v6591_v27 = vld [vmem:[%s7620_s12] ss:$0 sm:$0xff] }
 0x2d5   :  { %3992 = vmatmul.mubr.msk.bf16.vlgmr.msra.gmra.mrb[20].mxu1 %vm6348_vm11, %v3991_v6  ;;  %4764 = vmatmul.mubr.msk.bf16.gmra.mrb[52].mxu0 %vm6352_vm12, %v4015_v21 }
 0x2d6   :  { %1241 = vmatprep.mubr.bf16.mxu1 %v1042_v47  ;;  %4767 = vmatprep.mubr.msk.bf16.mxu0 %vm5525_vm0, %v5524_v0  ;;  %v5100_v47 = vld [vmem:[#allocation6 + $0x8] sm:$0xff]  }
 0x2d7   :  { %4780 = vmatpush3.bf16.msra.mxu0 %v5098_v45  ;;  %4411 = vmatpush3.bf16.msra.mxu1 %v5097_v23 }
 0x2d8   :  { %4781 = vmatprep.subr.bf16.mxu0 %v5524_v0  ;;  %4412 = vmatprep.subr.bf16.mxu1 %v5099_v40 }
 0x2db   :  { %4782 = vmatpush3.bf16.msra.mxu0 %v5101_v46  ;;  %4413 = vmatpush3.bf16.msra.mxu1 %v5100_v47 }
 0x2dc   :  { %4783 = vmatprep.subr.bf16.mxu0 %v5524_v0 }
 0x2dd   :  { %3995 = vmatmul.mubr.msk.bf16.gmra.mrb[24].mxu1 %vm6376_vm5, %v3994_v39  ;;  %4768 = vmatmul.mubr.msk.bf16.gmra.mrb[56].mxu0 %vm6380_vm7, %v4018_v55  ;;  %v5105_v39 = vld [vmem:[#allocation6 + $0xb8] sm:$0xff]  }
 0x2de   :  { %1249 = vmatprep.mubr.bf16.mxu1 %v1043_v50  ;;  %4787 = vmatprep.mubr.msk.bf16.mxu0 %vm5525_vm0, %v5524_v0  ;;  %v5102_v50 = vld [vmem:[#allocation6 + $0x50] sm:$0xff]  }
 0x2df   :  { %4784 = vmatpush3.bf16.msra.mxu0 %v5103_v15  ;;  %4414 = vmatprep.subr.bf16.mxu1 %v5102_v50 }
 0x2e0   :  { %4785 = vmatprep.subr.bf16.mxu0 %v5524_v0  ;;  %4415 = vmatpush3.bf16.msra.mxu1 %v5104_v7 }
 0x2e1   :  { %4416 = vmatprep.subr.bf16.mxu1 %v5106_v3 }
 0x2e3   :  { %4786 = vmatpush3.bf16.msra.mxu0 %v5105_v39 }
 0x2e4   :  { %4807 = vmatprep.subr.bf16.mxu0 %v5524_v0  ;;  %4417 = vmatpush3.bf16.msra.mxu1 %v5107_v44 }
 0x2e5   :  { %3998 = vmatmul.mubr.msk.bf16.gmra.mrb[28].mxu1 %vm6400_vm10, %v3997_v31  ;;  %4418 = vmatprep.subr.bf16.mxu1 %v5108_v59  ;;  %v5114_v31 = vld [vmem:[#allocation6 + $0x78] sm:$0xff]   ;;  %vm1602_vm10 = vcmp.lt.s32.totalorder %v6241_v30, 6 }
 0x2e6   :  { %1257 = vmatprep.mubr.bf16.mxu1 %v1044_v8  ;;  %v6572_v8 = vpop.permute.xlu0 %1364 }
 0x2e7   :  { %vm7581_vm9 = vcmp.eq.s32.totalorder %v6572_v8, 1 }
 0x2e8   :  { %4419 = vmatpush3.bf16.msra.mxu1 %v5109_v34 }
 0x2e9   :  { %4420 = vmatprep.subr.bf16.mxu1 %v5110_v42 }
 0x2ea   :  { %v6578_v18 = vpop.permute.xlu0 %1388 }
 0x2ec   :  { %4421 = vmatpush3.bf16.msra.mxu1 %v5111_v49 }
 0x2ed   :  { %4001 = vmatmul.mubr.msk.bf16.gmra.mrb[32].mxu1 %vm6416_vm4, %v4000_v20  ;;  %4422 = vmatprep.subr.bf16.mxu1 %v5112_v54  ;;  %v6584_v20 = vpop.permute.xlu1 %1370  ;;  %vm7573_vm4 = vcmp.eq.s32.totalorder %v6578_v18, 1 }
 0x2ee   :  { %1265 = vmatprep.mubr.bf16.mxu1 %v1045_v13  ;;  %v6582_v51 = vpop.permute.xlu0 %1373  ;;  %vm7579_vm3 = vcmp.eq.s32.totalorder %v6584_v20, 1 }
 0x2ef   :  { %vm7578_vm6 = vcmp.eq.s32.totalorder %v6582_v51, 1 }
 0x2f0   :  { %4423 = vmatpush3.bf16.msra.mxu1 %v5113_v38 }
 0x2f1   :  { %4424 = vmatprep.subr.bf16.mxu1 %v5114_v31  ;;  %v6596_v24 = vpop.permute.xlu1 %1376 }
 0x2f2   :  { %v6599_v58 = vpop.permute.xlu0 %1379  ;;  %vm7577_vm8 = vcmp.eq.s32.totalorder %v6596_v24, 1 }
 0x2f3   :  { %vm7576_vm11 = vcmp.eq.s32.totalorder %v6599_v58, 1 }
 0x2f4   :  { %4425 = vmatpush3.bf16.msra.mxu1 %v5115_v56 }
 0x2f5   :  { %4004 = vmatmul.mubr.msk.bf16.gmra.mrb[36].mxu1 %vm6426_vm1, %v4003_v16  ;;  %v6612_v34 = vpop.permute.xlu1 %1382 }
 0x2f6   :  { %v6619_v38 = vpop.permute.xlu0 %1549  ;;  %vm7575_vm12 = vcmp.eq.s32.totalorder %v6612_v34, 1 }
 0x390   :  { %v1307_v37 = vpop.f32.mrb[40].mxu0 }
 0x391   :  { %v4753_v60 = vpop.f32.mrb[41].mxu0 }
 0x392   :  { %v1310_v2 = vpop.f32.mrb[42].mxu0 }
 0x393   :  { %v4754_v1 = vpop.f32.mrb[43].mxu0 }
 0x398   :  { %v1315_v26 = vpop.f32.mrb[44].mxu0 }
 0x399   :  { %v4757_v10 = vpop.f32.mrb[45].mxu0 }
 0x39a   :  { %v1318_v61 = vpop.f32.mrb[46].mxu0  ;;  %v6625_v10 = vpop.permute.xlu1 %1552 }
 0x39b   :  { %v4758_v11 = vpop.f32.mrb[47].mxu0 }
 0x3a0   :  { %v6576_v14 = vpop.f32.mrb[48].mxu0 }
 0x3a1   :  { %v4761_v17 = vpop.f32.mrb[49].mxu0 }
 0x3a2   :  { %v6580_v9 = vpop.f32.mrb[50].mxu0 }
 0x3a3   :  { %v4762_v36 = vpop.f32.mrb[51].mxu0 }
 0x3a8   :  { %v4367_v25 = vpop.f32.mrb[20].mxu1  ;;  %v6586_v52 = vpop.f32.mrb[52].mxu0 }
 0x3a9   :  { %v4368_v19 = vpop.f32.mrb[21].mxu1  ;;  %v4765_v28 = vpop.f32.mrb[53].mxu0 }
 0x3aa   :  { %v4369_v41 = vadd.f32 %v4368_v19, %v4367_v25  ;;  %v4370_v48 = vpop.f32.mrb[22].mxu1  ;;  %v6593_v6 = vpop.f32.mrb[54].mxu0 }
 0x3ab   :  { %v4371_v21 = vpop.f32.mrb[23].mxu1  ;;  %v4766_v55 = vpop.f32.mrb[55].mxu0 }
 0x3ac   :  { %v1236_v13 = vadd.f32 %v4369_v41, %v6591_v27  ;;  %v4372_v16 = vadd.f32 %v4371_v21, %v4370_v48  ;;  %v6633_v25 = vpop.permute.xlu0 %1385 }
 0x3ad   :  { %vm7574_vm5 = vcmp.eq.s32.totalorder %v6633_v25, 1 }
 0x3ae   :  { %v1308_v29 = vadd.f32 %v1307_v37, %v1236_v13  ;;  %v1239_v33 = vadd.f32 %v4372_v16, %v6591_v27  ;;  %v6644_v13 = vpop.permute.xlu1 %1622 }
 0x3af   :  { %vm1648_vm7 = vcmp.eq.s32.totalorder %v6644_v13, 1 }
 0x3b0   :  { %v1345_v45 = vadd.f32 %v1308_v29, %v6204_v53  ;;  %v1311_v46 = vadd.f32 %v1310_v2, %v1239_v33  ;;  %v4373_v32 = vpop.f32.mrb[24].mxu1  ;;  %v6602_v23 = vpop.f32.mrb[56].mxu0 }
 0x3b1   :  { %v4374_v15 = vpop.f32.mrb[25].mxu1  ;;  %v4769_v40 = vpop.f32.mrb[57].mxu0 }
 0x3b2   :  { %v6607_v47 = vsel %vm7581_vm9, %v1345_v45, 0.0  ;;  %v1346_v39 = vadd.f32 %v1311_v46, %v6208_v57  ;;  %v4375_v50 = vadd.f32 %v4374_v15, %v4373_v32  ;;  %v4376_v7 = vpop.f32.mrb[26].mxu1  ;;  %v1342_v3 = vpop.f32.mrb[58].mxu0 }
 0x3b3   :  { %v1435_v53 = vmul.f32 0.70710677, %v6607_v47  ;;  %v4377_v44 = vpop.f32.mrb[27].mxu1  ;;  %v4770_v59 = vpop.f32.mrb[59].mxu0 }
 0x3b4   :  { %v6616_v42 = vsel %vm7580_vm13, %v1346_v39, 0.0  ;;  %v1244_v49 = vadd.f32 %v4375_v50, %v6591_v27  ;;  %v4378_v54 = vadd.f32 %v4377_v44, %v4376_v7  ;;  %v6649_v46 = vpop.permute.xlu0 %1625 }
 0x3b5   :  { %5248 = verf.f32 %v1435_v53  ;;  %v1436_v57 = vmul.f32 0.70710677, %v6616_v42  ;;  %v1427_v15 = vmul.f32 0.5, %v6616_v42  ;;  %v1426_v53 = vmul.f32 0.5, %v6607_v47 }
 0x3b6   :  { %v1316_v31 = vadd.f32 %v1315_v26, %v1244_v49  ;;  %v1247_v56 = vadd.f32 %v4378_v54, %v6591_v27  ;;  %vm1649_vm14 = vcmp.eq.s32.totalorder %v6649_v46, 1 }
 0x3b7   :  { %5250 = verf.f32 %v1436_v57  ;;  %vm6715_vm15 = vmpackc.low %vm1649_vm14, %vm1648_vm7 }
 0x3b8   :  { %v1347_v37 = vadd.f32 %v1316_v31, %v6214_v62  ;;  %v1319_v60 = vadd.f32 %v1318_v61, %v1247_v56  ;;  %v4379_v2 = vpop.f32.mrb[28].mxu1 }
 0x3b9   :  { %v4380_v1 = vpop.f32.mrb[29].mxu1 }
 0x3ba   :  { %v6629_v11 = vsel %vm7579_vm3, %v1347_v37, 0.0  ;;  %v1348_v17 = vadd.f32 %v1319_v60, %v6218_v5  ;;  %v4381_v36 = vadd.f32 %v4380_v1, %v4379_v2  ;;  %v4382_v26 = vpop.f32.mrb[30].mxu1  ;;  %v6672_v60 = vpop.permute.xlu0 %1558 }
 0x3bb   :  { %v1437_v62 = vmul.f32 0.70710677, %v6629_v11  ;;  %v4383_v61 = vpop.f32.mrb[31].mxu1  ;;  %v6674_v2 = vpop.permute.xlu1 %1555 }
 0x3bc   :  { %v6638_v19 = vsel %vm7578_vm6, %v1348_v17, 0.0  ;;  %v1252_v28 = vadd.f32 %v4381_v36, %v6591_v27  ;;  %v4384_v41 = vadd.f32 %v4383_v61, %v4382_v26  ;;  %v1428_v17 = vmul.f32 0.5, %v6629_v11 }
 0x3bd   :  { %5252 = verf.f32 %v1437_v62  ;;  %v1438_v48 = vmul.f32 0.70710677, %v6638_v19 }
 0x3be   :  { %v1324_v5 = vadd.f32 %v6576_v14, %v1252_v28  ;;  %v1255_v21 = vadd.f32 %v4384_v41, %v6591_v27 }
 0x3bf   :  { %v5249_v55 = vpop.eup %5248  ;;  %5254 = verf.f32 %v1438_v48 }
 0x3c0   :  { %v1349_v16 = vadd.f32 %v1324_v5, %v6224_v12  ;;  %v1327_v29 = vadd.f32 %v6580_v9, %v1255_v21  ;;  %v4385_v33 = vpop.f32.mrb[32].mxu1  ;;  %v1453_v14 = vadd.f32 1.0, %v5249_v55 }
 0x3c1   :  { %v5251_v45 = vpop.eup %5250  ;;  %v4386_v32 = vpop.f32.mrb[33].mxu1 }
 0x3c2   :  { %v6654_v40 = vsel %vm7577_vm8, %v1349_v16, 0.0  ;;  %v1350_v39 = vadd.f32 %v1327_v29, %v6230_v22  ;;  %v4387_v50 = vadd.f32 %v4386_v32, %v4385_v33  ;;  %v4388_v12 = vpop.f32.mrb[34].mxu1  ;;  %v1454_v7 = vadd.f32 1.0, %v5251_v45 }
 0x3c3   :  { %v1439_v9 = vmul.f32 0.70710677, %v6654_v40  ;;  %v4389_v3 = vpop.f32.mrb[35].mxu1  ;;  %v6668_v57 = vmul.f32 %v1453_v14, %v1426_v53  ;;  %v1429_v45 = vmul.f32 0.5, %v6638_v19  ;;  %v1629_v14 = vpop.permute.xlu1 %1628 }
 0x3c4   :  { %v6662_v44 = vsel %vm7576_vm11, %v1350_v39, 0.0  ;;  %v1260_v59 = vadd.f32 %v4387_v50, %v6591_v27  ;;  %v4390_v49 = vadd.f32 %v4389_v3, %v4388_v12  ;;  %v6665_v54 = vmul.f32 %v1454_v7, %v1427_v15 }
 0x3c5   :  { %5256 = verf.f32 %v1439_v9  ;;  %v1440_v22 = vmul.f32 0.70710677, %v6662_v44  ;;  %v1593_v15 = vrot.slane %v6668_v57, 2  ;;  %vm1650_vm1 = vcmp.eq.s32.totalorder %v1629_v14, 1 }
 0x3c6   :  { %v1332_v31 = vadd.f32 %v6586_v52, %v1260_v59  ;;  %v1263_v56 = vadd.f32 %v4390_v49, %v6591_v27  ;;  %v1671_v1 = vpack.c.bf16 %v6665_v54, %v6668_v57  ;;  %v1594_v28 = vrot.slane %v6665_v54, 2 }
 0x3c7   :  { %v5253_v37 = vpop.eup %5252  ;;  %5258 = verf.f32 %v1440_v22 }
 0x3c8   :  { %v1455_v36 = vadd.f32 1.0, %v5253_v37  ;;  %v1351_v26 = vadd.f32 %v1332_v31, %v6247_v35  ;;  %v1335_v62 = vadd.f32 %v6593_v6, %v1263_v56  ;;  %v4391_v61 = vpop.f32.mrb[36].mxu1  ;;  %1863 = vmatprep.mubr.bf16.mxu1 %v1671_v1  ;;  %v1610_v9 = vsel %vm1602_vm10, %v1593_v15, %v1594_v28  ;;  %v6731_v1 = vpop.permute.xlu1 %1561 }
 0x3c9   :  { %v5255_v52 = vpop.eup %5254  ;;  %v4392_v41 = vpop.f32.mrb[37].mxu1 }
 0x3ca   :  { %v6684_v48 = vmul.f32 %v1455_v36, %v1428_v17  ;;  %v1456_v5 = vadd.f32 1.0, %v5255_v52  ;;  %v6688_v21 = vsel %vm7575_vm12, %v1351_v26, 0.0  ;;  %v1352_v35 = vadd.f32 %v1335_v62, %v6255_v43  ;;  %v4394_v6 = vpop.f32.mrb[38].mxu1  ;;  %v1632_v43 = vpop.permute.xlu0 %1631 }
 0x3cb   :  { %v1441_v55 = vmul.f32 0.70710677, %v6688_v21  ;;  %v4393_v16 = vadd.f32 %v4392_v41, %v4391_v61  ;;  %v4395_v29 = vpop.f32.mrb[39].mxu1  ;;  %v1431_v17 = vmul.f32 0.5, %v6662_v44  ;;  %vm1651_vm2 = vcmp.eq.s32.totalorder %v1632_v43, 1 }
 0x3cc   :  { %v1595_v33 = vrot.slane %v6684_v48, 2  ;;  %v6698_v32 = vsel %vm7574_vm5, %v1352_v35, 0.0  ;;  %v6704_v12 = vmul.f32 %v1456_v5, %v1429_v45  ;;  %vm6746_vm7 = vmpackc.low %vm1651_vm2, %vm1650_vm1  ;;  %v1432_v35 = vmul.f32 0.5, %v6688_v21  ;;  %v1635_v29 = vpop.permute.xlu1 %1634 }
 0x3cd   :  { %5260 = verf.f32 %v1441_v55  ;;  %v1442_v39 = vmul.f32 0.70710677, %v6698_v32  ;;  %v1268_v50 = vadd.f32 %v4393_v16, %v6591_v27  ;;  %v1430_v27 = vmul.f32 0.5, %v6654_v40 }
 0x3ce   :  { %v1609_v7 = vsel %vm1602_vm10, %v1594_v28, %v1595_v33  ;;  %v1596_v13 = vrot.slane %v6704_v12, 2  ;;  %v6729_v37 = vpop.permute.xlu0 %1564  ;;  %vm1652_vm2 = vcmp.eq.s32.totalorder %v1635_v29, 1  ;;  %v1672_v29 = vpack.c.bf16 %v6704_v12, %v6684_v48 }
 0x3cf   :  { %v5257_v3 = vpop.eup %5256  ;;  %5262 = verf.f32 %v1442_v39  ;;  %v1340_v46 = vadd.f32 %v6602_v23, %v1268_v50  ;;  %v4061_v53 = vpack.c.bf16 %v1609_v7, %v1610_v9  ;;  %v1433_v39 = vmul.f32 0.5, %v6698_v32 }
 0x3d0   :  { %v1457_v49 = vadd.f32 1.0, %v5257_v3  ;;  %v1608_v52 = vsel %vm1602_vm10, %v1595_v33, %v1596_v13  ;;  %v6766_v3 = vpop.permute.xlu1 %1567 }
 0x3d1   :  { %v5259_v22 = vpop.eup %5258  ;;  %v1353_v31 = vadd.f32 %v1340_v46, %v6277_v4  ;;  %4788 = vmatmul.mubr.msk.bf16.vlgmr.msra.gmra.mrb[60].mxu0 %vm6715_vm15, %v4061_v53 }
 0x3d2   :  { %v6724_v56 = vmul.f32 %v1457_v49, %v1430_v27  ;;  %v1458_v23 = vadd.f32 1.0, %v5259_v22  ;;  %4791 = vmatprep.mubr.msk.bf16.mxu0 %vm5525_vm0, %v5524_v0  ;;  %v1638_v16 = vpop.permute.xlu0 %1637 }
 0x3d3   :  { %v6735_v4 = vsel %vm7573_vm4, %v1353_v31, 0.0  ;;  %vm1653_vm14 = vcmp.eq.s32.totalorder %v1638_v16, 1  ;;  %vm1576_vm4 = vcmp.eq.s32.totalorder %v6625_v10, 1 }
 0x3d4   :  { %v1443_v36 = vmul.f32 0.70710677, %v6735_v4  ;;  %v1597_v26 = vrot.slane %v6724_v56, 2  ;;  %v6740_v62 = vmul.f32 %v1458_v23, %v1431_v17  ;;  %vm6770_vm1 = vmpackc.low %vm1653_vm14, %vm1652_vm2  ;;  %v1434_v22 = vmul.f32 0.5, %v6735_v4 }
 0x3d5   :  { %v1521_v23 = vrot.slane %v6665_v54, 6  ;;  %vm1575_vm14 = vcmp.eq.s32.totalorder %v6619_v38, 1  ;;  %vm1529_vm2 = vcmp.lt.s32.totalorder %v6241_v30, 2 }
 0x3d6   :  { %5264 = verf.f32 %v1443_v36  ;;  %v1607_v61 = vsel %vm1602_vm10, %v1596_v13, %v1597_v26  ;;  %v1598_v33 = vrot.slane %v6740_v62, 2  ;;  %v6764_v9 = vpop.permute.xlu0 %1570  ;;  %vm6797_vm11 = vmpackc.low %vm1576_vm4, %vm1575_vm14 }
 0x3d7   :  { %v5261_v28 = vpop.eup %5260  ;;  %v4064_v41 = vpack.c.bf16 %v1607_v61, %v1608_v52  ;;  %v1520_v61 = vrot.slane %v6668_v57, 6  ;;  %v1673_v57 = vpack.c.bf16 %v6740_v62, %v6724_v56  ;;  %vm1582_vm3 = vcmp.eq.s32.totalorder %v6764_v9, 1 }
 0x3d8   :  { %v1459_v6 = vadd.f32 1.0, %v5261_v28  ;;  %v1606_v7 = vsel %vm1602_vm10, %v1597_v26, %v1598_v33  ;;  %v1641_v26 = vpop.permute.xlu1 %1640 }
 0x3d9   :  { %v5263_v55 = vpop.eup %5262  ;;  %4792 = vmatmul.mubr.msk.bf16.gmra.mrb[64].mxu0 %vm6746_vm7, %v4064_v41  ;;  %vm1654_vm12 = vcmp.eq.s32.totalorder %v1641_v26, 1  ;;  %v1537_v54 = vsel %vm1529_vm2, %v1520_v61, %v1521_v23  ;;  %v5143_v26 = vld [vmem:[#allocation9 + $0x18] sm:$0xff]  }
 0x3da   :  { %v6753_v45 = vmul.f32 %v1459_v6, %v1432_v35  ;;  %4795 = vmatprep.mubr.msk.bf16.mxu0 %vm5525_vm0, %v5524_v0  ;;  %v1460_v43 = vadd.f32 1.0, %v5263_v55  ;;  %v1644_v36 = vpop.permute.xlu0 %1643 }
 0x3db   :  { %vm1655_vm5 = vcmp.eq.s32.totalorder %v1644_v36, 1 }
 0x3dc   :  { %v1599_v14 = vrot.slane %v6753_v45, 2  ;;  %v6768_v46 = vmul.f32 %v1460_v43, %v1433_v39  ;;  %vm6801_vm8 = vmpackc.low %vm1655_vm5, %vm1654_vm12  ;;  %v1522_v43 = vrot.slane %v6684_v48, 6  ;;  %vm1578_vm12 = vcmp.eq.s32.totalorder %v6672_v60, 1 }
 0x3dd   :  { %vm1577_vm5 = vcmp.eq.s32.totalorder %v6674_v2, 1  ;;  %v5141_v2 = vld [vmem:[#allocation9 + $0x8] sm:$0xff]  }
 0x3de   :  { %v1605_v50 = vsel %vm1602_vm10, %v1598_v33, %v1599_v14  ;;  %v1600_v17 = vrot.slane %v6768_v46, 2  ;;  %v1523_v33 = vrot.slane %v6704_v12, 6  ;;  %vm6825_vm14 = vmpackc.low %vm1578_vm12, %vm1577_vm5  ;;  %vm1580_vm12 = vcmp.eq.s32.totalorder %v6729_v37, 1 }
 0x3df   :  { %v4067_v53 = vpack.c.bf16 %v1605_v50, %v1606_v7  ;;  %v1536_v50 = vsel %vm1529_vm2, %v1521_v23, %v1522_v43  ;;  %vm1579_vm5 = vcmp.eq.s32.totalorder %v6731_v1, 1  ;;  %v1527_v23 = vrot.slane %v6768_v46, 6  ;;  %v5140_v7 = vld [vmem:[#allocation9] sm:$0xff]  }
 0x3e0   :  { %v5265_v27 = vpop.eup %5264  ;;  %v1604_v10 = vsel %vm1602_vm10, %v1599_v14, %v1600_v17  ;;  %v1647_v14 = vpop.permute.xlu0 %1646  ;;  %v1535_v12 = vsel %vm1529_vm2, %v1522_v43, %v1523_v33  ;;  %v1526_v37 = vrot.slane %v6753_v45, 6  ;;  %v5129_v43 = vld [vmem:[#allocation7 + $0xb8] sm:$0xff]  }
 0x3e1   :  { %v1461_v31 = vadd.f32 1.0, %v5265_v27  ;;  %4796 = vmatmul.mubr.msk.bf16.gmra.mrb[68].mxu0 %vm6770_vm1, %v4067_v53  ;;  %vm1656_vm4 = vcmp.eq.s32.totalorder %v1647_v14, 1  ;;  %v4049_v60 = vpack.c.bf16 %v1535_v12, %v1536_v50  ;;  %v1525_v53 = vrot.slane %v6740_v62, 6  ;;  %v5126_v14 = vld [vmem:[#allocation7 + $0x50] sm:$0xff]   ;;  %v5131_v50 = vld [vmem:[#allocation7 + $0x18] sm:$0xff]  }
 0x3e2   :  { %4799 = vmatprep.mubr.msk.bf16.mxu0 %vm5525_vm0, %v5524_v0  ;;  %vm6829_vm6 = vmpackc.low %vm1656_vm4, %vm1656_vm4  ;;  %v1531_v1 = vsel %vm1529_vm2, %v1526_v37, %v1527_v23  ;;  %v5128_v12 = vld [vmem:[#allocation7 + $0x10] sm:$0xff]  }
 0x3e3   :  { %v6780_v13 = vmul.f32 %v1461_v31, %v1434_v22  ;;  %vm6849_vm4 = vmpackc.low %vm1580_vm12, %vm1579_vm5  ;;  %vm1581_vm12 = vcmp.eq.s32.totalorder %v6766_v3, 1  ;;  %v5142_v31 = vld [vmem:[#allocation9 + $0x10] sm:$0xff]  }
 0x3e4   :  { %vm6865_vm5 = vmpackc.low %vm1582_vm3, %vm1581_vm12 }
 0x3e5   :  { %v1528_v52 = vrot.slane %v6780_v13, 6  ;;  %v1601_v28 = vrot.slane %v6780_v13, 2 }
 0x3e7   :  { %v1538_v38 = vsel %vm1529_vm2, %v1528_v52, %v1520_v61  ;;  %v1603_v41 = vsel %vm1602_vm10, %v1600_v17, %v1601_v28  ;;  %v1611_v39 = vsel %vm1602_vm10, %v1601_v28, %v1593_v15  ;;  %v1524_v15 = vrot.slane %v6724_v56, 6  ;;  %v5116_v28 = vld [vmem:[#allocation7 + $0x80] sm:$0xff]   ;;  %v5145_v61 = vld [vmem:[#allocation9 + $0x28] sm:$0xff]  }
 0x3e8   :  { %v4046_v6 = vpack.c.bf16 %v1537_v54, %v1538_v38  ;;  %v4070_v55 = vpack.c.bf16 %v1603_v41, %v1604_v10  ;;  %v4073_v48 = vpack.c.bf16 %v1611_v39, %v1611_v39  ;;  %v1674_v56 = vpack.c.bf16 %v6768_v46, %v6753_v45  ;;  %v1574_v45 = vpop.permute.xlu1 %1573  ;;  %4808 = vmatpush3.bf16.msra.mxu0 %v5116_v28  ;;  %v5118_v54 = vld [vmem:[#allocation7 + $0x90] sm:$0xff]   ;;  %v5122_v38 = vld [vmem:[#allocation7 + $0xa0] sm:$0xff]   ;;  %v5125_v41 = vld [vmem:[#allocation7 + $0xa8] sm:$0xff]  }
 0x3e9   :  { %v1533_v27 = vsel %vm1529_vm2, %v1524_v15, %v1525_v53  ;;  %v1534_v62 = vsel %vm1529_vm2, %v1523_v33, %v1524_v15  ;;  %v1532_v17 = vsel %vm1529_vm2, %v1525_v53, %v1526_v37  ;;  %v1675_v46 = vpack.c.bf16 %v6780_v13, %v6780_v13  ;;  %4809 = vmatprep.subr.bf16.mxu0 %v5524_v0  ;;  %v5117_v13 = vld [vmem:[#allocation7 + $0x88] sm:$0xff]   ;;  %v5120_v10 = vld [vmem:[#allocation7 + $0x40] sm:$0xff]   ;;  %v5130_v39 = vld [vmem:[#allocation7 + $0x58] sm:$0xff]  }
 0x3ea   :  { %4047 = vmatmul.mubr.msk.bf16.vlgmr.msra.gmra.mrb[40].mxu1 %vm6797_vm11, %v4046_v6  ;;  %4800 = vmatmul.mubr.msk.bf16.gmra.mrb[72].mxu0 %vm6801_vm8, %v4070_v55  ;;  %v4052_v22 = vpack.c.bf16 %v1533_v27, %v1534_v62  ;;  %v4055_v36 = vpack.c.bf16 %v1531_v1, %v1532_v17  ;;  %v1530_v9 = vsel %vm1529_vm2, %v1527_v23, %v1528_v52  ;;  %vm1583_vm13 = vcmp.eq.s32.totalorder %v1574_v45, 1  ;;  %v5119_v52 = vld [vmem:[#allocation7 + $0x98] sm:$0xff]   ;;  %v5121_v6 = vld [vmem:[#allocation7] sm:$0xff]   ;;  %v5127_v55 = vld [vmem:[#allocation7 + $0xb0] sm:$0xff]  }
 0x3eb   :  { %1871 = vmatprep.mubr.bf16.mxu1 %v1672_v29  ;;  %4803 = vmatprep.mubr.msk.bf16.mxu0 %vm5525_vm0, %v5524_v0  ;;  %v4058_v3 = vpack.c.bf16 %v1530_v9, %v1530_v9  ;;  %vm6875_vm9 = vmpackc.low %vm1583_vm13, %vm1583_vm13  ;;  %v5123_v29 = vld [vmem:[#allocation7 + $0x48] sm:$0xff]   ;;  %v5136_v15 = vld [vmem:[#allocation7 + $0x70] sm:$0xff]   ;;  %vm7642_vm13 = vcmp.eq.s32.totalorder %v6574_v63, 1 }
 0x3ec   :  { %4810 = vmatpush3.bf16.msra.mxu0 %v5117_v13  ;;  %4469 = vmatprep.subr.bf16.mxu1 %v5120_v10  ;;  %v5124_v33 = vld [vmem:[#allocation7 + $0x8] sm:$0xff]   ;;  %v5137_v27 = vld [vmem:[#allocation7 + $0x30] sm:$0xff]   ;;  %v5138_v62 = vld [vmem:[#allocation7 + $0x78] sm:$0xff]  }
 0x3ed   :  { %4811 = vmatprep.subr.bf16.mxu0 %v5524_v0  ;;  %4470 = vmatpush3.bf16.msra.mxu1 %v5121_v6  ;;  %v5135_v53 = vld [vmem:[#allocation7 + $0x28] sm:$0xff]  }
 0x3ee   :  { %4471 = vmatprep.subr.bf16.mxu1 %v5123_v29 }
 0x3f0   :  { %4812 = vmatpush3.bf16.msra.mxu0 %v5118_v54 }
 0x3f1   :  { %4813 = vmatprep.subr.bf16.mxu0 %v5524_v0  ;;  %4472 = vmatpush3.bf16.msra.mxu1 %v5124_v33 }
 0x3f2   :  { %4050 = vmatmul.mubr.msk.bf16.gmra.mrb[44].mxu1 %vm6825_vm14, %v4049_v60  ;;  %4804 = vmatmul.mubr.msk.bf16.gmra.mrb[76].mxu0 %vm6829_vm6, %v4073_v48  ;;  %v5132_v60 = vld [vmem:[#allocation7 + $0x60] sm:$0xff]  }
 0x3f3   :  { %1879 = vmatprep.mubr.bf16.mxu1 %v1673_v57  ;;  %4823 = vmatprep.mubr.msk.bf16.mxu0 %vm5525_vm0, %v5524_v0  ;;  %v5133_v48 = vld [vmem:[#allocation7 + $0x20] sm:$0xff]   ;;  %v5134_v57 = vld [vmem:[#allocation7 + $0x68] sm:$0xff]  }
 0x3f4   :  { %4814 = vmatpush3.bf16.msra.mxu0 %v5119_v52  ;;  %4473 = vmatprep.subr.bf16.mxu1 %v5126_v14 }
 0x3f5   :  { %4815 = vmatprep.subr.bf16.mxu0 %v5524_v0  ;;  %4474 = vmatpush3.bf16.msra.mxu1 %v5128_v12 }
 0x3f6   :  { %4475 = vmatprep.subr.bf16.mxu1 %v5130_v39 }
 0x3f8   :  { %4816 = vmatpush3.bf16.msra.mxu0 %v5122_v38  ;;  %v6894_v38 = vld [vmem:[%s7552_s9] ss:$0 sm:$0xff] }
 0x3f9   :  { %4817 = vmatprep.subr.bf16.mxu0 %v5524_v0  ;;  %4476 = vmatpush3.bf16.msra.mxu1 %v5131_v50 }
 0x3fa   :  { %4053 = vmatmul.mubr.msk.bf16.gmra.mrb[48].mxu1 %vm6849_vm4, %v4052_v22  ;;  %4477 = vmatprep.subr.bf16.mxu1 %v5132_v60  ;;  %v5139_v22 = vld [vmem:[#allocation7 + $0x38] sm:$0xff]  }
 0x3fb   :  { %1887 = vmatprep.mubr.bf16.mxu1 %v1674_v56 }
 0x3fc   :  { %4818 = vmatpush3.bf16.msra.mxu0 %v5125_v41 }
 0x3fd   :  { %4819 = vmatprep.subr.bf16.mxu0 %v5524_v0  ;;  %4478 = vmatpush3.bf16.msra.mxu1 %v5133_v48 }
 0x3fe   :  { %4479 = vmatprep.subr.bf16.mxu1 %v5134_v57 }
 0x400   :  { %4820 = vmatpush3.bf16.msra.mxu0 %v5127_v55 }
 0x401   :  { %4821 = vmatprep.subr.bf16.mxu0 %v5524_v0  ;;  %4480 = vmatpush3.bf16.msra.mxu1 %v5135_v53 }
 0x402   :  { %4056 = vmatmul.mubr.msk.bf16.gmra.mrb[52].mxu1 %vm6865_vm5, %v4055_v36  ;;  %4481 = vmatprep.subr.bf16.mxu1 %v5136_v15 }
 0x403   :  { %1895 = vmatprep.mubr.bf16.mxu1 %v1675_v46 }
 0x404   :  { %4822 = vmatpush3.bf16.msra.mxu0 %v5129_v43 }
 0x405   :  { %4482 = vmatpush3.bf16.msra.mxu1 %v5137_v27 }
 0x406   :  { %4483 = vmatprep.subr.bf16.mxu1 %v5138_v62 }
 0x409   :  { %4484 = vmatpush3.bf16.msra.mxu1 %v5139_v22 }
 0x40a   :  { %4059 = vmatmul.mubr.msk.bf16.gmra.mrb[56].mxu1 %vm6875_vm9, %v4058_v3  ;;  %4843 = vmatprep.subr.bf16.mxu1 %v5524_v0 }
 0x4a4   :  { %v1937_v56 = vpop.f32.mrb[60].mxu0 }
 0x4a5   :  { %v4789_v23 = vpop.f32.mrb[61].mxu0 }
 0x4a6   :  { %v1940_v37 = vpop.f32.mrb[62].mxu0 }
 0x4a7   :  { %v4790_v1 = vpop.f32.mrb[63].mxu0 }
 0x4ac   :  { %v1945_v17 = vpop.f32.mrb[64].mxu0 }
 0x4ad   :  { %v4793_v36 = vpop.f32.mrb[65].mxu0 }
 0x4ae   :  { %v1948_v46 = vpop.f32.mrb[66].mxu0 }
 0x4af   :  { %v4794_v45 = vpop.f32.mrb[67].mxu0 }
 0x4b4   :  { %v1953_v9 = vpop.f32.mrb[68].mxu0 }
 0x4b5   :  { %v4797_v3 = vpop.f32.mrb[69].mxu0 }
 0x4b6   :  { %v1956_v28 = vpop.f32.mrb[70].mxu0 }
 0x4b7   :  { %v4798_v13 = vpop.f32.mrb[71].mxu0 }
 0x4bd   :  { %v4426_v54 = vpop.f32.mrb[40].mxu1  ;;  %v6889_v52 = vpop.f32.mrb[72].mxu0 }
 0x4be   :  { %v4427_v41 = vpop.f32.mrb[41].mxu1  ;;  %v4801_v10 = vpop.f32.mrb[73].mxu0 }
 0x4bf   :  { %v4428_v6 = vadd.f32 %v4427_v41, %v4426_v54  ;;  %v4429_v55 = vpop.f32.mrb[42].mxu1  ;;  %v6896_v29 = vpop.f32.mrb[74].mxu0 }
 0x4c0   :  { %v4430_v33 = vpop.f32.mrb[43].mxu1  ;;  %v4802_v43 = vpop.f32.mrb[75].mxu0 }
 0x4c1   :  { %v1866_v14 = vadd.f32 %v4428_v6, %v6894_v38  ;;  %v4431_v12 = vadd.f32 %v4430_v33, %v4429_v55 }
 0x4c3   :  { %v1938_v39 = vadd.f32 %v1937_v56, %v1866_v14  ;;  %v1869_v50 = vadd.f32 %v4431_v12, %v6894_v38 }
 0x4c5   :  { %v1984_v60 = vmul.f32 0.70710677, %v1938_v39  ;;  %v1941_v48 = vadd.f32 %v1940_v37, %v1869_v50  ;;  %v4432_v57 = vpop.f32.mrb[44].mxu1  ;;  %v6900_v53 = vpop.f32.mrb[76].mxu0 }
 0x4c6   :  { %v4433_v15 = vpop.f32.mrb[45].mxu1  ;;  %v4805_v27 = vpop.f32.mrb[77].mxu0 }
 0x4c7   :  { %5266 = verf.f32 %v1984_v60  ;;  %v1985_v62 = vmul.f32 0.70710677, %v1941_v48  ;;  %v4434_v22 = vadd.f32 %v4433_v15, %v4432_v57  ;;  %v4435_v23 = vpop.f32.mrb[46].mxu1  ;;  %v1972_v1 = vpop.f32.mrb[78].mxu0  ;;  %v1975_v57 = vmul.f32 0.5, %v1938_v39 }
 0x4c8   :  { %v4436_v36 = vpop.f32.mrb[47].mxu1  ;;  %v4806_v45 = vpop.f32.mrb[79].mxu0 }
 0x4c9   :  { %5268 = verf.f32 %v1985_v62  ;;  %v1874_v3 = vadd.f32 %v4434_v22, %v6894_v38  ;;  %v4437_v56 = vadd.f32 %v4436_v36, %v4435_v23  ;;  %v1976_v22 = vmul.f32 0.5, %v1941_v48 }
 0x4cb   :  { %v1946_v13 = vadd.f32 %v1945_v17, %v1874_v3  ;;  %v1877_v54 = vadd.f32 %v4437_v56, %v6894_v38 }
 0x4cd   :  { %v1986_v37 = vmul.f32 0.70710677, %v1946_v13  ;;  %v1949_v41 = vadd.f32 %v1948_v46, %v1877_v54  ;;  %v4438_v10 = vpop.f32.mrb[48].mxu1 }
 0x4ce   :  { %v4439_v6 = vpop.f32.mrb[49].mxu1 }
 0x4cf   :  { %5270 = verf.f32 %v1986_v37  ;;  %v1987_v55 = vmul.f32 0.70710677, %v1949_v41  ;;  %v4440_v33 = vadd.f32 %v4439_v6, %v4438_v10  ;;  %v4441_v43 = vpop.f32.mrb[50].mxu1 }
 0x4d0   :  { %v4442_v14 = vpop.f32.mrb[51].mxu1 }
 0x4d1   :  { %v5267_v12 = vpop.eup %5266  ;;  %5272 = verf.f32 %v1987_v55  ;;  %v1882_v50 = vadd.f32 %v4440_v33, %v6894_v38  ;;  %v4443_v60 = vadd.f32 %v4442_v14, %v4441_v43 }
 0x4d2   :  { %v2002_v15 = vadd.f32 1.0, %v5267_v12  ;;  %v1977_v12 = vmul.f32 0.5, %v1946_v13  ;;  %v1978_v13 = vmul.f32 0.5, %v1949_v41 }
 0x4d3   :  { %v5269_v27 = vpop.eup %5268  ;;  %v1954_v17 = vadd.f32 %v1953_v9, %v1882_v50  ;;  %v1885_v62 = vadd.f32 %v4443_v60, %v6894_v38 }
 0x4d4   :  { %v2003_v46 = vadd.f32 1.0, %v5269_v27  ;;  %v6906_v23 = vmul.f32 %v2002_v15, %v1975_v57 }
 0x4d5   :  { %v1988_v1 = vmul.f32 0.70710677, %v1954_v17  ;;  %v1957_v36 = vadd.f32 %v1956_v28, %v1885_v62  ;;  %v4444_v45 = vpop.f32.mrb[52].mxu1 }
 0x4d6   :  { %v4445_v3 = vpop.f32.mrb[53].mxu1  ;;  %v2012_v56 = vmul.f32 %v2003_v46, %v1976_v22  ;;  %v2069_v39 = vrot.slane %v6906_v23, 6  ;;  %v2096_v9 = vrot.slane %v6906_v23, 2 }
 0x4d7   :  { %5274 = verf.f32 %v1988_v1  ;;  %v1989_v54 = vmul.f32 0.70710677, %v1957_v36  ;;  %v4446_v37 = vadd.f32 %v4445_v3, %v4444_v45  ;;  %v4447_v10 = vpop.f32.mrb[54].mxu1 }
 0x4d8   :  { %v4448_v6 = vpop.f32.mrb[55].mxu1  ;;  %v2070_v55 = vrot.slane %v2012_v56, 6  ;;  %v2097_v33 = vrot.slane %v2012_v56, 2  ;;  %v2128_v48 = vpack.c.bf16 %v2012_v56, %v6906_v23 }
 0x4d9   :  { %v5271_v43 = vpop.eup %5270  ;;  %5276 = verf.f32 %v1989_v54  ;;  %v1890_v28 = vadd.f32 %v4446_v37, %v6894_v38  ;;  %v4449_v14 = vadd.f32 %v4448_v6, %v4447_v10 }
 0x4da   :  { %v2004_v50 = vadd.f32 1.0, %v5271_v43  ;;  %v6916_v60 = vsel %vm1529_vm2, %v2069_v39, %v2070_v55  ;;  %v2112_v57 = vsel %vm1602_vm10, %v2096_v9, %v2097_v33  ;;  %2320 = vmatprep.mubr.bf16.mxu1 %v2128_v48 }
 0x4db   :  { %v5273_v15 = vpop.eup %5272  ;;  %v1962_v27 = vadd.f32 %v6889_v52, %v1890_v28  ;;  %v1893_v62 = vadd.f32 %v4449_v14, %v6894_v38 }
 0x4dc   :  { %v6924_v22 = vmul.f32 %v2004_v50, %v1977_v12  ;;  %v2005_v46 = vadd.f32 1.0, %v5273_v15 }
 0x4dd   :  { %v1990_v1 = vmul.f32 0.70710677, %v1962_v27  ;;  %v1965_v45 = vadd.f32 %v6896_v29, %v1893_v62  ;;  %v4450_v3 = vpop.f32.mrb[56].mxu1 }
 0x4de   :  { %v2098_v56 = vrot.slane %v6924_v22, 2  ;;  %v6928_v54 = vmul.f32 %v2005_v46, %v1978_v13  ;;  %v4451_v37 = vpop.f32.mrb[57].mxu1  ;;  %v2071_v10 = vrot.slane %v6924_v22, 6  ;;  %v1979_v13 = vmul.f32 0.5, %v1954_v17 }
 0x4df   :  { %5278 = verf.f32 %v1990_v1  ;;  %v1991_v6 = vmul.f32 0.70710677, %v1965_v45  ;;  %v4452_v52 = vadd.f32 %v4451_v37, %v4450_v3  ;;  %v4453_v48 = vpop.f32.mrb[58].mxu1 }
 0x4e0   :  { %v2111_v43 = vsel %vm1602_vm10, %v2097_v33, %v2098_v56  ;;  %v4454_v41 = vpop.f32.mrb[59].mxu1  ;;  %v2099_v28 = vrot.slane %v6928_v54, 2  ;;  %v2129_v29 = vpack.c.bf16 %v6928_v54, %v6924_v22  ;;  %v2072_v14 = vrot.slane %v6928_v54, 6  ;;  %v5149_v22 = vld [vmem:[%s7557_s14 + $0x40] sm:$0xff]  }
 0x4e1   :  { %v5275_v12 = vpop.eup %5274  ;;  %5280 = verf.f32 %v1991_v6  ;;  %v1898_v50 = vadd.f32 %v4452_v52, %v6894_v38  ;;  %v4116_v15 = vpack.c.bf16 %v2111_v43, %v2112_v57  ;;  %v6940_v62 = vsel %vm1529_vm2, %v2070_v55, %v2071_v10  ;;  %v5150_v54 = vld [vmem:[%s7557_s14] sm:$0xff]   ;;  %4541 = vmatprep.subr.bf16.mxu0 %v5149_v22 }
 0x4e2   :  { %v2006_v46 = vadd.f32 1.0, %v5275_v12  ;;  %v2110_v33 = vsel %vm1602_vm10, %v2098_v56, %v2099_v28  ;;  %v6946_v1 = vsel %vm1529_vm2, %v2071_v10, %v2072_v14  ;;  %v1980_v57 = vmul.f32 0.5, %v1957_v36 }
 0x4e3   :  { %v5277_v3 = vpop.eup %5276  ;;  %v1970_v37 = vadd.f32 %v6900_v53, %v1898_v50  ;;  %4824 = vmatmul.mubr.msk.bf16.vlgmr.msra.gmra.mrb[80].mxu0 %vm6715_vm15, %v4116_v15  ;;  %v4104_v38 = vpack.c.bf16 %v6946_v1, %v6940_v62  ;;  %v1981_v50 = vmul.f32 0.5, %v1962_v27 }
 0x4e4   :  { %v2015_v55 = vmul.f32 %v2006_v46, %v1979_v13  ;;  %v2007_v17 = vadd.f32 1.0, %v5277_v3  ;;  %4827 = vmatprep.mubr.msk.bf16.mxu0 %vm5525_vm0, %v5524_v0  ;;  %v1982_v3 = vmul.f32 0.5, %v1965_v45  ;;  %4542 = vmatpush3.bf16.msra.mxu0 %v5150_v54 }
 0x4e5   :  { %v1992_v56 = vmul.f32 0.70710677, %v1970_v37 }
 0x4e6   :  { %v2016_v6 = vmul.f32 %v2007_v17, %v1980_v57  ;;  %v2100_v52 = vrot.slane %v2015_v55, 2  ;;  %v2073_v10 = vrot.slane %v2015_v55, 6 }
 0x4e7   :  { %5282 = verf.f32 %v1992_v56 }
 0x4e8   :  { %v2109_v53 = vsel %vm1602_vm10, %v2099_v28, %v2100_v52  ;;  %v2101_v48 = vrot.slane %v2016_v6, 2  ;;  %v2130_v59 = vpack.c.bf16 %v2016_v6, %v2015_v55  ;;  %v2074_v43 = vrot.slane %v2016_v6, 6 }
 0x4e9   :  { %v5279_v41 = vpop.eup %5278  ;;  %v4119_v12 = vpack.c.bf16 %v2109_v53, %v2110_v33  ;;  %v2082_v36 = vsel %vm1529_vm2, %v2072_v14, %v2073_v10  ;;  %v1983_v53 = vmul.f32 0.5, %v1970_v37 }
 0x4ea   :  { %v2008_v15 = vadd.f32 1.0, %v5279_v41  ;;  %v2108_v62 = vsel %vm1602_vm10, %v2100_v52, %v2101_v48  ;;  %v2081_v13 = vsel %vm1529_vm2, %v2073_v10, %v2074_v43 }
 0x4eb   :  { %v5281_v46 = vpop.eup %5280  ;;  %4828 = vmatmul.mubr.msk.bf16.gmra.mrb[84].mxu0 %vm6746_vm7, %v4119_v12  ;;  %v4107_v28 = vpack.c.bf16 %v2081_v13, %v2082_v36 }
 0x4ec   :  { %v2017_v1 = vmul.f32 %v2008_v15, %v1981_v50  ;;  %v2009_v55 = vadd.f32 1.0, %v5281_v46  ;;  %4831 = vmatprep.mubr.msk.bf16.mxu0 %vm5525_vm0, %v5524_v0 }
 0x4ee   :  { %v2018_v14 = vmul.f32 %v2009_v55, %v1982_v3  ;;  %v2102_v27 = vrot.slane %v2017_v1, 2  ;;  %v2075_v33 = vrot.slane %v2017_v1, 6  ;;  %v5160_v3 = vld [vmem:[%s7557_s14 + $0x18] sm:$0xff]   ;;  %v5162_v55 = vld [vmem:[%s7557_s14 + $0x60] sm:$0xff]  }
 0x4f0   :  { %v2107_v57 = vsel %vm1602_vm10, %v2101_v48, %v2102_v27  ;;  %v2103_v17 = vrot.slane %v2018_v14, 2  ;;  %v2131_v56 = vpack.c.bf16 %v2018_v14, %v2017_v1  ;;  %v2076_v6 = vrot.slane %v2018_v14, 6  ;;  %v5158_v1 = vld [vmem:[%s7557_s14 + $0x58] sm:$0xff]   ;;  %v5163_v14 = vld [vmem:[%s7557_s14 + $0x20] sm:$0xff]  }
 0x4f1   :  { %v5283_v52 = vpop.eup %5282  ;;  %v4122_v10 = vpack.c.bf16 %v2107_v57, %v2108_v62  ;;  %v2080_v5 = vsel %vm1529_vm2, %v2074_v43, %v2075_v33  ;;  %v5168_v57 = vld [vmem:[%s7557_s14 + $0x70] sm:$0xff]  }
 0x4f2   :  { %v2010_v45 = vadd.f32 1.0, %v5283_v52  ;;  %v2106_v41 = vsel %vm1602_vm10, %v2102_v27, %v2103_v17  ;;  %v2079_v12 = vsel %vm1529_vm2, %v2075_v33, %v2076_v6  ;;  %v5165_v27 = vld [vmem:[%s7557_s14 + $0x68] sm:$0xff]  }
 0x4f3   :  { %4832 = vmatmul.mubr.msk.bf16.gmra.mrb[88].mxu0 %vm6770_vm1, %v4122_v10  ;;  %v4110_v48 = vpack.c.bf16 %v2079_v12, %v2080_v5  ;;  %v5166_v33 = vld [vmem:[%s7557_s14 + $0x28] sm:$0xff]  }
 0x4f4   :  { %v2019_v36 = vmul.f32 %v2010_v45, %v1983_v53  ;;  %4835 = vmatprep.mubr.msk.bf16.mxu0 %vm5525_vm0, %v5524_v0 }
 0x4f6   :  { %v2077_v50 = vrot.slane %v2019_v36, 6  ;;  %v2104_v15 = vrot.slane %v2019_v36, 2  ;;  %v2132_v35 = vpack.c.bf16 %v2019_v36, %v2019_v36 }
 0x4f8   :  { %v2086_v37 = vsel %vm1529_vm2, %v2077_v50, %v2069_v39  ;;  %v2105_v43 = vsel %vm1602_vm10, %v2103_v17, %v2104_v15  ;;  %v2113_v49 = vsel %vm1602_vm10, %v2104_v15, %v2096_v9  ;;  %v2078_v62 = vsel %vm1529_vm2, %v2076_v6, %v2077_v50  ;;  %v5144_v39 = vld [vmem:[#allocation9 + $0x20] sm:$0xff]   ;;  %v5146_v9 = vld [vmem:[#allocation9 + $0x30] sm:$0xff]   ;;  %v5171_v6 = vld [vmem:[%s7557_s14 + $0x38] sm:$0xff]  }
 0x4f9   :  { %v4101_v13 = vpack.c.bf16 %v6916_v60, %v2086_v37  ;;  %v4125_v46 = vpack.c.bf16 %v2105_v43, %v2106_v41  ;;  %v4128_v23 = vpack.c.bf16 %v2113_v49, %v2113_v49  ;;  %v4113_v16 = vpack.c.bf16 %v2078_v62, %v2078_v62  ;;  %v5147_v60 = vld [vmem:[#allocation9 + $0x38] sm:$0xff]   ;;  %v5169_v17 = vld [vmem:[%s7557_s14 + $0x30] sm:$0xff]   ;;  %v7078_v62 = vld [vmem:[%s7554_s11] ss:$0 sm:$0xff] }
 0x4fa   :  { %vm7646_vm10 = vcmp.eq.s32.totalorder %v6582_v51, 1  ;;  %vm7649_vm2 = vcmp.eq.s32.totalorder %v6596_v24, 1 }
 0x4fb   :  { %4102 = vmatmul.mubr.msk.bf16.vlgmr.msra.gmra.mrb[60].mxu1 %vm6797_vm11, %v4101_v13  ;;  %4836 = vmatmul.mubr.msk.bf16.gmra.mrb[92].mxu0 %vm6801_vm8, %v4125_v46  ;;  %vm7645_vm11 = vcmp.eq.s32.totalorder %v6584_v20, 1  ;;  %vm7648_vm7 = vmmov %vm7646_vm10 }
 0x4fc   :  { %2328 = vmatprep.mubr.bf16.mxu1 %v2129_v29  ;;  %4839 = vmatprep.mubr.msk.bf16.mxu0 %vm5525_vm0, %v5524_v0  ;;  %v5152_v29 = vld [vmem:[%s7557_s14 + $0x48] sm:$0xff]   ;;  %vm7647_vm15 = vmmov %vm7645_vm11 }
 0x4fd   :  { %4844 = vmatpush3.bf16.msra.mxu1 %v5140_v7  ;;  %4543 = vmatprep.subr.bf16.mxu0 %v5152_v29  ;;  %vm4142_vm1 = vmpackc.low %vm7648_vm7, %vm7647_vm15 }
 0x4fe   :  { %4845 = vmatprep.subr.bf16.mxu1 %v5524_v0 }
 0x501   :  { %4846 = vmatpush3.bf16.msra.mxu1 %v5141_v2 }
 0x502   :  { %4847 = vmatprep.subr.bf16.mxu1 %v5524_v0 }
 0x503   :  { %4105 = vmatmul.mubr.msk.bf16.gmra.mrb[64].mxu1 %vm6825_vm14, %v4104_v38  ;;  %4840 = vmatmul.mubr.msk.bf16.gmra.mrb[96].mxu0 %vm6829_vm6, %v4128_v23  ;;  %v5153_v38 = vld [vmem:[%s7557_s14 + $0x8] sm:$0xff]   ;;  %vm7644_vm6 = vmmov %vm7642_vm13  ;;  %vm7650_vm14 = vcmp.eq.s32.totalorder %v6599_v58, 1 }
 0x504   :  { %2336 = vmatprep.mubr.bf16.mxu1 %v2130_v59  ;;  %4544 = vmatpush3.bf16.msra.mxu0 %v5153_v38  ;;  %v5155_v59 = vld [vmem:[%s7557_s14 + $0x50] sm:$0xff]   ;;  %vm7652_vm12 = vmmov %vm7650_vm14 }
 0x505   :  { %4848 = vmatpush3.bf16.msra.mxu1 %v5142_v31  ;;  %4545 = vmatprep.subr.bf16.mxu0 %v5155_v59 }
 0x506   :  { %4849 = vmatprep.subr.bf16.mxu1 %v5524_v0 }
 0x509   :  { %4850 = vmatpush3.bf16.msra.mxu1 %v5143_v26 }
 0x50a   :  { %4851 = vmatprep.subr.bf16.mxu1 %v5524_v0 }
 0x50b   :  { %4108 = vmatmul.mubr.msk.bf16.gmra.mrb[68].mxu1 %vm6849_vm4, %v4107_v28  ;;  %v5156_v28 = vld [vmem:[%s7557_s14 + $0x10] sm:$0xff]   ;;  %vm7651_vm4 = vmmov %vm7649_vm2 }
 0x50c   :  { %2344 = vmatprep.mubr.bf16.mxu1 %v2131_v56  ;;  %4546 = vmatpush3.bf16.msra.mxu0 %v5156_v28  ;;  %v5170_v56 = vld [vmem:[%s7557_s14 + $0x78] sm:$0xff]  }
 0x50d   :  { %4852 = vmatpush3.bf16.msra.mxu1 %v5144_v39  ;;  %4547 = vmatprep.subr.bf16.mxu0 %v5158_v1 }
 0x50e   :  { %4853 = vmatprep.subr.bf16.mxu1 %v5524_v0 }
 0x510   :  { %4548 = vmatpush3.bf16.msra.mxu0 %v5160_v3 }
 0x511   :  { %4854 = vmatpush3.bf16.msra.mxu1 %v5145_v61  ;;  %4549 = vmatprep.subr.bf16.mxu0 %v5162_v55 }
 0x512   :  { %4855 = vmatprep.subr.bf16.mxu1 %v5524_v0 }
 0x513   :  { %4111 = vmatmul.mubr.msk.bf16.gmra.mrb[72].mxu1 %vm6865_vm5, %v4110_v48  ;;  %vm4145_vm5 = vmpackc.low %vm7652_vm12, %vm7651_vm4 }
 0x514   :  { %2352 = vmatprep.mubr.bf16.mxu1 %v2132_v35  ;;  %4550 = vmatpush3.bf16.msra.mxu0 %v5163_v14 }
 0x515   :  { %4856 = vmatpush3.bf16.msra.mxu1 %v5146_v9  ;;  %4551 = vmatprep.subr.bf16.mxu0 %v5165_v27 }
 0x516   :  { %4857 = vmatprep.subr.bf16.mxu1 %v5524_v0 }
 0x518   :  { %4552 = vmatpush3.bf16.msra.mxu0 %v5166_v33 }
 0x519   :  { %4858 = vmatpush3.bf16.msra.mxu1 %v5147_v60  ;;  %4553 = vmatprep.subr.bf16.mxu0 %v5168_v57 }
 0x51a   :  { %4879 = vmatprep.subr.bf16.mxu1 %v5524_v0 }
 0x51b   :  { %4114 = vmatmul.mubr.msk.bf16.gmra.mrb[76].mxu1 %vm6875_vm9, %v4113_v16  ;;  %vm7641_vm9 = vcmp.eq.s32.totalorder %v6572_v8, 1 }
 0x51c   :  { %4859 = vmatprep.mubr.msk.bf16.mxu1 %vm5525_vm0, %v5524_v0  ;;  %4554 = vmatpush3.bf16.msra.mxu0 %v5169_v17  ;;  %vm7643_vm3 = vmmov %vm7641_vm9 }
 0x51d   :  { %4555 = vmatprep.subr.bf16.mxu0 %v5170_v56  ;;  %vm4139_vm8 = vmpackc.low %vm7644_vm6, %vm7643_vm3  ;;  %vm7654_vm3 = vcmp.eq.s32.totalorder %v6633_v25, 1 }
 0x520   :  { %4556 = vmatpush3.bf16.msra.mxu0 %v5171_v6 }
 0x5b6   :  { %v2394_v52 = vpop.f32.mrb[80].mxu0 }
 0x5b7   :  { %v4825_v10 = vpop.f32.mrb[81].mxu0 }
 0x5b8   :  { %v2397_v5 = vpop.f32.mrb[82].mxu0 }
 0x5b9   :  { %v4826_v53 = vpop.f32.mrb[83].mxu0 }
 0x5be   :  { %v2402_v45 = vpop.f32.mrb[84].mxu0 }
 0x5bf   :  { %v4829_v41 = vpop.f32.mrb[85].mxu0 }
 0x5c0   :  { %v2405_v12 = vpop.f32.mrb[86].mxu0 }
 0x5c1   :  { %v4830_v48 = vpop.f32.mrb[87].mxu0 }
 0x5c6   :  { %v7069_v36 = vpop.f32.mrb[88].mxu0 }
 0x5c7   :  { %v4833_v50 = vpop.f32.mrb[89].mxu0 }
 0x5c8   :  { %v7071_v15 = vpop.f32.mrb[90].mxu0 }
 0x5c9   :  { %v4834_v37 = vpop.f32.mrb[91].mxu0 }
 0x5ce   :  { %v4485_v43 = vpop.f32.mrb[60].mxu1  ;;  %v7073_v49 = vpop.f32.mrb[92].mxu0 }
 0x5cf   :  { %v4486_v13 = vpop.f32.mrb[61].mxu1  ;;  %v4837_v46 = vpop.f32.mrb[93].mxu0 }
 0x5d0   :  { %v4487_v23 = vadd.f32 %v4486_v13, %v4485_v43  ;;  %v4488_v35 = vpop.f32.mrb[62].mxu1  ;;  %v7080_v16 = vpop.f32.mrb[94].mxu0 }
 0x5d1   :  { %v4489_v7 = vpop.f32.mrb[63].mxu1  ;;  %v4838_v2 = vpop.f32.mrb[95].mxu0 }
 0x5d2   :  { %v2323_v31 = vadd.f32 %v4487_v23, %v7078_v62  ;;  %v4490_v26 = vadd.f32 %v4489_v7, %v4488_v35 }
 0x5d4   :  { %v2395_v39 = vadd.f32 %v2394_v52, %v2323_v31  ;;  %v2326_v61 = vadd.f32 %v4490_v26, %v7078_v62 }
 0x5d6   :  { %v2432_v9 = vadd.f32 %v2395_v39, %v6607_v47  ;;  %v2398_v60 = vadd.f32 %v2397_v5, %v2326_v61  ;;  %v4491_v22 = vpop.f32.mrb[64].mxu1  ;;  %v7085_v54 = vpop.f32.mrb[96].mxu0  ;;  %v5148_v47 = vld [vmem:[%s7557_s14 + $0x80] sm:$0xff]   ;;  %v5151_v5 = vld [vmem:[%s7557_s14 + $0x88] sm:$0xff]   ;;  %v5157_v61 = vld [vmem:[%s7557_s14 + $0x98] sm:$0xff]  }
 0x5d7   :  { %v4492_v29 = vpop.f32.mrb[65].mxu1  ;;  %v4841_v38 = vpop.f32.mrb[97].mxu0 }
 0x5d8   :  { %v2441_v59 = vsel %vm7641_vm9, %v2432_v9, 0.0  ;;  %v2433_v28 = vadd.f32 %v2398_v60, %v6616_v42  ;;  %v4493_v1 = vadd.f32 %v4492_v29, %v4491_v22  ;;  %v4494_v3 = vpop.f32.mrb[66].mxu1  ;;  %v2429_v55 = vpop.f32.mrb[98].mxu0  ;;  %vm2719_vm9 = vcmp.lt.s32.totalorder %v6241_v30, 4 }
 0x5d9   :  { %v2625_v14 = vmul.f32 0.70710677, %v2441_v59  ;;  %v4495_v27 = vpop.f32.mrb[67].mxu1  ;;  %v4842_v33 = vpop.f32.mrb[99].mxu0 }
 0x5da   :  { %v2442_v57 = vsel %vm7642_vm13, %v2433_v28, 0.0  ;;  %v4140_v17 = vpack.c.bf16 %v2433_v28, %v2432_v9  ;;  %v2331_v56 = vadd.f32 %v4493_v1, %v7078_v62  ;;  %v4496_v6 = vadd.f32 %v4495_v27, %v4494_v3 }
 0x5db   :  { %5284 = verf.f32 %v2625_v14  ;;  %v2626_v42 = vmul.f32 0.70710677, %v2442_v57  ;;  %v2616_v28 = vmul.f32 0.5, %v2441_v59  ;;  %v5159_v59 = vld [vmem:[%s7557_s14 + $0xa0] sm:$0xff]   ;;  %vm7653_vm13 = vcmp.eq.s32.totalorder %v6612_v34, 1 }
 0x5dc   :  { %v2403_v52 = vadd.f32 %v2402_v45, %v2331_v56  ;;  %v2334_v10 = vadd.f32 %v4496_v6, %v7078_v62  ;;  %4860 = vmatmul.mubr.msk.bf16.vlgmr.msra.gmra.mrb[80].mxu1 %vm4139_vm8, %v4140_v17  ;;  %vm7655_vm6 = vmmov %vm7653_vm13 }
 0x5dd   :  { %5286 = verf.f32 %v2626_v42  ;;  %4863 = vmatprep.mubr.msk.bf16.mxu1 %vm5525_vm0, %v5524_v0  ;;  %4880 = vmatpush3.bf16.msra.mxu1 %v5148_v47  ;;  %v7155_v42 = vpop.permute.xlu1 %2739  ;;  %vm7656_vm8 = vmmov %vm7654_vm3 }
 0x5de   :  { %v2434_v53 = vadd.f32 %v2403_v52, %v6629_v11  ;;  %v2406_v41 = vadd.f32 %v2405_v12, %v2334_v10  ;;  %v4497_v48 = vpop.f32.mrb[68].mxu1  ;;  %4881 = vmatprep.subr.bf16.mxu1 %v5524_v0  ;;  %v5154_v11 = vld [vmem:[%s7557_s14 + $0x90] sm:$0xff]  }
 0x5df   :  { %v4498_v50 = vpop.f32.mrb[69].mxu1 }
 0x5e0   :  { %v7110_v45 = vsel %vm7645_vm11, %v2434_v53, 0.0  ;;  %v2435_v37 = vadd.f32 %v2406_v41, %v6638_v19  ;;  %v4499_v43 = vadd.f32 %v4498_v50, %v4497_v48  ;;  %v4500_v13 = vpop.f32.mrb[70].mxu1  ;;  %v7165_v41 = vpop.permute.xlu0 %2742  ;;  %vm4148_vm11 = vmpackc.low %vm7656_vm8, %vm7655_vm6 }
 0x5e1   :  { %v2627_v46 = vmul.f32 0.70710677, %v7110_v45  ;;  %v4501_v23 = vpop.f32.mrb[71].mxu1  ;;  %4882 = vmatpush3.bf16.msra.mxu1 %v5151_v5 }
 0x5e2   :  { %v7119_v12 = vsel %vm7646_vm10, %v2435_v37, 0.0  ;;  %v2339_v35 = vadd.f32 %v4499_v43, %v7078_v62  ;;  %v4502_v7 = vadd.f32 %v4501_v23, %v4500_v13  ;;  %v4143_v2 = vpack.c.bf16 %v2435_v37, %v2434_v53  ;;  %4883 = vmatprep.subr.bf16.mxu1 %v5524_v0 }
 0x5e3   :  { %5288 = verf.f32 %v2627_v46  ;;  %v2628_v19 = vmul.f32 0.70710677, %v7119_v12  ;;  %v2618_v43 = vmul.f32 0.5, %v7110_v45  ;;  %vm7657_vm10 = vcmp.eq.s32.totalorder %v6578_v18, 1 }
 0x5e4   :  { %v2411_v31 = vadd.f32 %v7069_v36, %v2339_v35  ;;  %v2342_v26 = vadd.f32 %v4502_v7, %v7078_v62  ;;  %4864 = vmatmul.mubr.msk.bf16.gmra.mrb[84].mxu1 %vm4142_vm1, %v4143_v2  ;;  %v2619_v7 = vmul.f32 0.5, %v7119_v12  ;;  %vm7658_vm15 = vmmov %vm7657_vm10 }
 0x5e5   :  { %v5285_v39 = vpop.eup %5284  ;;  %5290 = verf.f32 %v2628_v19  ;;  %4867 = vmatprep.mubr.msk.bf16.mxu1 %vm5525_vm0, %v5524_v0  ;;  %4884 = vmatpush3.bf16.msra.mxu1 %v5154_v11  ;;  %vm4151_vm7 = vmpackc.low %vm7658_vm15, %vm7658_vm15 }
 0x5e6   :  { %v2436_v9 = vadd.f32 %v2411_v31, %v6654_v40  ;;  %v2414_v60 = vadd.f32 %v7071_v15, %v2342_v26  ;;  %v4503_v22 = vpop.f32.mrb[72].mxu1  ;;  %v2643_v29 = vadd.f32 1.0, %v5285_v39  ;;  %4885 = vmatprep.subr.bf16.mxu1 %v5524_v0  ;;  %v2617_v15 = vmul.f32 0.5, %v2442_v57  ;;  %v7190_v39 = vpop.permute.xlu1 %2793 }
 0x5e7   :  { %v5287_v36 = vpop.eup %5286  ;;  %v4504_v38 = vpop.f32.mrb[73].mxu1  ;;  %vm2819_vm1 = vcmp.eq.s32.totalorder %v7190_v39, 1 }
 0x5e8   :  { %v7140_v1 = vsel %vm7649_vm2, %v2436_v9, 0.0  ;;  %v2437_v3 = vadd.f32 %v2414_v60, %v6662_v44  ;;  %v4505_v55 = vadd.f32 %v4504_v38, %v4503_v22  ;;  %v4506_v14 = vpop.f32.mrb[74].mxu1  ;;  %v2644_v27 = vadd.f32 1.0, %v5287_v36  ;;  %v5164_v60 = vld [vmem:[%s7557_s14 + $0xb0] sm:$0xff]  }
 0x5e9   :  { %v2629_v40 = vmul.f32 0.70710677, %v7140_v1  ;;  %v4507_v33 = vpop.f32.mrb[75].mxu1  ;;  %v7144_v47 = vmul.f32 %v2643_v29, %v2616_v28  ;;  %4886 = vmatpush3.bf16.msra.mxu1 %v5157_v61 }
 0x5ea   :  { %v7151_v17 = vsel %vm7650_vm14, %v2437_v3, 0.0  ;;  %v2347_v44 = vadd.f32 %v4505_v55, %v7078_v62  ;;  %v4508_v56 = vadd.f32 %v4507_v33, %v4506_v14  ;;  %v4146_v6 = vpack.c.bf16 %v2437_v3, %v2436_v9  ;;  %4887 = vmatprep.subr.bf16.mxu1 %v5524_v0 }
 0x5eb   :  { %5292 = verf.f32 %v2629_v40  ;;  %v2630_v57 = vmul.f32 0.70710677, %v7151_v17  ;;  %v2653_v52 = vmul.f32 %v2644_v27, %v2617_v15  ;;  %v2710_v48 = vrot.slane %v7144_v47, 4  ;;  %v5167_v15 = vld [vmem:[%s7557_s14 + $0xb8] sm:$0xff]  }
 0x5ec   :  { %v2419_v10 = vadd.f32 %v7073_v49, %v2347_v44  ;;  %v2350_v5 = vadd.f32 %v4508_v56, %v7078_v62  ;;  %4868 = vmatmul.mubr.msk.bf16.gmra.mrb[88].mxu1 %vm4145_vm5, %v4146_v6  ;;  %v5161_v49 = vld [vmem:[%s7557_s14 + $0xa8] sm:$0xff]  }
 0x5ed   :  { %v5289_v53 = vpop.eup %5288  ;;  %5294 = verf.f32 %v2630_v57  ;;  %v2711_v50 = vrot.slane %v2653_v52, 4  ;;  %v2842_v37 = vpack.c.bf16 %v2653_v52, %v7144_v47  ;;  %4871 = vmatprep.mubr.msk.bf16.mxu1 %vm5525_vm0, %v5524_v0  ;;  %4888 = vmatpush3.bf16.msra.mxu1 %v5159_v59  ;;  %v2620_v59 = vmul.f32 0.5, %v7140_v1  ;;  %v7227_v57 = vpop.permute.xlu1 %2745 }
 0x5ee   :  { %v2645_v13 = vadd.f32 1.0, %v5289_v53  ;;  %v2438_v46 = vadd.f32 %v2419_v10, %v6688_v21  ;;  %v2422_v23 = vadd.f32 %v7080_v16, %v2350_v5  ;;  %v4509_v11 = vpop.f32.mrb[76].mxu1  ;;  %4889 = vmatprep.subr.bf16.mxu1 %v5524_v0  ;;  %v2621_v5 = vmul.f32 0.5, %v7151_v17 }
 0x5ef   :  { %v5291_v35 = vpop.eup %5290  ;;  %v7183_v2 = vsel %vm2719_vm9, %v2710_v48, %v2711_v50  ;;  %3034 = vmatprep.mubr.bf16.mxu0 %v2842_v37  ;;  %v4510_v19 = vpop.f32.mrb[77].mxu1 }
 0x5f0   :  { %v7185_v45 = vmul.f32 %v2645_v13, %v2618_v43  ;;  %v2646_v31 = vadd.f32 1.0, %v5291_v35  ;;  %v2447_v21 = vsel %vm7653_vm13, %v2438_v46, 0.0  ;;  %v2439_v16 = vadd.f32 %v2422_v23, %v6698_v32  ;;  %v4512_v26 = vpop.f32.mrb[78].mxu1  ;;  %v2797_v32 = vpop.permute.xlu0 %2796 }
 0x5f1   :  { %v2631_v12 = vmul.f32 0.70710677, %v2447_v21  ;;  %v4511_v61 = vadd.f32 %v4510_v19, %v4509_v11  ;;  %v4513_v9 = vpop.f32.mrb[79].mxu1  ;;  %4890 = vmatpush3.bf16.msra.mxu1 %v5161_v49  ;;  %v2800_v11 = vpop.permute.xlu1 %2799  ;;  %vm2820_vm2 = vcmp.eq.s32.totalorder %v2797_v32, 1  ;;  %vm2766_vm13 = vcmp.eq.s32.totalorder %v7165_v41, 1 }
 0x5f2   :  { %v2712_v22 = vrot.slane %v7185_v45, 4  ;;  %v7196_v29 = vmul.f32 %v2646_v31, %v2619_v7  ;;  %v2448_v36 = vsel %vm7654_vm3, %v2439_v16, 0.0  ;;  %v4149_v38 = vpack.c.bf16 %v2439_v16, %v2438_v46  ;;  %4891 = vmatprep.subr.bf16.mxu1 %v5524_v0  ;;  %vm7264_vm14 = vmpackc.low %vm2820_vm2, %vm2819_vm1 }
 0x5f3   :  { %5296 = verf.f32 %v2631_v12  ;;  %v2632_v28 = vmul.f32 0.70710677, %v2448_v36  ;;  %v2355_v3 = vadd.f32 %v4511_v61, %v7078_v62  ;;  %v2622_v7 = vmul.f32 0.5, %v2447_v21 }
 0x5f4   :  { %v7208_v55 = vsel %vm2719_vm9, %v2711_v50, %v2712_v22  ;;  %4872 = vmatmul.mubr.msk.bf16.gmra.mrb[92].mxu1 %vm4148_vm11, %v4149_v38  ;;  %v2713_v14 = vrot.slane %v7196_v29, 4  ;;  %v2843_v27 = vpack.c.bf16 %v7196_v29, %v7185_v45  ;;  %v7235_v53 = vpop.permute.xlu0 %2748  ;;  %v2623_v9 = vmul.f32 0.5, %v2448_v36  ;;  %v5197_v29 = vld [vmem:[#allocation12 + $0x8] sm:$0xff]  }
 0x5f5   :  { %v5293_v40 = vpop.eup %5292  ;;  %5298 = verf.f32 %v2632_v28  ;;  %v4195_v62 = vpack.c.bf16 %v7208_v55, %v7183_v2  ;;  %v2427_v33 = vadd.f32 %v7085_v54, %v2355_v3  ;;  %4875 = vmatprep.mubr.msk.bf16.mxu1 %vm5525_vm0, %v5524_v0  ;;  %4892 = vmatpush3.bf16.msra.mxu1 %v5164_v60  ;;  %v2752_v28 = vpop.permute.xlu1 %2751  ;;  %vm2821_vm12 = vcmp.eq.s32.totalorder %v2800_v11, 1  ;;  %v5174_v11 = vld [vmem:[#allocation10 + $0x90] sm:$0xff]  }
 0x5f6   :  { %v2647_v44 = vadd.f32 1.0, %v5293_v40  ;;  %4893 = vmatprep.subr.bf16.mxu1 %v5524_v0  ;;  %v7225_v56 = vsel %vm2719_vm9, %v2712_v22, %v2713_v14  ;;  %vm2765_vm3 = vcmp.eq.s32.totalorder %v7155_v42, 1  ;;  %vm2768_vm15 = vcmp.eq.s32.totalorder %v7235_v53, 1 }
 0x5f7   :  { %v5295_v6 = vpop.eup %5294  ;;  %v2440_v54 = vadd.f32 %v2427_v33, %v6735_v4  ;;  %v4183_v52 = vpack.c.bf16 %v7225_v56, %v7208_v55  ;;  %vm7298_vm6 = vmpackc.low %vm2766_vm13, %vm2765_vm3  ;;  %vm2769_vm3 = vcmp.eq.s32.totalorder %v2752_v28, 1  ;;  %v5187_v28 = vld [vmem:[#allocation10 + $0x18] sm:$0xff]   ;;  %v5198_v55 = vld [vmem:[#allocation12 + $0x10] sm:$0xff]  }
 0x5f8   :  { %v7232_v10 = vmul.f32 %v2647_v44, %v2620_v59  ;;  %v2648_v1 = vadd.f32 1.0, %v5295_v6  ;;  %v2803_v26 = vpop.permute.xlu0 %2802 }
 0x5f9   :  { %v2449_v50 = vsel %vm7657_vm10, %v2440_v54, 0.0  ;;  %4894 = vmatpush3.bf16.msra.mxu1 %v5167_v15  ;;  %v4152_v43 = vpack.c.bf16 %v2440_v54, %v2440_v54  ;;  %vm2822_vm4 = vcmp.eq.s32.totalorder %v2803_v26, 1  ;;  %v2806_v44 = vpop.permute.xlu1 %2805  ;;  %v5183_v26 = vld [vmem:[#allocation10 + $0xb0] sm:$0xff]  }
 0x5fa   :  { %v7239_v37 = vmul.f32 %v2648_v1, %v2621_v5  ;;  %v2633_v49 = vmul.f32 0.70710677, %v2449_v50  ;;  %v2714_v4 = vrot.slane %v7232_v10, 4  ;;  %4915 = vmatprep.subr.bf16.mxu1 %v5524_v0  ;;  %v2624_v15 = vmul.f32 0.5, %v2449_v50  ;;  %vm7281_vm5 = vmpackc.low %vm2822_vm4, %vm2821_vm12 }
 0x5fb   :  { %vm2823_vm11 = vcmp.eq.s32.totalorder %v2806_v44, 1 }
 0x5fc   :  { %5300 = verf.f32 %v2633_v49  ;;  %4876 = vmatmul.mubr.msk.bf16.gmra.mrb[96].mxu1 %vm4151_vm7, %v4152_v43  ;;  %v7248_v17 = vsel %vm2719_vm9, %v2713_v14, %v2714_v4  ;;  %v2715_v13 = vrot.slane %v7239_v37, 4  ;;  %v2844_v46 = vpack.c.bf16 %v7239_v37, %v7232_v10  ;;  %v2755_v32 = vpop.permute.xlu0 %2754 }
 0x5fd   :  { %v5297_v23 = vpop.eup %5296  ;;  %4895 = vmatprep.mubr.msk.bf16.mxu1 %vm5525_vm0, %v5524_v0  ;;  %v4198_v35 = vpack.c.bf16 %v7248_v17, %v7225_v56  ;;  %v2758_v42 = vpop.permute.xlu1 %2757  ;;  %vm2767_vm7 = vcmp.eq.s32.totalorder %v7227_v57, 1  ;;  %vm2770_vm13 = vcmp.eq.s32.totalorder %v2755_v32, 1  ;;  %v5191_v32 = vld [vmem:[#allocation10 + $0x28] sm:$0xff]   ;;  %v5199_v57 = vld [vmem:[#allocation12 + $0x18] sm:$0xff]  }
 0x5fe   :  { %v2649_v19 = vadd.f32 1.0, %v5297_v23  ;;  %v7259_v31 = vsel %vm2719_vm9, %v2714_v4, %v2715_v13  ;;  %vm7317_vm1 = vmpackc.low %vm2768_vm15, %vm2767_vm7  ;;  %v5173_v23 = vld [vmem:[#allocation10 + $0x88] sm:$0xff]  }
 0x5ff   :  { %v5299_v16 = vpop.eup %5298  ;;  %v4186_v12 = vpack.c.bf16 %v7259_v31, %v7248_v17  ;;  %v5201_v17 = vld [vmem:[#allocation12 + $0x28] sm:$0xff]  }
 0x600   :  { %v2658_v61 = vmul.f32 %v2649_v19, %v2622_v7  ;;  %v2650_v60 = vadd.f32 1.0, %v5299_v16  ;;  %v2809_v5 = vpop.permute.xlu0 %2808  ;;  %v5178_v7 = vld [vmem:[#allocation10 + $0xa0] sm:$0xff]   ;;  %v5181_v19 = vld [vmem:[#allocation10 + $0xa8] sm:$0xff]  }
 0x601   :  { %vm2824_vm8 = vcmp.eq.s32.totalorder %v2809_v5, 1  ;;  %v5177_v16 = vld [vmem:[#allocation10] sm:$0xff]  }
 0x602   :  { %v2659_v22 = vmul.f32 %v2650_v60, %v2623_v9  ;;  %v2716_v38 = vrot.slane %v2658_v61, 4  ;;  %vm7307_vm10 = vmpackc.low %vm2824_vm8, %vm2823_vm11  ;;  %v5185_v9 = vld [vmem:[#allocation10 + $0xb8] sm:$0xff]   ;;  %v5182_v60 = vld [vmem:[#allocation10 + $0x50] sm:$0xff]  }
 0x603   :  { %vm7337_vm8 = vmpackc.low %vm2770_vm13, %vm2769_vm3 }
 0x604   :  { %4896 = vmatmul.mubr.msk.bf16.vlgmr.msra.gmra.mrb[100].mxu1 %vm7264_vm14, %v4195_v62  ;;  %v7272_v39 = vsel %vm2719_vm9, %v2715_v13, %v2716_v38  ;;  %v2717_v3 = vrot.slane %v2659_v22, 4  ;;  %v2845_v14 = vpack.c.bf16 %v2659_v22, %v2658_v61  ;;  %v2761_v47 = vpop.permute.xlu0 %2760  ;;  %v5180_v61 = vld [vmem:[#allocation10 + $0x8] sm:$0xff]   ;;  %v5184_v22 = vld [vmem:[#allocation10 + $0x10] sm:$0xff]   ;;  %v5196_v13 = vld [vmem:[#allocation12] sm:$0xff]  }
 0x605   :  { %4899 = vmatprep.mubr.msk.bf16.mxu1 %vm5525_vm0, %v5524_v0  ;;  %v4201_v36 = vpack.c.bf16 %v7272_v39, %v7259_v31  ;;  %vm2772_vm7 = vcmp.eq.s32.totalorder %v2761_v47, 1  ;;  %v5176_v31 = vld [vmem:[#allocation10 + $0x40] sm:$0xff]  }
 0x606   :  { %v5301_v40 = vpop.eup %5300  ;;  %v2721_v33 = vsel %vm2719_vm9, %v2716_v38, %v2717_v3  ;;  %4600 = vmatprep.subr.bf16.mxu0 %v5176_v31  ;;  %v5186_v38 = vld [vmem:[#allocation10 + $0x58] sm:$0xff]  }
 0x607   :  { %v2651_v59 = vadd.f32 1.0, %v5301_v40  ;;  %v4189_v62 = vpack.c.bf16 %v2721_v33, %v7272_v39  ;;  %v5188_v39 = vld [vmem:[#allocation10 + $0x60] sm:$0xff]   ;;  %v5193_v40 = vld [vmem:[#allocation10 + $0x30] sm:$0xff]  }
 0x608   :  { %v2815_v45 = vpop.permute.xlu0 %2814 }
 0x609   :  { %v2660_v6 = vmul.f32 %v2651_v59, %v2624_v15  ;;  %vm2826_vm2 = vcmp.eq.s32.totalorder %v2815_v45, 1  ;;  %v5195_v15 = vld [vmem:[#allocation10 + $0x38] sm:$0xff]  }
 0x60b   :  { %v2718_v1 = vrot.slane %v2660_v6, 4  ;;  %v2846_v10 = vpack.c.bf16 %v2660_v6, %v2660_v6 }
 0x60c   :  { %4900 = vmatmul.mubr.msk.bf16.gmra.mrb[104].mxu1 %vm7281_vm5, %v4198_v35  ;;  %v5175_v35 = vld [vmem:[#allocation10 + $0x98] sm:$0xff]  }
 0x60d   :  { %v2728_v50 = vsel %vm2719_vm9, %v2718_v1, %v2710_v48  ;;  %4903 = vmatprep.mubr.msk.bf16.mxu1 %vm5525_vm0, %v5524_v0  ;;  %v2720_v49 = vsel %vm2719_vm9, %v2717_v3, %v2718_v1  ;;  %v5189_v3 = vld [vmem:[#allocation10 + $0x20] sm:$0xff]  }
 0x60e   :  { %v4180_v43 = vpack.c.bf16 %v7183_v2, %v2728_v50  ;;  %v4204_v4 = vpack.c.bf16 %v2720_v49, %v2721_v33  ;;  %v2812_v2 = vpop.permute.xlu1 %2811  ;;  %v4207_v56 = vpack.c.bf16 %v2728_v50, %v2728_v50  ;;  %v4192_v37 = vpack.c.bf16 %v2720_v49, %v2720_v49  ;;  %v5194_v33 = vld [vmem:[#allocation10 + $0x78] sm:$0xff]  }
 0x60f   :  { %vm2825_vm4 = vcmp.eq.s32.totalorder %v2812_v2, 1 }
 0x610   :  { %4181 = vmatmul.mubr.msk.bf16.vlgmr.msra.gmra.mrb[100].mxu0 %vm7298_vm6, %v4180_v43  ;;  %vm7329_vm12 = vmpackc.low %vm2826_vm2, %vm2825_vm4  ;;  %vm2771_vm2 = vcmp.eq.s32.totalorder %v2758_v42, 1 }
 0x611   :  { %3042 = vmatprep.mubr.bf16.mxu0 %v2843_v27  ;;  %v2818_v27 = vpop.permute.xlu0 %2817  ;;  %vm7354_vm4 = vmpackc.low %vm2772_vm7, %vm2771_vm2  ;;  %4601 = vmatpush3.bf16.msra.mxu0 %v5177_v16 }
 0x612   :  { %vm2827_vm11 = vcmp.eq.s32.totalorder %v2818_v27, 1  ;;  %v2764_v53 = vpop.permute.xlu1 %2763 }
 0x613   :  { %vm7346_vm15 = vmpackc.low %vm2827_vm11, %vm2827_vm11  ;;  %vm2773_vm13 = vcmp.eq.s32.totalorder %v2764_v53, 1  ;;  %vm3659_vm11 = vcmask 1041409  }
 0x614   :  { %4904 = vmatmul.mubr.msk.bf16.gmra.mrb[108].mxu1 %vm7307_vm10, %v4201_v36  ;;  %vm7360_vm3 = vmpackc.low %vm2773_vm13, %vm2773_vm13  ;;  %v5192_v36 = vld [vmem:[#allocation10 + $0x70] sm:$0xff]  }
 0x615   :  { %4907 = vmatprep.mubr.msk.bf16.mxu1 %vm5525_vm0, %v5524_v0 }
 0x618   :  { %4184 = vmatmul.mubr.msk.bf16.gmra.mrb[104].mxu0 %vm7317_vm1, %v4183_v52  ;;  %v5200_v52 = vld [vmem:[#allocation12 + $0x20] sm:$0xff]  }
 0x619   :  { %3050 = vmatprep.mubr.bf16.mxu0 %v2844_v46  ;;  %v5172_v46 = vld [vmem:[#allocation10 + $0x80] sm:$0xff]  }
 0x61a   :  { %4916 = vmatpush3.bf16.msra.mxu1 %v5172_v46 }
 0x61b   :  { %4917 = vmatprep.subr.bf16.mxu1 %v5524_v0 }
 0x61c   :  { %4908 = vmatmul.mubr.msk.bf16.gmra.mrb[112].mxu1 %vm7329_vm12, %v4204_v4  ;;  %v7378_v4 = vld [vmem:[%s7558_s15] ss:$0 sm:$0xff] }
 0x61d   :  { %4911 = vmatprep.mubr.msk.bf16.mxu1 %vm5525_vm0, %v5524_v0 }
 0x61e   :  { %4918 = vmatpush3.bf16.msra.mxu1 %v5173_v23 }
 0x61f   :  { %4919 = vmatprep.subr.bf16.mxu1 %v5524_v0 }
 0x620   :  { %4187 = vmatmul.mubr.msk.bf16.gmra.mrb[108].mxu0 %vm7337_vm8, %v4186_v12  ;;  %v5179_v12 = vld [vmem:[#allocation10 + $0x48] sm:$0xff]  }
 0x621   :  { %3058 = vmatprep.mubr.bf16.mxu0 %v2845_v14  ;;  %4602 = vmatprep.subr.bf16.mxu0 %v5179_v12  ;;  %v5190_v14 = vld [vmem:[#allocation10 + $0x68] sm:$0xff]  }
 0x622   :  { %4920 = vmatpush3.bf16.msra.mxu1 %v5174_v11  ;;  %4603 = vmatpush3.bf16.msra.mxu0 %v5180_v61 }
 0x623   :  { %4921 = vmatprep.subr.bf16.mxu1 %v5524_v0  ;;  %4604 = vmatprep.subr.bf16.mxu0 %v5182_v60 }
 0x624   :  { %4912 = vmatmul.mubr.msk.bf16.gmra.mrb[116].mxu1 %vm7346_vm15, %v4207_v56 }
 0x625   :  { %4931 = vmatprep.mubr.msk.bf16.mxu1 %vm5525_vm0, %v5524_v0 }
 0x626   :  { %4922 = vmatpush3.bf16.msra.mxu1 %v5175_v35  ;;  %4605 = vmatpush3.bf16.msra.mxu0 %v5184_v22 }
 0x627   :  { %4923 = vmatprep.subr.bf16.mxu1 %v5524_v0  ;;  %4606 = vmatprep.subr.bf16.mxu0 %v5186_v38 }
 0x628   :  { %4190 = vmatmul.mubr.msk.bf16.gmra.mrb[112].mxu0 %vm7354_vm4, %v4189_v62 }
 0x629   :  { %3066 = vmatprep.mubr.bf16.mxu0 %v2846_v10 }
 0x62a   :  { %4924 = vmatpush3.bf16.msra.mxu1 %v5178_v7  ;;  %4607 = vmatpush3.bf16.msra.mxu0 %v5187_v28 }
 0x62b   :  { %4925 = vmatprep.subr.bf16.mxu1 %v5524_v0  ;;  %4608 = vmatprep.subr.bf16.mxu0 %v5188_v39 }
 0x62e   :  { %4926 = vmatpush3.bf16.msra.mxu1 %v5181_v19  ;;  %4609 = vmatpush3.bf16.msra.mxu0 %v5189_v3 }
 0x62f   :  { %4927 = vmatprep.subr.bf16.mxu1 %v5524_v0  ;;  %4610 = vmatprep.subr.bf16.mxu0 %v5190_v14 }
 0x630   :  { %4193 = vmatmul.mubr.msk.bf16.gmra.mrb[116].mxu0 %vm7360_vm3, %v4192_v37 }
 0x632   :  { %4928 = vmatpush3.bf16.msra.mxu1 %v5183_v26  ;;  %4611 = vmatpush3.bf16.msra.mxu0 %v5191_v32 }
 0x633   :  { %4929 = vmatprep.subr.bf16.mxu1 %v5524_v0  ;;  %4612 = vmatprep.subr.bf16.mxu0 %v5192_v36 }
 0x636   :  { %4930 = vmatpush3.bf16.msra.mxu1 %v5185_v9  ;;  %4613 = vmatpush3.bf16.msra.mxu0 %v5193_v40 }
 0x637   :  { %4971 = vmatprep.subr.bf16.mxu1 %v5524_v0  ;;  %4614 = vmatprep.subr.bf16.mxu0 %v5194_v33 }
 0x63a   :  { %4615 = vmatpush3.bf16.msra.mxu0 %v5195_v15 }
 0x63b   :  { %4951 = vmatprep.subr.bf16.mxu0 %v5524_v0 }
 0x6d7   :  { %v3108_v59 = vpop.f32.mrb[100].mxu1 }
 0x6d8   :  { %v4897_v62 = vpop.f32.mrb[101].mxu1 }
 0x6d9   :  { %v3111_v44 = vpop.f32.mrb[102].mxu1 }
 0x6da   :  { %v4898_v6 = vpop.f32.mrb[103].mxu1 }
 0x6df   :  { %v3116_v5 = vpop.f32.mrb[104].mxu1 }
 0x6e0   :  { %v4901_v1 = vpop.f32.mrb[105].mxu1 }
 0x6e1   :  { %v3119_v50 = vpop.f32.mrb[106].mxu1 }
 0x6e2   :  { %v4902_v49 = vpop.f32.mrb[107].mxu1 }
 0x6e3   :  { %v4557_v43 = vpop.f32.mrb[100].mxu0 }
 0x6e4   :  { %v4558_v42 = vpop.f32.mrb[101].mxu0 }
 0x6e5   :  { %v4559_v47 = vadd.f32 %v4558_v42, %v4557_v43  ;;  %v4560_v2 = vpop.f32.mrb[102].mxu0 }
 0x6e6   :  { %v4561_v45 = vpop.f32.mrb[103].mxu0 }
 0x6e7   :  { %v3037_v27 = vadd.f32 %v4559_v47, %v7378_v4  ;;  %v4562_v56 = vadd.f32 %v4561_v45, %v4560_v2  ;;  %v3124_v10 = vpop.f32.mrb[108].mxu1 }
 0x6e8   :  { %v4905_v53 = vpop.f32.mrb[109].mxu1 }
 0x6e9   :  { %v3109_v37 = vadd.f32 %v3108_v59, %v3037_v27  ;;  %v3040_v46 = vadd.f32 %v4562_v56, %v7378_v4  ;;  %v3127_v23 = vpop.f32.mrb[110].mxu1 }
 0x6ea   :  { %v4906_v11 = vpop.f32.mrb[111].mxu1 }
 0x6eb   :  { %v3155_v35 = vmul.f32 0.70710677, %v3109_v37  ;;  %v3112_v7 = vadd.f32 %v3111_v44, %v3040_v46  ;;  %v4563_v19 = vpop.f32.mrb[104].mxu0 }
 0x6ec   :  { %v4564_v31 = vpop.f32.mrb[105].mxu0 }
 0x6ed   :  { %5302 = verf.f32 %v3155_v35  ;;  %v3156_v16 = vmul.f32 0.70710677, %v3112_v7  ;;  %v4565_v26 = vadd.f32 %v4564_v31, %v4563_v19  ;;  %v4566_v12 = vpop.f32.mrb[106].mxu0  ;;  %v3147_v56 = vmul.f32 0.5, %v3112_v7 }
 0x6ee   :  { %v4567_v61 = vpop.f32.mrb[107].mxu0 }
 0x6ef   :  { %5304 = verf.f32 %v3156_v16  ;;  %v3045_v9 = vadd.f32 %v4565_v26, %v7378_v4  ;;  %v4568_v60 = vadd.f32 %v4567_v61, %v4566_v12  ;;  %v3132_v22 = vpop.f32.mrb[112].mxu1 }
 0x6f0   :  { %v4909_v38 = vpop.f32.mrb[113].mxu1 }
 0x6f1   :  { %v3117_v28 = vadd.f32 %v3116_v5, %v3045_v9  ;;  %v3048_v39 = vadd.f32 %v4568_v60, %v7378_v4  ;;  %v3135_v3 = vpop.f32.mrb[114].mxu1  ;;  %v3146_v5 = vmul.f32 0.5, %v3109_v37 }
 0x6f2   :  { %v4910_v14 = vpop.f32.mrb[115].mxu1 }
 0x6f3   :  { %v3157_v32 = vmul.f32 0.70710677, %v3117_v28  ;;  %v3120_v36 = vadd.f32 %v3119_v50, %v3048_v39  ;;  %v4569_v40 = vpop.f32.mrb[108].mxu0 }
 0x6f4   :  { %v4570_v33 = vpop.f32.mrb[109].mxu0 }
 0x6f5   :  { %5306 = verf.f32 %v3157_v32  ;;  %v3158_v15 = vmul.f32 0.70710677, %v3120_v36  ;;  %v4571_v59 = vadd.f32 %v4570_v33, %v4569_v40  ;;  %v4572_v62 = vpop.f32.mrb[110].mxu0  ;;  %v3148_v32 = vmul.f32 0.5, %v3117_v28 }
 0x6f6   :  { %v4573_v44 = vpop.f32.mrb[111].mxu0 }
 0x6f7   :  { %v5303_v6 = vpop.eup %5302  ;;  %5308 = verf.f32 %v3158_v15  ;;  %v3053_v1 = vadd.f32 %v4571_v59, %v7378_v4  ;;  %v4574_v49 = vadd.f32 %v4573_v44, %v4572_v62  ;;  %v3140_v43 = vpop.f32.mrb[116].mxu1  ;;  %v3149_v44 = vmul.f32 0.5, %v3120_v36 }
 0x6f8   :  { %v4913_v42 = vpop.f32.mrb[117].mxu1  ;;  %v3173_v47 = vadd.f32 1.0, %v5303_v6 }
 0x6f9   :  { %v5305_v2 = vpop.eup %5304  ;;  %v3125_v45 = vadd.f32 %v3124_v10, %v3053_v1  ;;  %v3056_v50 = vadd.f32 %v4574_v49, %v7378_v4  ;;  %v3143_v27 = vpop.f32.mrb[118].mxu1 }
 0x6fa   :  { %v4914_v53 = vpop.f32.mrb[119].mxu1  ;;  %v3174_v46 = vadd.f32 1.0, %v5305_v2  ;;  %v7386_v11 = vmul.f32 %v3173_v47, %v3146_v5 }
 0x6fb   :  { %v3159_v35 = vmul.f32 0.70710677, %v3125_v45  ;;  %v3128_v19 = vadd.f32 %v3127_v23, %v3056_v50  ;;  %v4575_v31 = vpop.f32.mrb[112].mxu0 }
 0x6fc   :  { %v4576_v16 = vpop.f32.mrb[113].mxu0  ;;  %v3183_v26 = vmul.f32 %v3174_v46, %v3147_v56  ;;  %v3240_v10 = vrot.slane %v7386_v11, 4 }
 0x6fd   :  { %5310 = verf.f32 %v3159_v35  ;;  %v3160_v12 = vmul.f32 0.70710677, %v3128_v19  ;;  %v4577_v37 = vadd.f32 %v4576_v16, %v4575_v31  ;;  %v4578_v61 = vpop.f32.mrb[114].mxu0  ;;  %v3150_v31 = vmul.f32 0.5, %v3125_v45 }
 0x6fe   :  { %v4579_v9 = vpop.f32.mrb[115].mxu0  ;;  %v3241_v60 = vrot.slane %v3183_v26, 4  ;;  %v3281_v38 = vpack.c.bf16 %v3183_v26, %v7386_v11  ;;  %v5202_v11 = vld [vmem:[#allocation12 + $0x30] sm:$0xff]  }
 0x6ff   :  { %v5307_v7 = vpop.eup %5306  ;;  %5312 = verf.f32 %v3160_v12  ;;  %v3061_v39 = vadd.f32 %v4577_v37, %v7378_v4  ;;  %v4580_v14 = vadd.f32 %v4579_v9, %v4578_v61 }
 0x700   :  { %v3175_v23 = vadd.f32 1.0, %v5307_v7  ;;  %v7395_v40 = vsel %vm2719_vm9, %v3240_v10, %v3241_v60  ;;  %3473 = vmatprep.mubr.bf16.mxu0 %v3281_v38 }
 0x701   :  { %v5309_v33 = vpop.eup %5308  ;;  %v3133_v15 = vadd.f32 %v3132_v22, %v3061_v39  ;;  %v3064_v59 = vadd.f32 %v4580_v14, %v7378_v4 }
 0x702   :  { %v7398_v62 = vmul.f32 %v3175_v23, %v3148_v32  ;;  %v3176_v6 = vadd.f32 1.0, %v5309_v33 }
 0x703   :  { %v3161_v1 = vmul.f32 0.70710677, %v3133_v15  ;;  %v3136_v49 = vadd.f32 %v3135_v3, %v3064_v59  ;;  %v4581_v5 = vpop.f32.mrb[116].mxu0  ;;  %v3152_v21 = vmul.f32 0.5, %v3133_v15 }
 0x704   :  { %v3242_v28 = vrot.slane %v7398_v62, 4  ;;  %v7401_v42 = vmul.f32 %v3176_v6, %v3149_v44  ;;  %v4582_v47 = vpop.f32.mrb[117].mxu0 }
 0x705   :  { %5314 = verf.f32 %v3161_v1  ;;  %v3162_v2 = vmul.f32 0.70710677, %v3136_v49  ;;  %v4583_v50 = vadd.f32 %v4582_v47, %v4581_v5  ;;  %v4584_v27 = vpop.f32.mrb[118].mxu0  ;;  %v3153_v6 = vmul.f32 0.5, %v3136_v49 }
 0x706   :  { %v3243_v22 = vrot.slane %v7401_v42, 4  ;;  %v3255_v56 = vsel %vm2719_vm9, %v3241_v60, %v3242_v28  ;;  %v4585_v53 = vpop.f32.mrb[119].mxu0  ;;  %v3282_v36 = vpack.c.bf16 %v7401_v42, %v7398_v62  ;;  %v3151_v60 = vmul.f32 0.5, %v3128_v19 }
 0x707   :  { %v5311_v3 = vpop.eup %5310  ;;  %5316 = verf.f32 %v3162_v2  ;;  %v4250_v46 = vpack.c.bf16 %v3255_v56, %v7395_v40  ;;  %v3069_v35 = vadd.f32 %v4583_v50, %v7378_v4 }
 0x708   :  { %v3177_v16 = vadd.f32 1.0, %v5311_v3  ;;  %v3254_v26 = vsel %vm2719_vm9, %v3242_v28, %v3243_v22 }
 0x709   :  { %v5313_v12 = vpop.eup %5312  ;;  %v3141_v37 = vadd.f32 %v3140_v43, %v3069_v35  ;;  %4932 = vmatmul.mubr.msk.bf16.vlgmr.msra.gmra.mrb[80].mxu1 %vm7264_vm14, %v4250_v46  ;;  %v4238_v61 = vpack.c.bf16 %v3254_v26, %v3255_v56  ;;  %vm7681_vm14 = vcmp.eq.s32.totalorder %v6574_v63, 1 }
 0x70a   :  { %v3186_v9 = vmul.f32 %v3177_v16, %v3150_v31  ;;  %v3178_v38 = vadd.f32 1.0, %v5313_v12  ;;  %4935 = vmatprep.mubr.msk.bf16.mxu1 %vm5525_vm0, %v5524_v0  ;;  %v5206_v16 = vld [vmem:[#allocation13 + $0x10] sm:$0xff]   ;;  %v5208_v12 = vld [vmem:[#allocation13 + $0x20] sm:$0xff]  }
 0x70b   :  { %v3163_v7 = vmul.f32 0.70710677, %v3141_v37  ;;  %v3154_v27 = vmul.f32 0.5, %v3141_v37  ;;  %v5209_v37 = vld [vmem:[#allocation13 + $0x28] sm:$0xff]  }
 0x70c   :  { %v3244_v39 = vrot.slane %v3186_v9, 4  ;;  %v3187_v4 = vmul.f32 %v3178_v38, %v3151_v60 }
 0x70d   :  { %5318 = verf.f32 %v3163_v7 }
 0x70e   :  { %v3245_v45 = vrot.slane %v3187_v4, 4  ;;  %v3253_v14 = vsel %vm2719_vm9, %v3243_v22, %v3244_v39  ;;  %v3283_v32 = vpack.c.bf16 %v3187_v4, %v3186_v9 }
 0x70f   :  { %v5315_v43 = vpop.eup %5314  ;;  %v4253_v23 = vpack.c.bf16 %v3253_v14, %v3254_v26  ;;  %v5207_v26 = vld [vmem:[#allocation13 + $0x18] sm:$0xff]  }
 0x710   :  { %v3179_v33 = vadd.f32 1.0, %v5315_v43  ;;  %v3252_v19 = vsel %vm2719_vm9, %v3244_v39, %v3245_v45 }
 0x711   :  { %v5317_v59 = vpop.eup %5316  ;;  %4936 = vmatmul.mubr.msk.bf16.gmra.mrb[84].mxu1 %vm7281_vm5, %v4253_v23  ;;  %v4241_v62 = vpack.c.bf16 %v3252_v19, %v3253_v14  ;;  %vm7682_vm5 = vcmp.eq.s32.totalorder %v6582_v51, 1 }
 0x712   :  { %v3188_v44 = vmul.f32 %v3179_v33, %v3152_v21  ;;  %v3180_v1 = vadd.f32 1.0, %v5317_v59  ;;  %4939 = vmatprep.mubr.msk.bf16.mxu1 %vm5525_vm0, %v5524_v0 }
 0x714   :  { %v3246_v5 = vrot.slane %v3188_v44, 4  ;;  %v3189_v28 = vmul.f32 %v3180_v1, %v3153_v6 }
 0x716   :  { %v3247_v42 = vrot.slane %v3189_v28, 4  ;;  %v3251_v15 = vsel %vm2719_vm9, %v3245_v45, %v3246_v5  ;;  %v3284_v47 = vpack.c.bf16 %v3189_v28, %v3188_v44 }
 0x717   :  { %v5319_v2 = vpop.eup %5318  ;;  %v4256_v50 = vpack.c.bf16 %v3251_v15, %v3252_v19  ;;  %v7477_v19 = vld [vmem:[%s7560_s17] ss:$0 sm:$0xff] }
 0x718   :  { %v3181_v22 = vadd.f32 1.0, %v5319_v2  ;;  %v3250_v54 = vsel %vm2719_vm9, %v3246_v5, %v3247_v42  ;;  %v7484_v5 = vld [vmem:[%s7556_s13] ss:$0 sm:$0xff] }
 0x719   :  { %4940 = vmatmul.mubr.msk.bf16.gmra.mrb[88].mxu1 %vm7307_vm10, %v4256_v50  ;;  %v4244_v49 = vpack.c.bf16 %v3250_v54, %v3251_v15  ;;  %vm7684_vm10 = vcmp.eq.s32.totalorder %v6596_v24, 1 }
 0x71a   :  { %v3190_v56 = vmul.f32 %v3181_v22, %v3154_v27  ;;  %4943 = vmatprep.mubr.msk.bf16.mxu1 %vm5525_vm0, %v5524_v0 }
 0x71c   :  { %v3248_v53 = vrot.slane %v3190_v56, 4  ;;  %v3285_v30 = vpack.c.bf16 %v3190_v56, %v3190_v56 }
 0x71e   :  { %v3257_v3 = vsel %vm2719_vm9, %v3248_v53, %v3240_v10  ;;  %v3249_v46 = vsel %vm2719_vm9, %v3247_v42, %v3248_v53  ;;  %v5203_v10 = vld [vmem:[#allocation12 + $0x38] sm:$0xff]   ;;  %vm7680_vm9 = vcmp.eq.s32.totalorder %v6584_v20, 1 }
 0x71f   :  { %v4235_v35 = vpack.c.bf16 %v7395_v40, %v3257_v3  ;;  %v4259_v31 = vpack.c.bf16 %v3249_v46, %v3250_v54  ;;  %v4262_v48 = vpack.c.bf16 %v3257_v3, %v3257_v3  ;;  %v4247_v41 = vpack.c.bf16 %v3249_v46, %v3249_v46  ;;  %v5204_v40 = vld [vmem:[#allocation13] sm:$0xff]  }
 0x720   :  { %4972 = vmatpush3.bf16.msra.mxu1 %v5204_v40 }
 0x721   :  { %4236 = vmatmul.mubr.msk.bf16.vlgmr.msra.gmra.mrb[120].mxu0 %vm7298_vm6, %v4235_v35  ;;  %4944 = vmatmul.mubr.msk.bf16.gmra.mrb[92].mxu1 %vm7329_vm12, %v4259_v31  ;;  %vm7683_vm6 = vcmp.eq.s32.totalorder %v6599_v58, 1  ;;  %vm7686_vm12 = vcmp.eq.s32.totalorder %v6578_v18, 1 }
 0x722   :  { %3481 = vmatprep.mubr.bf16.mxu0 %v3282_v36  ;;  %4947 = vmatprep.mubr.msk.bf16.mxu1 %vm5525_vm0, %v5524_v0  ;;  %v5205_v36 = vld [vmem:[#allocation13 + $0x8] sm:$0xff]  }
 0x723   :  { %4952 = vmatpush3.bf16.msra.mxu0 %v5196_v13  ;;  %4973 = vmatprep.subr.bf16.mxu1 %v5524_v0 }
 0x724   :  { %4953 = vmatprep.subr.bf16.mxu0 %v5524_v0  ;;  %4974 = vmatpush3.bf16.msra.mxu1 %v5205_v36 }
 0x725   :  { %4975 = vmatprep.subr.bf16.mxu1 %v5524_v0 }
 0x727   :  { %4954 = vmatpush3.bf16.msra.mxu0 %v5197_v29 }
 0x728   :  { %4955 = vmatprep.subr.bf16.mxu0 %v5524_v0  ;;  %4976 = vmatpush3.bf16.msra.mxu1 %v5206_v16 }
 0x729   :  { %4239 = vmatmul.mubr.msk.bf16.gmra.mrb[124].mxu0 %vm7317_vm1, %v4238_v61  ;;  %4948 = vmatmul.mubr.msk.bf16.gmra.mrb[96].mxu1 %vm7346_vm15, %v4262_v48  ;;  %vm7685_vm1 = vcmp.eq.s32.totalorder %v6612_v34, 1  ;;  %vm3661_vm15 = vcmask 1042434  }
 0x72a   :  { %3489 = vmatprep.mubr.bf16.mxu0 %v3283_v32  ;;  %4987 = vmatprep.mubr.msk.bf16.mxu1 %vm5525_vm0, %v5524_v0 }
 0x72b   :  { %4956 = vmatpush3.bf16.msra.mxu0 %v5198_v55  ;;  %4977 = vmatprep.subr.bf16.mxu1 %v5524_v0 }
 0x72c   :  { %4957 = vmatprep.subr.bf16.mxu0 %v5524_v0  ;;  %4978 = vmatpush3.bf16.msra.mxu1 %v5207_v26 }
 0x72d   :  { %4979 = vmatprep.subr.bf16.mxu1 %v5524_v0 }
 0x72f   :  { %4958 = vmatpush3.bf16.msra.mxu0 %v5199_v57 }
 0x730   :  { %4959 = vmatprep.subr.bf16.mxu0 %v5524_v0  ;;  %4980 = vmatpush3.bf16.msra.mxu1 %v5208_v12 }
 0x731   :  { %4242 = vmatmul.mubr.msk.bf16.gmra.mrb[128].mxu0 %vm7337_vm8, %v4241_v62  ;;  %4981 = vmatprep.subr.bf16.mxu1 %v5524_v0  ;;  %vm7687_vm8 = vcmp.eq.s32.totalorder %v6633_v25, 1  ;;  %v5210_v25 = vld [vmem:[#allocation13 + $0x30] sm:$0xff]  }
 0x732   :  { %3497 = vmatprep.mubr.bf16.mxu0 %v3284_v47 }
 0x733   :  { %4960 = vmatpush3.bf16.msra.mxu0 %v5200_v52 }
 0x734   :  { %4961 = vmatprep.subr.bf16.mxu0 %v5524_v0  ;;  %4982 = vmatpush3.bf16.msra.mxu1 %v5209_v37 }
 0x735   :  { %4983 = vmatprep.subr.bf16.mxu1 %v5524_v0 }
 0x737   :  { %4962 = vmatpush3.bf16.msra.mxu0 %v5201_v17 }
 0x738   :  { %4963 = vmatprep.subr.bf16.mxu0 %v5524_v0  ;;  %4984 = vmatpush3.bf16.msra.mxu1 %v5210_v25 }
 0x739   :  { %4245 = vmatmul.mubr.msk.bf16.gmra.mrb[132].mxu0 %vm7354_vm4, %v4244_v49  ;;  %4985 = vmatprep.subr.bf16.mxu1 %v5524_v0 }
 0x73a   :  { %3505 = vmatprep.mubr.bf16.mxu0 %v3285_v30 }
 0x73b   :  { %4964 = vmatpush3.bf16.msra.mxu0 %v5202_v11 }
 0x73c   :  { %4965 = vmatprep.subr.bf16.mxu0 %v5524_v0 }
 0x73f   :  { %4966 = vmatpush3.bf16.msra.mxu0 %v5203_v10 }
 0x741   :  { %4248 = vmatmul.mubr.msk.bf16.gmra.mrb[136].mxu0 %vm7360_vm3, %v4247_v41 }
 0x742   :  { %4967 = vmatprep.mubr.msk.bf16.mxu0 %vm5525_vm0, %v5524_v0  ;;  %vm7679_vm0 = vcmp.eq.s32.totalorder %v6572_v8, 1 }
 0x7dc   :  { %v3547_v61 = vpop.f32.mrb[80].mxu1 }
 0x7dd   :  { %v4933_v9 = vpop.f32.mrb[81].mxu1 }
 0x7de   :  { %v3550_v60 = vpop.f32.mrb[82].mxu1 }
 0x7df   :  { %v4934_v38 = vpop.f32.mrb[83].mxu1 }
 0x7e4   :  { %v3555_v7 = vpop.f32.mrb[84].mxu1 }
 0x7e5   :  { %v4937_v39 = vpop.f32.mrb[85].mxu1 }
 0x7e6   :  { %v3558_v4 = vpop.f32.mrb[86].mxu1 }
 0x7e7   :  { %v4938_v45 = vpop.f32.mrb[87].mxu1 }
 0x7ec   :  { %v3563_v14 = vpop.f32.mrb[88].mxu1 }
 0x7ed   :  { %v4941_v32 = vpop.f32.mrb[89].mxu1 }
 0x7ee   :  { %v3566_v43 = vpop.f32.mrb[90].mxu1 }
 0x7ef   :  { %v4942_v23 = vpop.f32.mrb[91].mxu1 }
 0x7f4   :  { %v4616_v21 = vpop.f32.mrb[120].mxu0  ;;  %v7472_v33 = vpop.f32.mrb[92].mxu1 }
 0x7f5   :  { %v4617_v59 = vpop.f32.mrb[121].mxu0  ;;  %v4945_v62 = vpop.f32.mrb[93].mxu1 }
 0x7f6   :  { %v4618_v44 = vadd.f32 %v4617_v59, %v4616_v21  ;;  %v4619_v6 = vpop.f32.mrb[122].mxu0  ;;  %v7479_v1 = vpop.f32.mrb[94].mxu1 }
 0x7f7   :  { %v4620_v28 = vpop.f32.mrb[123].mxu0  ;;  %v4946_v42 = vpop.f32.mrb[95].mxu1 }
 0x7f8   :  { %v3476_v15 = vadd.f32 %v4618_v44, %v7477_v19  ;;  %v4621_v47 = vadd.f32 %v4620_v28, %v4619_v6 }
 0x7fa   :  { %v4991_v2 = vadd.f32 %v7484_v5, %v3476_v15  ;;  %v3479_v50 = vadd.f32 %v4621_v47, %v7477_v19 }
 0x7fc   :  { %v4992_v27 = vadd.f32 %v4991_v2, %v3547_v61  ;;  %v4993_v22 = vadd.f32 %v7484_v5, %v3479_v50  ;;  %v4622_v54 = vpop.f32.mrb[124].mxu0  ;;  %v7490_v49 = vpop.f32.mrb[96].mxu1 }
 0x7fd   :  { %v4623_v56 = vpop.f32.mrb[125].mxu0  ;;  %v4949_v53 = vpop.f32.mrb[97].mxu1 }
 0x7fe   :  { %v4994_v3 = vadd.f32 %v4993_v22, %v3550_v60  ;;  %v4624_v46 = vadd.f32 %v4623_v56, %v4622_v54  ;;  %v4625_v35 = vpop.f32.mrb[126].mxu0  ;;  %v3582_v31 = vpop.f32.mrb[98].mxu1  ;;  %v3594_v10 = vsel %vm7679_vm0, %v4992_v27, -inf }
 0x7ff   :  { %v4626_v48 = vpop.f32.mrb[127].mxu0  ;;  %v4950_v30 = vpop.f32.mrb[99].mxu1 }
 0x800   :  { %v3484_v41 = vadd.f32 %v4624_v46, %v7477_v19  ;;  %v4627_v13 = vadd.f32 %v4626_v48, %v4625_v35  ;;  %v3595_v61 = vsel %vm7681_vm14, %v4994_v3, -inf }
 0x802   :  { %v4995_v29 = vadd.f32 %v7484_v5, %v3484_v41  ;;  %v3487_v55 = vadd.f32 %v4627_v13, %v7477_v19 }
 0x804   :  { %v4996_v57 = vadd.f32 %v4995_v29, %v3555_v7  ;;  %v4997_v52 = vadd.f32 %v7484_v5, %v3487_v55  ;;  %v4628_v17 = vpop.f32.mrb[128].mxu0 }
 0x805   :  { %v4629_v11 = vpop.f32.mrb[129].mxu0 }
 0x806   :  { %v3596_v40 = vsel %vm7680_vm9, %v4996_v57, -inf  ;;  %v4998_v36 = vadd.f32 %v4997_v52, %v3558_v4  ;;  %v4630_v16 = vadd.f32 %v4629_v11, %v4628_v17  ;;  %v4631_v26 = vpop.f32.mrb[130].mxu0 }
 0x807   :  { %v3603_v12 = vmax.f32 %v3594_v10, %v3596_v40  ;;  %v4632_v37 = vpop.f32.mrb[131].mxu0 }
 0x808   :  { %v3492_v9 = vadd.f32 %v4630_v16, %v7477_v19  ;;  %v4633_v60 = vadd.f32 %v4632_v37, %v4631_v26  ;;  %v3597_v6 = vsel %vm7682_vm5, %v4998_v36, -inf }
 0x809   :  { %v3604_v38 = vmax.f32 %v3603_v12, %v3595_v61 }
 0x80a   :  { %v4999_v7 = vadd.f32 %v7484_v5, %v3492_v9  ;;  %v3495_v8 = vadd.f32 %v4633_v60, %v7477_v19 }
 0x80b   :  { %v3605_v39 = vrot.slane %v3604_v38, 4 }
 0x80c   :  { %v5000_v45 = vadd.f32 %v4999_v7, %v3563_v14  ;;  %v5001_v20 = vadd.f32 %v7484_v5, %v3495_v8  ;;  %v4634_v4 = vpop.f32.mrb[132].mxu0  ;;  %v5211_v7 = vld [vmem:[#allocation13 + $0x38] sm:$0xff]   ;;  %v4264_v8 = vld [vmem:[%s7562_s19] ss:$0 sm:$0xff] }
 0x80d   :  { %v3606_v32 = vmax.f32 %v3604_v38, %v3605_v39  ;;  %v4635_v23 = vpop.f32.mrb[133].mxu0  ;;  %4986 = vmatpush3.bf16.msra.mxu1 %v5211_v7 }
 0x80e   :  { %v5002_v21 = vadd.f32 %v5001_v20, %v3566_v43  ;;  %v4636_v59 = vadd.f32 %v4635_v23, %v4634_v4  ;;  %v4637_v62 = vpop.f32.mrb[134].mxu0  ;;  %v3598_v47 = vsel %vm7684_vm10, %v5000_v45, -inf  ;;  %v4273_v45 = vld [vmem:[%s7563_s20] ss:$0 sm:$0xff] }
 0x80f   :  { %v3607_v63 = vrot.slane %v3606_v32, 2  ;;  %v4638_v44 = vpop.f32.mrb[135].mxu0 }
 0x810   :  { %v3599_v28 = vsel %vm7683_vm6, %v5002_v21, -inf  ;;  %v3500_v42 = vadd.f32 %v4636_v59, %v7477_v19  ;;  %v4639_v15 = vadd.f32 %v4638_v44, %v4637_v62  ;;  %v4275_v44 = vld [vmem:[%s7566_s23] ss:$0 sm:$0xff]  ;;  %s7688_s23 = sld [smem:[#allocation29_spill]] }
 0x811   :  { %v3611_v14 = vmax.f32 %v3597_v6, %v3599_v28  ;;  %v3608_v50 = vmax.f32 %v3606_v32, %v3607_v63  ;;  %v4274_v32 = vld [vmem:[%s7564_s21] ss:$0 sm:$0xff] }
 0x812   :  { %v5003_v2 = vadd.f32 %v7484_v5, %v3500_v42  ;;  %v3503_v43 = vadd.f32 %v4639_v15, %v7477_v19 }
 0x813   :  { %v3612_v27 = vmax.f32 %v3611_v14, %v3598_v47  ;;  %v3609_v35 = vrot.slane %v3608_v50, 1 }
 0x814   :  { %v5004_v22 = vadd.f32 %v5003_v2, %v7472_v33  ;;  %v5005_v51 = vadd.f32 %v7484_v5, %v3503_v43  ;;  %v4640_v54 = vpop.f32.mrb[136].mxu0 }
 0x815   :  { %v3613_v58 = vrot.slane %v3612_v27, 4  ;;  %v4641_v56 = vpop.f32.mrb[137].mxu0  ;;  %v3610_v13 = vmax.f32 %v3608_v50, %v3609_v35 }
 0x816   :  { %v5006_v53 = vadd.f32 %v5005_v51, %v7479_v1  ;;  %v4642_v3 = vadd.f32 %v4641_v56, %v4640_v54  ;;  %v4643_v46 = vpop.f32.mrb[138].mxu0  ;;  %v3600_v57 = vsel %vm7685_vm1, %v5004_v22, -inf }
 0x817   :  { %v3614_v24 = vmax.f32 %v3612_v27, %v3613_v58  ;;  %v4644_v31 = vpop.f32.mrb[139].mxu0  ;;  %v3643_v52 = vpack.c.bf16 %v3610_v13, %v3610_v13 }
 0x818   :  { %v3508_v48 = vadd.f32 %v4642_v3, %v7477_v19  ;;  %v3601_v19 = vsel %vm7687_vm8, %v5006_v53, -inf }
 0x819   :  { %v3615_v30 = vrot.slane %v3614_v24, 2 }
 0x81a   :  { %v5007_v41 = vadd.f32 %v7484_v5, %v3508_v48  ;;  %v3656_v5 = vunpack.c.l.b16 %v3643_v52 }
 0x81b   :  { %v3616_v29 = vmax.f32 %v3614_v24, %v3615_v30 }
 0x81c   :  { %v5008_v33 = vadd.f32 %v5007_v41, %v7490_v49 }
 0x81d   :  { %v3617_v55 = vrot.slane %v3616_v29, 1 }
 0x81e   :  { %v3602_v1 = vsel %vm7686_vm12, %v5008_v33, -inf }
 0x81f   :  { %v3618_v17 = vmax.f32 %v3616_v29, %v3617_v55  ;;  %v3619_v11 = vmax.f32 %v3600_v57, %v3602_v1 }
 0x821   :  { %v3644_v10 = vpack.c.bf16 %v3618_v17, %v3618_v17  ;;  %v3620_v40 = vmax.f32 %v3619_v11, %v3601_v19 }
 0x823   :  { %v3657_v36 = vunpack.c.l.b16 %v3644_v10  ;;  %v3621_v16 = vrot.slane %v3620_v40, 4 }
 0x825   :  { %v3622_v49 = vmax.f32 %v3620_v40, %v3621_v16  ;;  %v3660_v26 = vsel %vm3659_vm11, %v3657_v36, %v3656_v5 }
 0x827   :  { %v3623_v12 = vrot.slane %v3622_v49, 2 }
 0x829   :  { %v3624_v34 = vmax.f32 %v3622_v49, %v3623_v12 }
 0x82b   :  { %v3625_v37 = vrot.slane %v3624_v34, 1 }
 0x82d   :  { %v3626_v61 = vmax.f32 %v3624_v34, %v3625_v37 }
 0x82f   :  { %v3645_v18 = vpack.c.bf16 %v3626_v61, %v3626_v61 }
 0x831   :  { %v3658_v9 = vunpack.c.l.b16 %v3645_v18 }
 0x833   :  { %v3662_v60 = vsel %vm3661_vm15, %v3658_v9, %v3660_v26 }
 0x834   :  { %v3663_v38 = vpack.c.b16 %v3662_v60, %v3662_v60 }
 0x836   :  { %4968 = vmatmul.mubr.bf16.vlgmr.msra.gmra.mrb[140].mxu0 %v3663_v38 }
 0x909   :  { %v3747_v39 = vpop.f32.mrb[140].mxu0 }
 0x90a   :  { %v3748_v20 = vadd.f32 %v4264_v8, %v3747_v39  ;;  %v4969_v4 = vpop.f32.mrb[141].mxu0 }
 0x90b   :  { %v3750_v23 = vpop.f32.mrb[142].mxu0 }
 0x90c   :  { %v3760_v21 = vmul.f32 %v4273_v45, %v3748_v20  ;;  %v4970_v0 = vpop.f32.mrb[143].mxu0 }
 0x90e   :  { %v3768_v59 = vadd.f32 %v4274_v32, %v3760_v21 }
 0x910   :  { %v3769_v62 = vmax.f32 %v3768_v59, 0.0 }
 0x912   :  { %v3786_v63 = vpack.c.bf16 %v3769_v62, %v3769_v62 }
 0x914   :  { %4988 = vmatmul.mubr.bf16.vlgmr.msra.gmra.mrb[120].mxu1 %v3786_v63 }
 0x9e7   :  { %v3876_v6 = vpop.f32.mrb[120].mxu1 }
 0x9e8   :  { %v3877_v28 = vadd.f32 %v4275_v44, %v3876_v6  ;;  %v4989_v42 = vpop.f32.mrb[121].mxu1 }
 0x9e9   :  { %v3879_v15 = vpop.f32.mrb[122].mxu1 }
 0x9ea   :  { %v4284_v14 = vmul.f32 -1.442695, %v3877_v28  ;;  %v4990_v47 = vpop.f32.mrb[123].mxu1 }
 0x9ec   :  { %5320 = vpow2.f32 %v4284_v14 }
 0x9f6   :  { %v5321_v2 = vpop.eup %5320 }
 0x9f7   :  { %v3885_v43 = vadd.f32 1.0, %v5321_v2 }
 0x9f9   :  { %5322 = vrcp.f32 %v3885_v43 }
 0xa03   :  { %v5323_v50 = vpop.eup %5322 }
 0xa04   :  { %v4285_v27 = vmul.f32 -1.442695, %v5323_v50 }
 0xa06   :  { %5324 = vpow2.f32 %v4285_v27 }
 0xa10   :  { %v5325_v22 = vpop.eup %5324 }
 0xa11   :  { %v3891_v51 = vadd.f32 1.0, %v5325_v22 }
 0xa13   :  { %5326 = vrcp.f32 %v3891_v51 }
 0xa1d   :  { %v5327_v54 = vpop.eup %5326 }
 0xa1e   :  { %3894 = vst [vmem:[%s7688_s23] sm:$0x7] %v5327_v54 }
 0xa1f   :  { %3899 = vsyncpa [#allocation3], 1 }
 0xa20   :  { %3900 = vsyncpa [#allocation5], 1 }
 0xa21   :  { %3901 = vsyncpa [#allocation8], 1 }
 0xa22   :  { %3902 = vsyncpa [#allocation11], 1 }
 0xa23   :  { %3903 = vsyncpa [#allocation14], 1 }

</bundles_post_ra>
